<compile_context>
chip_gen: v6e
topology: v6e:2x2x1
jax: 0.10.0
libtpu: 0.0.40
codegen_flags: <defaults>
</compile_context>

<pallas_src>
import jax
import jax.numpy as jnp
from jax.experimental import pallas as pl
from jax.experimental.pallas import tpu as pltpu

HIDDEN = 128
IN_Z = 216
IN_X = 491
IN_X_PAD = 512          # pad 491 -> 512 for clean lane tiles
DENSE = 512
OUT = 3
OUT_PAD = 128           # lane-dense output slab; wrapper slices [:, :OUT]
MAX_TB = 128            # batch tile (sweep 64/128/256; 128 fills an MXU pass)


def relation_score_kernel(
    z_ref, x_ref,
    w_ih_ref, w_hh_ref, b_lstm_ref,
    w1h_ref, w1x_ref, b1_ref,
    w_mid_ref, b_mid_ref,          # stacked dense2..dense5
    w6_ref, b6_ref,
    out_ref,
):
    H = HIDDEN
    tb = x_ref.shape[0]
    T = z_ref.shape[0] // tb

    # ---------------- LSTM ----------------
    # Hoisted input->hidden projection: one (T*tb, 216) x (216, 4H) bf16 matmul
    # (f32 accumulation) instead of T tiny matmuls inside the recurrence.
    zg = (jnp.dot(z_ref[...], w_ih_ref[...],
                  preferred_element_type=jnp.float32)
          + b_lstm_ref[...])                                  # (T*tb, 4H) f32

    w_hh = w_hh_ref[...]                                      # (H, 4H) bf16

    def lstm_step(g_in, h, c):
        # PyTorch gate order: i, f, g, o.  Only h @ W_hh is serial.
        gates = g_in + jnp.dot(h.astype(jnp.bfloat16), w_hh,
                               preferred_element_type=jnp.float32)
        i_g = jax.nn.sigmoid(gates[:, 0:H])
        f_g = jax.nn.sigmoid(gates[:, H:2 * H])
        g_g = jnp.tanh(gates[:, 2 * H:3 * H])
        o_g = jax.nn.sigmoid(gates[:, 3 * H:4 * H])
        c = f_g * c + i_g * g_g
        h = o_g * jnp.tanh(c)
        return h, c

    h = jnp.zeros((tb, H), jnp.float32)
    c = jnp.zeros((tb, H), jnp.float32)

    if T <= 16:
        # Short sequences: static unroll (full LLO scheduling visibility).
        for t in range(T):
            h, c = lstm_step(zg[t * tb:(t + 1) * tb, :], h, c)
    else:
        # Long sequences: bounded live ranges / code size via fori_loop carry.
        zg3 = zg.reshape(T, tb, 4 * H)

        def body(t, carry):
            hh, cc = carry
            g_in = jax.lax.dynamic_index_in_dim(zg3, t, axis=0, keepdims=False)
            return lstm_step(g_in, hh, cc)

        h, c = jax.lax.fori_loop(0, T, body, (h, c), unroll=2)

    # ---------------- MLP head ----------------
    # lstm_out[:, -1, :] == h (final hidden state of the single-layer LSTM).
    x = x_ref[...]                                            # (tb, 512) bf16, zero-padded

    a = (jnp.dot(h.astype(jnp.bfloat16), w1h_ref[...],
                 preferred_element_type=jnp.float32)
         + jnp.dot(x, w1x_ref[...], preferred_element_type=jnp.float32)
         + b1_ref[...])
    a = jnp.maximum(a, 0.0)

    # dense2..dense5 (stacked): static index into the (4, 512, 512) weight slab.
    for k in range(4):
        y = (jnp.dot(a.astype(jnp.bfloat16), w_mid_ref[k],
                     preferred_element_type=jnp.float32)
             + b_mid_ref[k:k + 1, :])
        a = jnp.maximum(y, 0.0)

    # Lane-dense (tb, 128) logits slab (w6/b6 zero-padded past column 3).
    logits = jnp.dot(a.astype(jnp.bfloat16), w6_ref[...],
                     preferred_element_type=jnp.float32) + b6_ref[...]
    out_ref[...] = jax.nn.sigmoid(logits)


def prepare_params(params):
    """Pad + cast + stack the f32 reference params into kernel-ready form (once)."""
    bf16 = jnp.bfloat16
    f32 = jnp.float32
    w1x = jnp.pad(params["w1x"], ((0, IN_X_PAD - IN_X), (0, 0)))
    w6 = jnp.pad(params["w6"], ((0, 0), (0, OUT_PAD - OUT)))
    b6 = jnp.pad(params["b6"], ((0, 0), (0, OUT_PAD - OUT)))
    w_mid = jnp.stack([params["w2"], params["w3"], params["w4"], params["w5"]])
    b_mid = jnp.concatenate([params["b2"], params["b3"],
                             params["b4"], params["b5"]], axis=0)
    return (
        params["w_ih"].astype(bf16),        # (216, 4H)
        params["w_hh"].astype(bf16),        # (H, 4H)
        params["b_lstm"].astype(f32),       # (1, 4H)
        params["w1h"].astype(bf16),         # (H, 512)
        w1x.astype(bf16),                   # (512, 512)
        params["b1"].astype(f32),           # (1, 512)
        w_mid.astype(bf16),                 # (4, 512, 512)
        b_mid.astype(f32),                  # (4, 512)
        w6.astype(bf16),                    # (512, 128)
        b6.astype(f32),                     # (1, 128)
    )


def _choose_tb(B):
    # 128 rows fills an MXU pass on v5e and most of the 256-wide MXU on
    # v6e/v7x; round tiny batches up to a multiple of 16 (bf16 sublane pack).
    return min(MAX_TB, ((B + 15) // 16) * 16)


def relation_score_forward(z, x, kparams):
    """z: (B, T, 216) f32, x: (B, 491) f32, kparams: prepare_params(...)."""
    B, T, _ = z.shape
    TB = _choose_tb(B)
    B_pad = ((B + TB - 1) // TB) * TB
    nb = B_pad // TB

    z = jnp.pad(z, ((0, B_pad - B), (0, 0), (0, 0)))
    x = jnp.pad(x, ((0, B_pad - B), (0, IN_X_PAD - IN_X)))

    # Time-major within each batch tile: row = tile*(T*TB) + t*TB + b_local,
    # so zg[t*TB:(t+1)*TB] inside the kernel is a sublane-aligned static slice.
    # bf16 cast fused into this (already HBM-bound) repacking pass: halves the
    # z DMA into the kernel and removes the in-kernel VPU cast.
    z_r = (z.astype(jnp.bfloat16)
             .reshape(nb, TB, T, IN_Z)
             .transpose(0, 2, 1, 3)
             .reshape(nb * T * TB, IN_Z))
    x_bf = x.astype(jnp.bfloat16)

    def const_map(ndim):
        return lambda i: (0,) * ndim

    in_specs = (
        [pl.BlockSpec((T * TB, IN_Z), lambda i: (i, 0)),
         pl.BlockSpec((TB, IN_X_PAD), lambda i: (i, 0))]
        # Constant index_map -> each weight is DMA'd once and stays
        # VMEM-resident across all batch tiles.
        + [pl.BlockSpec(p.shape, const_map(p.ndim)) for p in kparams]
    )

    out = pl.pallas_call(
        relation_score_kernel,
        out_shape=jax.ShapeDtypeStruct((B_pad, OUT_PAD), jnp.float32),
        grid=(nb,),
        in_specs=in_specs,
        out_specs=pl.BlockSpec((TB, OUT_PAD), lambda i: (i, 0)),
        compiler_params=pltpu.CompilerParams(
            dimension_semantics=("parallel",),   # batch tiles are independent
            vmem_limit_bytes=48 << 20,           # headroom under v7x's 64 MiB
        ),
    )(z_r, x_bf, *kparams)

    return out[:B, :OUT]


def init_params(key):
    ks = jax.random.split(key, 16)
    s = 0.05

    def w(k, shape):
        return jax.random.normal(k, shape, jnp.float32) * s

    return {
        # LSTM: PyTorch stores W_ih (4H, 216), W_hh (4H, 128); we store transposed.
        "w_ih": w(ks[0], (IN_Z, 4 * HIDDEN)),
        "w_hh": w(ks[1], (HIDDEN, 4 * HIDDEN)),
        "b_lstm": w(ks[2], (1, 4 * HIDDEN)),          # b_ih + b_hh combined
        # dense1: (491+128, 512) split into h-part and x-part
        "w1h": w(ks[3], (HIDDEN, DENSE)),
        "w1x": w(ks[4], (IN_X, DENSE)),
        "b1": w(ks[5], (1, DENSE)),
        "w2": w(ks[6], (DENSE, DENSE)), "b2": w(ks[7], (1, DENSE)),
        "w3": w(ks[8], (DENSE, DENSE)), "b3": w(ks[9], (1, DENSE)),
        "w4": w(ks[10], (DENSE, DENSE)), "b4": w(ks[11], (1, DENSE)),
        "w5": w(ks[12], (DENSE, DENSE)), "b5": w(ks[13], (1, DENSE)),
        "w6": w(ks[14], (DENSE, OUT)), "b6": w(ks[15], (1, OUT)),
    }


def relation_score_reference(z, x, params):
    """Pure-JAX f32 reference (mirrors the PyTorch forward)."""
    B, T, _ = z.shape
    H = HIDDEN
    h = jnp.zeros((B, H), jnp.float32)
    c = jnp.zeros((B, H), jnp.float32)
    for t in range(T):
        gates = z[:, t, :] @ params["w_ih"] + h @ params["w_hh"] + params["b_lstm"]
        i_g = jax.nn.sigmoid(gates[:, :H])
        f_g = jax.nn.sigmoid(gates[:, H:2 * H])
        g_g = jnp.tanh(gates[:, 2 * H:3 * H])
        o_g = jax.nn.sigmoid(gates[:, 3 * H:])
        c = f_g * c + i_g * g_g
        h = o_g * jnp.tanh(c)
    a = jnp.maximum(h @ params["w1h"] + x @ params["w1x"] + params["b1"], 0.0)
    for k in (2, 3, 4, 5):
        a = jnp.maximum(a @ params[f"w{k}"] + params[f"b{k}"], 0.0)
    return jax.nn.sigmoid(a @ params["w6"] + params["b6"])


if __name__ == "__main__":
    key = jax.random.PRNGKey(0)
    k_z, k_x, k_p = jax.random.split(key, 3)

    params = init_params(k_p)
    kparams = prepare_params(params)          # pad + bf16-cast + stack once

    # Small-shape check (batch tile rounds up to 16).
    B, T = 2, 8
    z = jax.random.normal(k_z, (B, T, IN_Z), jnp.float32)
    x = jax.random.normal(k_x, (B, IN_X), jnp.float32)
    out = jax.block_until_ready(relation_score_forward(z, x, kparams))
    ref = relation_score_reference(z, x, params)
    assert out.shape == (B, OUT)
    assert bool(jnp.all(jnp.isfinite(out)))
    assert bool(jnp.max(jnp.abs(out - ref)) < 5e-2)   # bf16-matmul tolerance

    # Multi-tile check: exercises the TB=128 path and batch padding (200 -> 256).
    B2 = 200
    z2 = jax.random.normal(k_z, (B2, T, IN_Z), jnp.float32)
    x2 = jax.random.normal(k_x, (B2, IN_X), jnp.float32)
    out2 = jax.block_until_ready(relation_score_forward(z2, x2, kparams))
    ref2 = relation_score_reference(z2, x2, params)
    assert out2.shape == (B2, OUT)
    assert bool(jnp.all(jnp.isfinite(out2)))
    assert bool(jnp.max(jnp.abs(out2 - ref2)) < 5e-2)

    print("KERNEL_OK")
</pallas_src>

<mosaic_0001>
module attributes {stable_mosaic.version = 11 : i64} {
  func.func @relation_score_kernel(%arg0: i32, %arg1: memref<128x216xbf16, #tpu.memory_space<vmem>>, %arg2: memref<16x512xbf16, #tpu.memory_space<vmem>>, %arg3: memref<216x512xbf16, #tpu.memory_space<vmem>>, %arg4: memref<128x512xbf16, #tpu.memory_space<vmem>>, %arg5: memref<1x512xf32, #tpu.memory_space<vmem>>, %arg6: memref<128x512xbf16, #tpu.memory_space<vmem>>, %arg7: memref<512x512xbf16, #tpu.memory_space<vmem>>, %arg8: memref<1x512xf32, #tpu.memory_space<vmem>>, %arg9: memref<4x512x512xbf16, #tpu.memory_space<vmem>>, %arg10: memref<4x512xf32, #tpu.memory_space<vmem>>, %arg11: memref<512x128xbf16, #tpu.memory_space<vmem>>, %arg12: memref<1x128xf32, #tpu.memory_space<vmem>>, %arg13: memref<16x128xf32, #tpu.memory_space<vmem>>) attributes {dimension_semantics = [#tpu.dimension_semantics<parallel>], iteration_bounds = array<i64: 1>, scalar_prefetch = 0 : i64, scratch_operands = 0 : i64, tpu.core_type = #tpu.core_type<tc>, window_params = [{transform_indices = @transform_0, window_bounds = array<i64: 128, 216>}, {transform_indices = @transform_1, window_bounds = array<i64: 16, 512>}, {pipeline_mode = #tpu.pipeline_mode<synchronous>, transform_indices = @transform_2, window_bounds = array<i64: 216, 512>}, {pipeline_mode = #tpu.pipeline_mode<synchronous>, transform_indices = @transform_3, window_bounds = array<i64: 128, 512>}, {pipeline_mode = #tpu.pipeline_mode<synchronous>, transform_indices = @transform_4, window_bounds = array<i64: 1, 512>}, {pipeline_mode = #tpu.pipeline_mode<synchronous>, transform_indices = @transform_5, window_bounds = array<i64: 128, 512>}, {pipeline_mode = #tpu.pipeline_mode<synchronous>, transform_indices = @transform_6, window_bounds = array<i64: 512, 512>}, {pipeline_mode = #tpu.pipeline_mode<synchronous>, transform_indices = @transform_7, window_bounds = array<i64: 1, 512>}, {pipeline_mode = #tpu.pipeline_mode<synchronous>, transform_indices = @transform_8, window_bounds = array<i64: 4, 512, 512>}, {pipeline_mode = #tpu.pipeline_mode<synchronous>, transform_indices = @transform_9, window_bounds = array<i64: 4, 512>}, {pipeline_mode = #tpu.pipeline_mode<synchronous>, transform_indices = @transform_10, window_bounds = array<i64: 512, 128>}, {pipeline_mode = #tpu.pipeline_mode<synchronous>, transform_indices = @transform_11, window_bounds = array<i64: 1, 128>}, {transform_indices = @transform_12, window_bounds = array<i64: 16, 128>}]} {
    %c0 = arith.constant 0 : index
    %c0_0 = arith.constant 0 : index
    %0 = vector.load %arg1[%c0, %c0_0] : memref<128x216xbf16, #tpu.memory_space<vmem>>, vector<128x216xbf16>
    %c0_1 = arith.constant 0 : index
    %c0_2 = arith.constant 0 : index
    %1 = vector.load %arg3[%c0_1, %c0_2] : memref<216x512xbf16, #tpu.memory_space<vmem>>, vector<216x512xbf16>
    %cst = arith.constant dense<0.000000e+00> : vector<128x512xf32>
    %2 = tpu.matmul %0, %1, %cst {dimension_numbers = #tpu.dot_dimension_numbers<[1], [0], [0], [1], [0, 0, 1, 1], [], []>} : vector<128x216xbf16>, vector<216x512xbf16>, vector<128x512xf32> -> vector<128x512xf32>
    %c0_3 = arith.constant 0 : index
    %c0_4 = arith.constant 0 : index
    %3 = vector.load %arg5[%c0_3, %c0_4] : memref<1x512xf32, #tpu.memory_space<vmem>>, vector<1x512xf32>
    %4 = vector.broadcast %3 : vector<1x512xf32> to vector<128x512xf32>
    %5 = arith.addf %2, %4 : vector<128x512xf32>
    %c0_5 = arith.constant 0 : index
    %c0_6 = arith.constant 0 : index
    %6 = vector.load %arg4[%c0_5, %c0_6] : memref<128x512xbf16, #tpu.memory_space<vmem>>, vector<128x512xbf16>
    %cst_7 = arith.constant 0.000000e+00 : f32
    %7 = vector.broadcast %cst_7 : f32 to vector<16x128xf32>
    %cst_8 = arith.constant 0.000000e+00 : f32
    %8 = vector.broadcast %cst_8 : f32 to vector<16x128xf32>
    %9 = vector.extract_strided_slice %5 {offsets = [0, 0], sizes = [16, 512], strides = [1, 1]} : vector<128x512xf32> to vector<16x512xf32>
    %10 = arith.truncf %7 : vector<16x128xf32> to vector<16x128xbf16>
    %cst_9 = arith.constant dense<0.000000e+00> : vector<16x512xf32>
    %11 = tpu.matmul %10, %6, %cst_9 {dimension_numbers = #tpu.dot_dimension_numbers<[1], [0], [0], [1], [0, 0, 1, 1], [], []>} : vector<16x128xbf16>, vector<128x512xbf16>, vector<16x512xf32> -> vector<16x512xf32>
    %12 = arith.addf %9, %11 : vector<16x512xf32>
    %13 = vector.extract_strided_slice %12 {offsets = [0, 0], sizes = [16, 128], strides = [1, 1]} : vector<16x512xf32> to vector<16x128xf32>
    %14 = arith.negf %13 : vector<16x128xf32>
    %15 = math.exp %14 : vector<16x128xf32>
    %cst_10 = arith.constant 1.000000e+00 : f32
    %16 = vector.broadcast %cst_10 : f32 to vector<16x128xf32>
    %17 = arith.addf %16, %15 : vector<16x128xf32>
    %18 = arith.divf %16, %17 : vector<16x128xf32>
    %19 = vector.extract_strided_slice %12 {offsets = [0, 128], sizes = [16, 128], strides = [1, 1]} : vector<16x512xf32> to vector<16x128xf32>
    %20 = arith.negf %19 : vector<16x128xf32>
    %21 = math.exp %20 : vector<16x128xf32>
    %cst_11 = arith.constant 1.000000e+00 : f32
    %22 = vector.broadcast %cst_11 : f32 to vector<16x128xf32>
    %23 = arith.addf %22, %21 : vector<16x128xf32>
    %24 = arith.divf %22, %23 : vector<16x128xf32>
    %25 = vector.extract_strided_slice %12 {offsets = [0, 256], sizes = [16, 128], strides = [1, 1]} : vector<16x512xf32> to vector<16x128xf32>
    %26 = math.tanh %25 : vector<16x128xf32>
    %27 = vector.extract_strided_slice %12 {offsets = [0, 384], sizes = [16, 128], strides = [1, 1]} : vector<16x512xf32> to vector<16x128xf32>
    %28 = arith.negf %27 : vector<16x128xf32>
    %29 = math.exp %28 : vector<16x128xf32>
    %cst_12 = arith.constant 1.000000e+00 : f32
    %30 = vector.broadcast %cst_12 : f32 to vector<16x128xf32>
    %31 = arith.addf %30, %29 : vector<16x128xf32>
    %32 = arith.divf %30, %31 : vector<16x128xf32>
    %33 = arith.mulf %24, %8 : vector<16x128xf32>
    %34 = arith.mulf %18, %26 : vector<16x128xf32>
    %35 = arith.addf %33, %34 : vector<16x128xf32>
    %36 = math.tanh %35 : vector<16x128xf32>
    %37 = arith.mulf %32, %36 : vector<16x128xf32>
    %38 = vector.extract_strided_slice %5 {offsets = [16, 0], sizes = [16, 512], strides = [1, 1]} : vector<128x512xf32> to vector<16x512xf32>
    %39 = arith.truncf %37 : vector<16x128xf32> to vector<16x128xbf16>
    %cst_13 = arith.constant dense<0.000000e+00> : vector<16x512xf32>
    %40 = tpu.matmul %39, %6, %cst_13 {dimension_numbers = #tpu.dot_dimension_numbers<[1], [0], [0], [1], [0, 0, 1, 1], [], []>} : vector<16x128xbf16>, vector<128x512xbf16>, vector<16x512xf32> -> vector<16x512xf32>
    %41 = arith.addf %38, %40 : vector<16x512xf32>
    %42 = vector.extract_strided_slice %41 {offsets = [0, 0], sizes = [16, 128], strides = [1, 1]} : vector<16x512xf32> to vector<16x128xf32>
    %43 = arith.negf %42 : vector<16x128xf32>
    %44 = math.exp %43 : vector<16x128xf32>
    %cst_14 = arith.constant 1.000000e+00 : f32
    %45 = vector.broadcast %cst_14 : f32 to vector<16x128xf32>
    %46 = arith.addf %45, %44 : vector<16x128xf32>
    %47 = arith.divf %45, %46 : vector<16x128xf32>
    %48 = vector.extract_strided_slice %41 {offsets = [0, 128], sizes = [16, 128], strides = [1, 1]} : vector<16x512xf32> to vector<16x128xf32>
    %49 = arith.negf %48 : vector<16x128xf32>
    %50 = math.exp %49 : vector<16x128xf32>
    %cst_15 = arith.constant 1.000000e+00 : f32
    %51 = vector.broadcast %cst_15 : f32 to vector<16x128xf32>
    %52 = arith.addf %51, %50 : vector<16x128xf32>
    %53 = arith.divf %51, %52 : vector<16x128xf32>
    %54 = vector.extract_strided_slice %41 {offsets = [0, 256], sizes = [16, 128], strides = [1, 1]} : vector<16x512xf32> to vector<16x128xf32>
    %55 = math.tanh %54 : vector<16x128xf32>
    %56 = vector.extract_strided_slice %41 {offsets = [0, 384], sizes = [16, 128], strides = [1, 1]} : vector<16x512xf32> to vector<16x128xf32>
    %57 = arith.negf %56 : vector<16x128xf32>
    %58 = math.exp %57 : vector<16x128xf32>
    %cst_16 = arith.constant 1.000000e+00 : f32
    %59 = vector.broadcast %cst_16 : f32 to vector<16x128xf32>
    %60 = arith.addf %59, %58 : vector<16x128xf32>
    %61 = arith.divf %59, %60 : vector<16x128xf32>
    %62 = arith.mulf %53, %35 : vector<16x128xf32>
    %63 = arith.mulf %47, %55 : vector<16x128xf32>
    %64 = arith.addf %62, %63 : vector<16x128xf32>
    %65 = math.tanh %64 : vector<16x128xf32>
    %66 = arith.mulf %61, %65 : vector<16x128xf32>
    %67 = vector.extract_strided_slice %5 {offsets = [32, 0], sizes = [16, 512], strides = [1, 1]} : vector<128x512xf32> to vector<16x512xf32>
    %68 = arith.truncf %66 : vector<16x128xf32> to vector<16x128xbf16>
    %cst_17 = arith.constant dense<0.000000e+00> : vector<16x512xf32>
    %69 = tpu.matmul %68, %6, %cst_17 {dimension_numbers = #tpu.dot_dimension_numbers<[1], [0], [0], [1], [0, 0, 1, 1], [], []>} : vector<16x128xbf16>, vector<128x512xbf16>, vector<16x512xf32> -> vector<16x512xf32>
    %70 = arith.addf %67, %69 : vector<16x512xf32>
    %71 = vector.extract_strided_slice %70 {offsets = [0, 0], sizes = [16, 128], strides = [1, 1]} : vector<16x512xf32> to vector<16x128xf32>
    %72 = arith.negf %71 : vector<16x128xf32>
    %73 = math.exp %72 : vector<16x128xf32>
    %cst_18 = arith.constant 1.000000e+00 : f32
    %74 = vector.broadcast %cst_18 : f32 to vector<16x128xf32>
    %75 = arith.addf %74, %73 : vector<16x128xf32>
    %76 = arith.divf %74, %75 : vector<16x128xf32>
    %77 = vector.extract_strided_slice %70 {offsets = [0, 128], sizes = [16, 128], strides = [1, 1]} : vector<16x512xf32> to vector<16x128xf32>
    %78 = arith.negf %77 : vector<16x128xf32>
    %79 = math.exp %78 : vector<16x128xf32>
    %cst_19 = arith.constant 1.000000e+00 : f32
    %80 = vector.broadcast %cst_19 : f32 to vector<16x128xf32>
    %81 = arith.addf %80, %79 : vector<16x128xf32>
    %82 = arith.divf %80, %81 : vector<16x128xf32>
    %83 = vector.extract_strided_slice %70 {offsets = [0, 256], sizes = [16, 128], strides = [1, 1]} : vector<16x512xf32> to vector<16x128xf32>
    %84 = math.tanh %83 : vector<16x128xf32>
    %85 = vector.extract_strided_slice %70 {offsets = [0, 384], sizes = [16, 128], strides = [1, 1]} : vector<16x512xf32> to vector<16x128xf32>
    %86 = arith.negf %85 : vector<16x128xf32>
    %87 = math.exp %86 : vector<16x128xf32>
    %cst_20 = arith.constant 1.000000e+00 : f32
    %88 = vector.broadcast %cst_20 : f32 to vector<16x128xf32>
    %89 = arith.addf %88, %87 : vector<16x128xf32>
    %90 = arith.divf %88, %89 : vector<16x128xf32>
    %91 = arith.mulf %82, %64 : vector<16x128xf32>
    %92 = arith.mulf %76, %84 : vector<16x128xf32>
    %93 = arith.addf %91, %92 : vector<16x128xf32>
    %94 = math.tanh %93 : vector<16x128xf32>
    %95 = arith.mulf %90, %94 : vector<16x128xf32>
    %96 = vector.extract_strided_slice %5 {offsets = [48, 0], sizes = [16, 512], strides = [1, 1]} : vector<128x512xf32> to vector<16x512xf32>
    %97 = arith.truncf %95 : vector<16x128xf32> to vector<16x128xbf16>
    %cst_21 = arith.constant dense<0.000000e+00> : vector<16x512xf32>
    %98 = tpu.matmul %97, %6, %cst_21 {dimension_numbers = #tpu.dot_dimension_numbers<[1], [0], [0], [1], [0, 0, 1, 1], [], []>} : vector<16x128xbf16>, vector<128x512xbf16>, vector<16x512xf32> -> vector<16x512xf32>
    %99 = arith.addf %96, %98 : vector<16x512xf32>
    %100 = vector.extract_strided_slice %99 {offsets = [0, 0], sizes = [16, 128], strides = [1, 1]} : vector<16x512xf32> to vector<16x128xf32>
    %101 = arith.negf %100 : vector<16x128xf32>
    %102 = math.exp %101 : vector<16x128xf32>
    %cst_22 = arith.constant 1.000000e+00 : f32
    %103 = vector.broadcast %cst_22 : f32 to vector<16x128xf32>
    %104 = arith.addf %103, %102 : vector<16x128xf32>
    %105 = arith.divf %103, %104 : vector<16x128xf32>
    %106 = vector.extract_strided_slice %99 {offsets = [0, 128], sizes = [16, 128], strides = [1, 1]} : vector<16x512xf32> to vector<16x128xf32>
    %107 = arith.negf %106 : vector<16x128xf32>
    %108 = math.exp %107 : vector<16x128xf32>
    %cst_23 = arith.constant 1.000000e+00 : f32
    %109 = vector.broadcast %cst_23 : f32 to vector<16x128xf32>
    %110 = arith.addf %109, %108 : vector<16x128xf32>
    %111 = arith.divf %109, %110 : vector<16x128xf32>
    %112 = vector.extract_strided_slice %99 {offsets = [0, 256], sizes = [16, 128], strides = [1, 1]} : vector<16x512xf32> to vector<16x128xf32>
    %113 = math.tanh %112 : vector<16x128xf32>
    %114 = vector.extract_strided_slice %99 {offsets = [0, 384], sizes = [16, 128], strides = [1, 1]} : vector<16x512xf32> to vector<16x128xf32>
    %115 = arith.negf %114 : vector<16x128xf32>
    %116 = math.exp %115 : vector<16x128xf32>
    %cst_24 = arith.constant 1.000000e+00 : f32
    %117 = vector.broadcast %cst_24 : f32 to vector<16x128xf32>
    %118 = arith.addf %117, %116 : vector<16x128xf32>
    %119 = arith.divf %117, %118 : vector<16x128xf32>
    %120 = arith.mulf %111, %93 : vector<16x128xf32>
    %121 = arith.mulf %105, %113 : vector<16x128xf32>
    %122 = arith.addf %120, %121 : vector<16x128xf32>
    %123 = math.tanh %122 : vector<16x128xf32>
    %124 = arith.mulf %119, %123 : vector<16x128xf32>
    %125 = vector.extract_strided_slice %5 {offsets = [64, 0], sizes = [16, 512], strides = [1, 1]} : vector<128x512xf32> to vector<16x512xf32>
    %126 = arith.truncf %124 : vector<16x128xf32> to vector<16x128xbf16>
    %cst_25 = arith.constant dense<0.000000e+00> : vector<16x512xf32>
    %127 = tpu.matmul %126, %6, %cst_25 {dimension_numbers = #tpu.dot_dimension_numbers<[1], [0], [0], [1], [0, 0, 1, 1], [], []>} : vector<16x128xbf16>, vector<128x512xbf16>, vector<16x512xf32> -> vector<16x512xf32>
    %128 = arith.addf %125, %127 : vector<16x512xf32>
    %129 = vector.extract_strided_slice %128 {offsets = [0, 0], sizes = [16, 128], strides = [1, 1]} : vector<16x512xf32> to vector<16x128xf32>
    %130 = arith.negf %129 : vector<16x128xf32>
    %131 = math.exp %130 : vector<16x128xf32>
    %cst_26 = arith.constant 1.000000e+00 : f32
    %132 = vector.broadcast %cst_26 : f32 to vector<16x128xf32>
    %133 = arith.addf %132, %131 : vector<16x128xf32>
    %134 = arith.divf %132, %133 : vector<16x128xf32>
    %135 = vector.extract_strided_slice %128 {offsets = [0, 128], sizes = [16, 128], strides = [1, 1]} : vector<16x512xf32> to vector<16x128xf32>
    %136 = arith.negf %135 : vector<16x128xf32>
    %137 = math.exp %136 : vector<16x128xf32>
    %cst_27 = arith.constant 1.000000e+00 : f32
    %138 = vector.broadcast %cst_27 : f32 to vector<16x128xf32>
    %139 = arith.addf %138, %137 : vector<16x128xf32>
    %140 = arith.divf %138, %139 : vector<16x128xf32>
    %141 = vector.extract_strided_slice %128 {offsets = [0, 256], sizes = [16, 128], strides = [1, 1]} : vector<16x512xf32> to vector<16x128xf32>
    %142 = math.tanh %141 : vector<16x128xf32>
    %143 = vector.extract_strided_slice %128 {offsets = [0, 384], sizes = [16, 128], strides = [1, 1]} : vector<16x512xf32> to vector<16x128xf32>
    %144 = arith.negf %143 : vector<16x128xf32>
    %145 = math.exp %144 : vector<16x128xf32>
    %cst_28 = arith.constant 1.000000e+00 : f32
    %146 = vector.broadcast %cst_28 : f32 to vector<16x128xf32>
    %147 = arith.addf %146, %145 : vector<16x128xf32>
    %148 = arith.divf %146, %147 : vector<16x128xf32>
    %149 = arith.mulf %140, %122 : vector<16x128xf32>
    %150 = arith.mulf %134, %142 : vector<16x128xf32>
    %151 = arith.addf %149, %150 : vector<16x128xf32>
    %152 = math.tanh %151 : vector<16x128xf32>
    %153 = arith.mulf %148, %152 : vector<16x128xf32>
    %154 = vector.extract_strided_slice %5 {offsets = [80, 0], sizes = [16, 512], strides = [1, 1]} : vector<128x512xf32> to vector<16x512xf32>
    %155 = arith.truncf %153 : vector<16x128xf32> to vector<16x128xbf16>
    %cst_29 = arith.constant dense<0.000000e+00> : vector<16x512xf32>
    %156 = tpu.matmul %155, %6, %cst_29 {dimension_numbers = #tpu.dot_dimension_numbers<[1], [0], [0], [1], [0, 0, 1, 1], [], []>} : vector<16x128xbf16>, vector<128x512xbf16>, vector<16x512xf32> -> vector<16x512xf32>
    %157 = arith.addf %154, %156 : vector<16x512xf32>
    %158 = vector.extract_strided_slice %157 {offsets = [0, 0], sizes = [16, 128], strides = [1, 1]} : vector<16x512xf32> to vector<16x128xf32>
    %159 = arith.negf %158 : vector<16x128xf32>
    %160 = math.exp %159 : vector<16x128xf32>
    %cst_30 = arith.constant 1.000000e+00 : f32
    %161 = vector.broadcast %cst_30 : f32 to vector<16x128xf32>
    %162 = arith.addf %161, %160 : vector<16x128xf32>
    %163 = arith.divf %161, %162 : vector<16x128xf32>
    %164 = vector.extract_strided_slice %157 {offsets = [0, 128], sizes = [16, 128], strides = [1, 1]} : vector<16x512xf32> to vector<16x128xf32>
    %165 = arith.negf %164 : vector<16x128xf32>
    %166 = math.exp %165 : vector<16x128xf32>
    %cst_31 = arith.constant 1.000000e+00 : f32
    %167 = vector.broadcast %cst_31 : f32 to vector<16x128xf32>
    %168 = arith.addf %167, %166 : vector<16x128xf32>
    %169 = arith.divf %167, %168 : vector<16x128xf32>
    %170 = vector.extract_strided_slice %157 {offsets = [0, 256], sizes = [16, 128], strides = [1, 1]} : vector<16x512xf32> to vector<16x128xf32>
    %171 = math.tanh %170 : vector<16x128xf32>
    %172 = vector.extract_strided_slice %157 {offsets = [0, 384], sizes = [16, 128], strides = [1, 1]} : vector<16x512xf32> to vector<16x128xf32>
    %173 = arith.negf %172 : vector<16x128xf32>
    %174 = math.exp %173 : vector<16x128xf32>
    %cst_32 = arith.constant 1.000000e+00 : f32
    %175 = vector.broadcast %cst_32 : f32 to vector<16x128xf32>
    %176 = arith.addf %175, %174 : vector<16x128xf32>
    %177 = arith.divf %175, %176 : vector<16x128xf32>
    %178 = arith.mulf %169, %151 : vector<16x128xf32>
    %179 = arith.mulf %163, %171 : vector<16x128xf32>
    %180 = arith.addf %178, %179 : vector<16x128xf32>
    %181 = math.tanh %180 : vector<16x128xf32>
    %182 = arith.mulf %177, %181 : vector<16x128xf32>
    %183 = vector.extract_strided_slice %5 {offsets = [96, 0], sizes = [16, 512], strides = [1, 1]} : vector<128x512xf32> to vector<16x512xf32>
    %184 = arith.truncf %182 : vector<16x128xf32> to vector<16x128xbf16>
    %cst_33 = arith.constant dense<0.000000e+00> : vector<16x512xf32>
    %185 = tpu.matmul %184, %6, %cst_33 {dimension_numbers = #tpu.dot_dimension_numbers<[1], [0], [0], [1], [0, 0, 1, 1], [], []>} : vector<16x128xbf16>, vector<128x512xbf16>, vector<16x512xf32> -> vector<16x512xf32>
    %186 = arith.addf %183, %185 : vector<16x512xf32>
    %187 = vector.extract_strided_slice %186 {offsets = [0, 0], sizes = [16, 128], strides = [1, 1]} : vector<16x512xf32> to vector<16x128xf32>
    %188 = arith.negf %187 : vector<16x128xf32>
    %189 = math.exp %188 : vector<16x128xf32>
    %cst_34 = arith.constant 1.000000e+00 : f32
    %190 = vector.broadcast %cst_34 : f32 to vector<16x128xf32>
    %191 = arith.addf %190, %189 : vector<16x128xf32>
    %192 = arith.divf %190, %191 : vector<16x128xf32>
    %193 = vector.extract_strided_slice %186 {offsets = [0, 128], sizes = [16, 128], strides = [1, 1]} : vector<16x512xf32> to vector<16x128xf32>
    %194 = arith.negf %193 : vector<16x128xf32>
    %195 = math.exp %194 : vector<16x128xf32>
    %cst_35 = arith.constant 1.000000e+00 : f32
    %196 = vector.broadcast %cst_35 : f32 to vector<16x128xf32>
    %197 = arith.addf %196, %195 : vector<16x128xf32>
    %198 = arith.divf %196, %197 : vector<16x128xf32>
    %199 = vector.extract_strided_slice %186 {offsets = [0, 256], sizes = [16, 128], strides = [1, 1]} : vector<16x512xf32> to vector<16x128xf32>
    %200 = math.tanh %199 : vector<16x128xf32>
    %201 = vector.extract_strided_slice %186 {offsets = [0, 384], sizes = [16, 128], strides = [1, 1]} : vector<16x512xf32> to vector<16x128xf32>
    %202 = arith.negf %201 : vector<16x128xf32>
    %203 = math.exp %202 : vector<16x128xf32>
    %cst_36 = arith.constant 1.000000e+00 : f32
    %204 = vector.broadcast %cst_36 : f32 to vector<16x128xf32>
    %205 = arith.addf %204, %203 : vector<16x128xf32>
    %206 = arith.divf %204, %205 : vector<16x128xf32>
    %207 = arith.mulf %198, %180 : vector<16x128xf32>
    %208 = arith.mulf %192, %200 : vector<16x128xf32>
    %209 = arith.addf %207, %208 : vector<16x128xf32>
    %210 = math.tanh %209 : vector<16x128xf32>
    %211 = arith.mulf %206, %210 : vector<16x128xf32>
    %212 = vector.extract_strided_slice %5 {offsets = [112, 0], sizes = [16, 512], strides = [1, 1]} : vector<128x512xf32> to vector<16x512xf32>
    %213 = arith.truncf %211 : vector<16x128xf32> to vector<16x128xbf16>
    %cst_37 = arith.constant dense<0.000000e+00> : vector<16x512xf32>
    %214 = tpu.matmul %213, %6, %cst_37 {dimension_numbers = #tpu.dot_dimension_numbers<[1], [0], [0], [1], [0, 0, 1, 1], [], []>} : vector<16x128xbf16>, vector<128x512xbf16>, vector<16x512xf32> -> vector<16x512xf32>
    %215 = arith.addf %212, %214 : vector<16x512xf32>
    %216 = vector.extract_strided_slice %215 {offsets = [0, 0], sizes = [16, 128], strides = [1, 1]} : vector<16x512xf32> to vector<16x128xf32>
    %217 = arith.negf %216 : vector<16x128xf32>
    %218 = math.exp %217 : vector<16x128xf32>
    %cst_38 = arith.constant 1.000000e+00 : f32
    %219 = vector.broadcast %cst_38 : f32 to vector<16x128xf32>
    %220 = arith.addf %219, %218 : vector<16x128xf32>
    %221 = arith.divf %219, %220 : vector<16x128xf32>
    %222 = vector.extract_strided_slice %215 {offsets = [0, 128], sizes = [16, 128], strides = [1, 1]} : vector<16x512xf32> to vector<16x128xf32>
    %223 = arith.negf %222 : vector<16x128xf32>
    %224 = math.exp %223 : vector<16x128xf32>
    %cst_39 = arith.constant 1.000000e+00 : f32
    %225 = vector.broadcast %cst_39 : f32 to vector<16x128xf32>
    %226 = arith.addf %225, %224 : vector<16x128xf32>
    %227 = arith.divf %225, %226 : vector<16x128xf32>
    %228 = vector.extract_strided_slice %215 {offsets = [0, 256], sizes = [16, 128], strides = [1, 1]} : vector<16x512xf32> to vector<16x128xf32>
    %229 = math.tanh %228 : vector<16x128xf32>
    %230 = vector.extract_strided_slice %215 {offsets = [0, 384], sizes = [16, 128], strides = [1, 1]} : vector<16x512xf32> to vector<16x128xf32>
    %231 = arith.negf %230 : vector<16x128xf32>
    %232 = math.exp %231 : vector<16x128xf32>
    %cst_40 = arith.constant 1.000000e+00 : f32
    %233 = vector.broadcast %cst_40 : f32 to vector<16x128xf32>
    %234 = arith.addf %233, %232 : vector<16x128xf32>
    %235 = arith.divf %233, %234 : vector<16x128xf32>
    %236 = arith.mulf %227, %209 : vector<16x128xf32>
    %237 = arith.mulf %221, %229 : vector<16x128xf32>
    %238 = arith.addf %236, %237 : vector<16x128xf32>
    %239 = math.tanh %238 : vector<16x128xf32>
    %240 = arith.mulf %235, %239 : vector<16x128xf32>
    %c0_41 = arith.constant 0 : index
    %c0_42 = arith.constant 0 : index
    %241 = vector.load %arg2[%c0_41, %c0_42] : memref<16x512xbf16, #tpu.memory_space<vmem>>, vector<16x512xbf16>
    %242 = arith.truncf %240 : vector<16x128xf32> to vector<16x128xbf16>
    %c0_43 = arith.constant 0 : index
    %c0_44 = arith.constant 0 : index
    %243 = vector.load %arg6[%c0_43, %c0_44] : memref<128x512xbf16, #tpu.memory_space<vmem>>, vector<128x512xbf16>
    %cst_45 = arith.constant dense<0.000000e+00> : vector<16x512xf32>
    %244 = tpu.matmul %242, %243, %cst_45 {dimension_numbers = #tpu.dot_dimension_numbers<[1], [0], [0], [1], [0, 0, 1, 1], [], []>} : vector<16x128xbf16>, vector<128x512xbf16>, vector<16x512xf32> -> vector<16x512xf32>
    %c0_46 = arith.constant 0 : index
    %c0_47 = arith.constant 0 : index
    %245 = vector.load %arg7[%c0_46, %c0_47] : memref<512x512xbf16, #tpu.memory_space<vmem>>, vector<512x512xbf16>
    %cst_48 = arith.constant dense<0.000000e+00> : vector<16x512xf32>
    %246 = tpu.matmul %241, %245, %cst_48 {dimension_numbers = #tpu.dot_dimension_numbers<[1], [0], [0], [1], [0, 0, 1, 1], [], []>} : vector<16x512xbf16>, vector<512x512xbf16>, vector<16x512xf32> -> vector<16x512xf32>
    %247 = arith.addf %244, %246 : vector<16x512xf32>
    %c0_49 = arith.constant 0 : index
    %c0_50 = arith.constant 0 : index
    %248 = vector.load %arg8[%c0_49, %c0_50] : memref<1x512xf32, #tpu.memory_space<vmem>>, vector<1x512xf32>
    %249 = vector.broadcast %248 : vector<1x512xf32> to vector<16x512xf32>
    %250 = arith.addf %247, %249 : vector<16x512xf32>
    %cst_51 = arith.constant 0.000000e+00 : f32
    %251 = vector.broadcast %cst_51 : f32 to vector<16x512xf32>
    %252 = arith.maximumf %250, %251 : vector<16x512xf32>
    %253 = arith.truncf %252 : vector<16x512xf32> to vector<16x512xbf16>
    %c0_52 = arith.constant 0 : index
    %c0_53 = arith.constant 0 : index
    %c0_54 = arith.constant 0 : index
    %254 = vector.load %arg9[%c0_52, %c0_53, %c0_54] : memref<4x512x512xbf16, #tpu.memory_space<vmem>>, vector<1x512x512xbf16>
    %255 = vector.shape_cast %254 : vector<1x512x512xbf16> to vector<512x512xbf16>
    %cst_55 = arith.constant dense<0.000000e+00> : vector<16x512xf32>
    %256 = tpu.matmul %253, %255, %cst_55 {dimension_numbers = #tpu.dot_dimension_numbers<[1], [0], [0], [1], [0, 0, 1, 1], [], []>} : vector<16x512xbf16>, vector<512x512xbf16>, vector<16x512xf32> -> vector<16x512xf32>
    %c0_56 = arith.constant 0 : index
    %c0_57 = arith.constant 0 : index
    %257 = vector.load %arg10[%c0_56, %c0_57] : memref<4x512xf32, #tpu.memory_space<vmem>>, vector<1x512xf32>
    %258 = vector.broadcast %257 : vector<1x512xf32> to vector<16x512xf32>
    %259 = arith.addf %256, %258 : vector<16x512xf32>
    %cst_58 = arith.constant 0.000000e+00 : f32
    %260 = vector.broadcast %cst_58 : f32 to vector<16x512xf32>
    %261 = arith.maximumf %259, %260 : vector<16x512xf32>
    %262 = arith.truncf %261 : vector<16x512xf32> to vector<16x512xbf16>
    %c1 = arith.constant 1 : index
    %c0_59 = arith.constant 0 : index
    %c0_60 = arith.constant 0 : index
    %263 = vector.load %arg9[%c1, %c0_59, %c0_60] : memref<4x512x512xbf16, #tpu.memory_space<vmem>>, vector<1x512x512xbf16>
    %264 = vector.shape_cast %263 : vector<1x512x512xbf16> to vector<512x512xbf16>
    %cst_61 = arith.constant dense<0.000000e+00> : vector<16x512xf32>
    %265 = tpu.matmul %262, %264, %cst_61 {dimension_numbers = #tpu.dot_dimension_numbers<[1], [0], [0], [1], [0, 0, 1, 1], [], []>} : vector<16x512xbf16>, vector<512x512xbf16>, vector<16x512xf32> -> vector<16x512xf32>
    %c1_62 = arith.constant 1 : index
    %c0_63 = arith.constant 0 : index
    %266 = vector.load %arg10[%c1_62, %c0_63] : memref<4x512xf32, #tpu.memory_space<vmem>>, vector<1x512xf32>
    %267 = vector.broadcast %266 : vector<1x512xf32> to vector<16x512xf32>
    %268 = arith.addf %265, %267 : vector<16x512xf32>
    %cst_64 = arith.constant 0.000000e+00 : f32
    %269 = vector.broadcast %cst_64 : f32 to vector<16x512xf32>
    %270 = arith.maximumf %268, %269 : vector<16x512xf32>
    %271 = arith.truncf %270 : vector<16x512xf32> to vector<16x512xbf16>
    %c2 = arith.constant 2 : index
    %c0_65 = arith.constant 0 : index
    %c0_66 = arith.constant 0 : index
    %272 = vector.load %arg9[%c2, %c0_65, %c0_66] : memref<4x512x512xbf16, #tpu.memory_space<vmem>>, vector<1x512x512xbf16>
    %273 = vector.shape_cast %272 : vector<1x512x512xbf16> to vector<512x512xbf16>
    %cst_67 = arith.constant dense<0.000000e+00> : vector<16x512xf32>
    %274 = tpu.matmul %271, %273, %cst_67 {dimension_numbers = #tpu.dot_dimension_numbers<[1], [0], [0], [1], [0, 0, 1, 1], [], []>} : vector<16x512xbf16>, vector<512x512xbf16>, vector<16x512xf32> -> vector<16x512xf32>
    %c2_68 = arith.constant 2 : index
    %c0_69 = arith.constant 0 : index
    %275 = vector.load %arg10[%c2_68, %c0_69] : memref<4x512xf32, #tpu.memory_space<vmem>>, vector<1x512xf32>
    %276 = vector.broadcast %275 : vector<1x512xf32> to vector<16x512xf32>
    %277 = arith.addf %274, %276 : vector<16x512xf32>
    %cst_70 = arith.constant 0.000000e+00 : f32
    %278 = vector.broadcast %cst_70 : f32 to vector<16x512xf32>
    %279 = arith.maximumf %277, %278 : vector<16x512xf32>
    %280 = arith.truncf %279 : vector<16x512xf32> to vector<16x512xbf16>
    %c3 = arith.constant 3 : index
    %c0_71 = arith.constant 0 : index
    %c0_72 = arith.constant 0 : index
    %281 = vector.load %arg9[%c3, %c0_71, %c0_72] : memref<4x512x512xbf16, #tpu.memory_space<vmem>>, vector<1x512x512xbf16>
    %282 = vector.shape_cast %281 : vector<1x512x512xbf16> to vector<512x512xbf16>
    %cst_73 = arith.constant dense<0.000000e+00> : vector<16x512xf32>
    %283 = tpu.matmul %280, %282, %cst_73 {dimension_numbers = #tpu.dot_dimension_numbers<[1], [0], [0], [1], [0, 0, 1, 1], [], []>} : vector<16x512xbf16>, vector<512x512xbf16>, vector<16x512xf32> -> vector<16x512xf32>
    %c3_74 = arith.constant 3 : index
    %c0_75 = arith.constant 0 : index
    %284 = vector.load %arg10[%c3_74, %c0_75] : memref<4x512xf32, #tpu.memory_space<vmem>>, vector<1x512xf32>
    %285 = vector.broadcast %284 : vector<1x512xf32> to vector<16x512xf32>
    %286 = arith.addf %283, %285 : vector<16x512xf32>
    %cst_76 = arith.constant 0.000000e+00 : f32
    %287 = vector.broadcast %cst_76 : f32 to vector<16x512xf32>
    %288 = arith.maximumf %286, %287 : vector<16x512xf32>
    %289 = arith.truncf %288 : vector<16x512xf32> to vector<16x512xbf16>
    %c0_77 = arith.constant 0 : index
    %c0_78 = arith.constant 0 : index
    %290 = vector.load %arg11[%c0_77, %c0_78] : memref<512x128xbf16, #tpu.memory_space<vmem>>, vector<512x128xbf16>
    %cst_79 = arith.constant dense<0.000000e+00> : vector<16x128xf32>
    %291 = tpu.matmul %289, %290, %cst_79 {dimension_numbers = #tpu.dot_dimension_numbers<[1], [0], [0], [1], [0, 0, 1, 1], [], []>} : vector<16x512xbf16>, vector<512x128xbf16>, vector<16x128xf32> -> vector<16x128xf32>
    %c0_80 = arith.constant 0 : index
    %c0_81 = arith.constant 0 : index
    %292 = vector.load %arg12[%c0_80, %c0_81] : memref<1x128xf32, #tpu.memory_space<vmem>>, vector<1x128xf32>
    %293 = vector.broadcast %292 : vector<1x128xf32> to vector<16x128xf32>
    %294 = arith.addf %291, %293 : vector<16x128xf32>
    %295 = arith.negf %294 : vector<16x128xf32>
    %296 = math.exp %295 : vector<16x128xf32>
    %cst_82 = arith.constant 1.000000e+00 : f32
    %297 = vector.broadcast %cst_82 : f32 to vector<16x128xf32>
    %298 = arith.addf %297, %296 : vector<16x128xf32>
    %299 = arith.divf %297, %298 : vector<16x128xf32>
    %c0_83 = arith.constant 0 : index
    %c0_84 = arith.constant 0 : index
    %300 = vector.load %arg13[%c0_83, %c0_84] : memref<16x128xf32, #tpu.memory_space<vmem>>, vector<16x128xf32>
    tpu.vector_store %arg13[%c0_83, %c0_84], %299 {strides = array<i32>} : memref<16x128xf32, #tpu.memory_space<vmem>>, vector<16x128xf32>,
    return
  }
  func.func @transform_0(%arg0: i32) -> (i32, i32) {
    %c0_i32 = arith.constant 0 : i32
    %c0_i32_0 = arith.constant 0 : i32
    return %arg0, %c0_i32 : i32, i32
  }
  func.func @transform_1(%arg0: i32) -> (i32, i32) {
    %c0_i32 = arith.constant 0 : i32
    %c0_i32_0 = arith.constant 0 : i32
    return %arg0, %c0_i32 : i32, i32
  }
  func.func @transform_2(%arg0: i32) -> (i32, i32) {
    %c0_i32 = arith.constant 0 : i32
    %c0_i32_0 = arith.constant 0 : i32
    %c0_i32_1 = arith.constant 0 : i32
    return %c0_i32, %c0_i32_0 : i32, i32
  }
  func.func @transform_3(%arg0: i32) -> (i32, i32) {
    %c0_i32 = arith.constant 0 : i32
    %c0_i32_0 = arith.constant 0 : i32
    %c0_i32_1 = arith.constant 0 : i32
    return %c0_i32, %c0_i32_0 : i32, i32
  }
  func.func @transform_4(%arg0: i32) -> (i32, i32) {
    %c0_i32 = arith.constant 0 : i32
    %c0_i32_0 = arith.constant 0 : i32
    %c0_i32_1 = arith.constant 0 : i32
    return %c0_i32, %c0_i32_0 : i32, i32
  }
  func.func @transform_5(%arg0: i32) -> (i32, i32) {
    %c0_i32 = arith.constant 0 : i32
    %c0_i32_0 = arith.constant 0 : i32
    %c0_i32_1 = arith.constant 0 : i32
    return %c0_i32, %c0_i32_0 : i32, i32
  }
  func.func @transform_6(%arg0: i32) -> (i32, i32) {
    %c0_i32 = arith.constant 0 : i32
    %c0_i32_0 = arith.constant 0 : i32
    %c0_i32_1 = arith.constant 0 : i32
    return %c0_i32, %c0_i32_0 : i32, i32
  }
  func.func @transform_7(%arg0: i32) -> (i32, i32) {
    %c0_i32 = arith.constant 0 : i32
    %c0_i32_0 = arith.constant 0 : i32
    %c0_i32_1 = arith.constant 0 : i32
    return %c0_i32, %c0_i32_0 : i32, i32
  }
  func.func @transform_8(%arg0: i32) -> (i32, i32, i32) {
    %c0_i32 = arith.constant 0 : i32
    %c0_i32_0 = arith.constant 0 : i32
    %c0_i32_1 = arith.constant 0 : i32
    %c0_i32_2 = arith.constant 0 : i32
    return %c0_i32, %c0_i32_0, %c0_i32_1 : i32, i32, i32
  }
  func.func @transform_9(%arg0: i32) -> (i32, i32) {
    %c0_i32 = arith.constant 0 : i32
    %c0_i32_0 = arith.constant 0 : i32
    %c0_i32_1 = arith.constant 0 : i32
    return %c0_i32, %c0_i32_0 : i32, i32
  }
  func.func @transform_10(%arg0: i32) -> (i32, i32) {
    %c0_i32 = arith.constant 0 : i32
    %c0_i32_0 = arith.constant 0 : i32
    %c0_i32_1 = arith.constant 0 : i32
    return %c0_i32, %c0_i32_0 : i32, i32
  }
  func.func @transform_11(%arg0: i32) -> (i32, i32) {
    %c0_i32 = arith.constant 0 : i32
    %c0_i32_0 = arith.constant 0 : i32
    %c0_i32_1 = arith.constant 0 : i32
    return %c0_i32, %c0_i32_0 : i32, i32
  }
  func.func @transform_12(%arg0: i32) -> (i32, i32) {
    %c0_i32 = arith.constant 0 : i32
    %c0_i32_0 = arith.constant 0 : i32
    return %arg0, %c0_i32 : i32, i32
  }
}

</mosaic_0001>

<bundles_post_ra>
// kernel: tpu_custom_call.1
= control target key start
LH: loop header
LB: loop body
LE: loop exit
PB: predicated region body
PF: predicated region fallthrough
CT: control target
= control target key end

     0   :  { %17 = vsyncpa [#allocation3], 0  ;;  %s11503_s0 = inlined_call_operand.vmem [shape: bf16[128,216], index: 0, kind: input, shape index: {}]   ;;  %s11504_s1 = inlined_call_operand.hbm [shape: bf16[16,512], index: 1, kind: input, shape index: {}]   ;;  %s11505_s2 = inlined_call_operand.hbm [shape: bf16[216,512], index: 2, kind: input, shape index: {}]   ;;  %s11506_s3 = inlined_call_operand.hbm [shape: bf16[128,512], index: 3, kind: input, shape index: {}]   ;;  %s11507_s4 = inlined_call_operand.hbm [shape: f32[1,512], index: 4, kind: input, shape index: {}]   ;;  %s11508_s5 = inlined_call_operand.hbm [shape: bf16[128,512], index: 5, kind: input, shape index: {}]   ;;  %s11509_s6 = inlined_call_operand.hbm [shape: bf16[512,512], index: 6, kind: input, shape index: {}]   ;;  %s11510_s7 = inlined_call_operand.hbm [shape: f32[1,512], index: 7, kind: input, shape index: {}]   ;;  %s11511_s8 = inlined_call_operand.hbm [shape: bf16[4,512,512], index: 8, kind: input, shape index: {}]   ;;  %s11512_s9 = inlined_call_operand.hbm [shape: f32[4,512], index: 9, kind: input, shape index: {}]   ;;  %s11513_s10 = inlined_call_operand.hbm [shape: bf16[512,128], index: 10, kind: input, shape index: {}]   ;;  %s11514_s11 = inlined_call_operand.hbm [shape: f32[1,128], index: 11, kind: input, shape index: {}]   ;;  %s11515_s12 = inlined_call_operand.hbm [shape: f32[16,128], index: 12, kind: output, shape index: {}]  }
   0x1   :  { %18 = vsyncpa [#allocation6], 0 }
   0x2   :  { %19 = vsyncpa [#allocation9], 0 }
   0x3   :  { %20 = vsyncpa [#allocation12], 0 }
   0x4   :  { %21 = vsyncpa [#allocation15], 0 }
   0x5   :  { %22 = vsyncpa [#allocation18], 0 }
   0x6   :  { %23 = vsyncpa [#allocation4], 0  ;;  %s10509_s21 = smov [#allocation5]   ;;  %s10510_s23 = smov [#allocation8]  }
   0x7   :  { %s43_s22 = sshll.u32 %s10509_s21, 4  ;;  %s68_s24 = sshll.u32 %s10510_s23, 4  ;;  %s44_s22 = int_to_ptr.vmem [resolvable:$true] %s43_s22  ;;  %s69_s24 = int_to_ptr.vmem [resolvable:$true] %s68_s24 }
   0x8   :  { %s10263_s25 = scalar_lea.vmem %s44_s22, 6912  ;;  %p10268_p1 = scmp.lt.s32.totalorder %s44_s22, %s44_s22 }
   0x9   :  { %p10264_p0 = scmp.ne.s32.totalorder %s44_s22, %s10263_s25  ;;  %p10269_p2 = scmp.lt.s32.totalorder %s10263_s25, %s10263_s25 }
   0xb   :  { %p10270_p3 = por %p10269_p2, %p10268_p1 }
   0xd   :  { %p10271_p4 = pnand %p10270_p3, %p10264_p0 }
   0xf   :  { %10274 = shalt.err (!%p10271_p4)
}
  0x10   :  { %s10511_s26 = smov 256   ;;  %s10512_s27 = smov 16  }
  0x11   :  { %49 = dma.hbm_to_vmem [thread:$0]  %s11505_s2, 6912, %s44_s22, [#allocation6], %s10511_s26, %s10511_s26, %s10512_s27  }
  0x12   :  { %s10283_s30 = scalar_lea.vmem %s69_s24, 64  ;;  %p10288_p6 = scmp.lt.s32.totalorder %s69_s24, %s69_s24 }
  0x13   :  { %p10284_p5 = scmp.ne.s32.totalorder %s69_s24, %s10283_s30  ;;  %p10289_p7 = scmp.lt.s32.totalorder %s10283_s30, %s10283_s30 }
  0x15   :  { %p10290_p8 = por %p10289_p7, %p10288_p6 }
  0x17   :  { %p10291_p9 = pnand %p10290_p8, %p10284_p5 }
  0x19   :  { %10294 = shalt.err (!%p10291_p9)
}
  0x1a   :  { %71 = dma.hbm_to_vmem [thread:$0]  %s11507_s4, 64, %s69_s24, [#allocation9]  }
  0x1b   :  { %s10513_s15 = smov [#allocation11]   ;;  %s10514_s17 = smov [#allocation14]  }
  0x1c   :  { %s89_s16 = sshll.u32 %s10513_s15, 4  ;;  %s111_s18 = sshll.u32 %s10514_s17, 4  ;;  %s90_s16 = int_to_ptr.vmem [resolvable:$true] %s89_s16  ;;  %s112_s18 = int_to_ptr.vmem [resolvable:$true] %s111_s18 }
  0x1d   :  { %s10303_s19 = scalar_lea.vmem %s90_s16, 16384  ;;  %p10308_p11 = scmp.lt.s32.totalorder %s90_s16, %s90_s16 }
  0x1e   :  { %p10304_p10 = scmp.ne.s32.totalorder %s90_s16, %s10303_s19  ;;  %p10309_p12 = scmp.lt.s32.totalorder %s10303_s19, %s10303_s19 }
  0x20   :  { %p10310_p13 = por %p10309_p12, %p10308_p11 }
  0x22   :  { %p10311_p0 = pnand %p10310_p13, %p10304_p10 }
  0x24   :  { %10314 = shalt.err (!%p10311_p0)
}
  0x25   :  { %95 = dma.hbm_to_vmem [thread:$0]  %s11509_s6, 16384, %s90_s16, [#allocation12], %s10511_s26, %s10511_s26, %s10512_s27  }
  0x26   :  { %s10323_s4 = scalar_lea.vmem %s112_s18, 65536  ;;  %p10328_p2 = scmp.lt.s32.totalorder %s112_s18, %s112_s18 }
  0x27   :  { %p10324_p1 = scmp.ne.s32.totalorder %s112_s18, %s10323_s4  ;;  %p10329_p3 = scmp.lt.s32.totalorder %s10323_s4, %s10323_s4 }
  0x29   :  { %p10330_p4 = por %p10329_p3, %p10328_p2 }
  0x2b   :  { %p10331_p5 = pnand %p10330_p4, %p10324_p1 }
  0x2d   :  { %10334 = shalt.err (!%p10331_p5)
}
  0x2e   :  { %117 = dma.hbm_to_vmem [thread:$0]  %s11511_s8, 65536, %s112_s18, [#allocation15], %s10511_s26, %s10511_s26, %s10512_s27  }
  0x2f   :  { %s10515_s23 = smov [#allocation17]  }
  0x30   :  { %s133_s24 = sshll.u32 %s10515_s23, 4  ;;  %s134_s24 = int_to_ptr.vmem [resolvable:$true] %s133_s24 }
  0x31   :  { %s10343_s25 = scalar_lea.vmem %s134_s24, 4096  ;;  %p10348_p7 = scmp.lt.s32.totalorder %s134_s24, %s134_s24 }
  0x32   :  { %p10344_p6 = scmp.ne.s32.totalorder %s134_s24, %s10343_s25  ;;  %p10349_p8 = scmp.lt.s32.totalorder %s10343_s25, %s10343_s25 }
  0x34   :  { %p10350_p9 = por %p10349_p8, %p10348_p7 }
  0x36   :  { %p10351_p10 = pnand %p10350_p9, %p10344_p6 }
  0x38   :  { %10354 = shalt.err (!%p10351_p10)
}
  0x39   :  { %s10516_s6 = smov 64   ;;  %s10517_s28 = smov 4  }
  0x3a   :  { %139 = dma.hbm_to_vmem [thread:$0]  %s11513_s10, 4096, %s134_s24, [#allocation18], %s10516_s6, %s10516_s6, %s10517_s28  }
  0x3b   :  { %s10518_s13 = smov [#allocation2]   ;;  %s10519_s8 = smov [#allocation7]  }
  0x3c   :  { %s31_s14 = sshll.u32 %s10518_s13, 4  ;;  %s55_s15 = sshll.u32 %s10519_s8, 4  ;;  %s32_s14 = int_to_ptr.vmem [resolvable:$true] %s31_s14  ;;  %s56_s15 = int_to_ptr.vmem [resolvable:$true] %s55_s15 }
  0x3d   :  { %s10363_s16 = scalar_lea.vmem %s32_s14, 512  ;;  %p10368_p12 = scmp.lt.s32.totalorder %s32_s14, %s32_s14 }
  0x3e   :  { %p10364_p11 = scmp.ne.s32.totalorder %s32_s14, %s10363_s16  ;;  %p10369_p13 = scmp.lt.s32.totalorder %s10363_s16, %s10363_s16 }
  0x40   :  { %p10370_p0 = por %p10369_p13, %p10368_p12 }
  0x42   :  { %p10371_p1 = pnand %p10370_p0, %p10364_p11 }
  0x44   :  { %10374 = shalt.err (!%p10371_p1)
}
  0x45   :  { %37 = dma.hbm_to_vmem [thread:$0]  %s11504_s1, 512, %s32_s14, [#allocation3], %s10511_s26, %s10511_s26, %s10512_s27  }
  0x46   :  { %s10383_s10 = scalar_lea.vmem %s56_s15, 4096  ;;  %p10388_p3 = scmp.lt.s32.totalorder %s56_s15, %s56_s15 }
  0x47   :  { %p10384_p2 = scmp.ne.s32.totalorder %s56_s15, %s10383_s10  ;;  %p10389_p4 = scmp.lt.s32.totalorder %s10383_s10, %s10383_s10 }
  0x49   :  { %p10390_p5 = por %p10389_p4, %p10388_p3 }
  0x4b   :  { %p10391_p6 = pnand %p10390_p5, %p10384_p2 }
  0x4d   :  { %10394 = shalt.err (!%p10391_p6)
}
  0x4e   :  { %61 = dma.hbm_to_vmem [thread:$0]  %s11506_s3, 4096, %s56_s15, [#allocation6], %s10511_s26, %s10511_s26, %s10512_s27  }
  0x4f   :  { %s10520_s20 = smov [#allocation10]   ;;  %s10521_s21 = smov [#allocation13]  }
  0x50   :  { %s77_s4 = sshll.u32 %s10520_s20, 4  ;;  %s102_s1 = sshll.u32 %s10521_s21, 4  ;;  %s78_s4 = int_to_ptr.vmem [resolvable:$true] %s77_s4  ;;  %s103_s1 = int_to_ptr.vmem [resolvable:$true] %s102_s1 }
  0x51   :  { %s10403_s22 = scalar_lea.vmem %s78_s4, 4096  ;;  %p10408_p8 = scmp.lt.s32.totalorder %s78_s4, %s78_s4 }
  0x52   :  { %p10404_p7 = scmp.ne.s32.totalorder %s78_s4, %s10403_s22  ;;  %p10409_p9 = scmp.lt.s32.totalorder %s10403_s22, %s10403_s22 }
  0x54   :  { %p10410_p10 = por %p10409_p9, %p10408_p8 }
  0x56   :  { %p10411_p11 = pnand %p10410_p10, %p10404_p7 }
  0x58   :  { %10414 = shalt.err (!%p10411_p11)
}
  0x59   :  { %83 = dma.hbm_to_vmem [thread:$0]  %s11508_s5, 4096, %s78_s4, [#allocation9], %s10511_s26, %s10511_s26, %s10512_s27  }
  0x5a   :  { %s10423_s3 = scalar_lea.vmem %s103_s1, 64  ;;  %p10428_p13 = scmp.lt.s32.totalorder %s103_s1, %s103_s1 }
  0x5b   :  { %p10424_p12 = scmp.ne.s32.totalorder %s103_s1, %s10423_s3  ;;  %p10429_p0 = scmp.lt.s32.totalorder %s10423_s3, %s10423_s3 }
  0x5d   :  { %p10430_p1 = por %p10429_p0, %p10428_p13 }
  0x5f   :  { %p10431_p2 = pnand %p10430_p1, %p10424_p12 }
  0x61   :  { %10434 = shalt.err (!%p10431_p2)
}
  0x62   :  { %105 = dma.hbm_to_vmem [thread:$0]  %s11510_s7, 64, %s103_s1, [#allocation12]  }
  0x63   :  { %s10522_s28 = smov [#allocation16]   ;;  %s10523_s30 = smov [#allocation19]  }
  0x64   :  { %s124_s29 = sshll.u32 %s10522_s28, 4  ;;  %s146_s13 = sshll.u32 %s10523_s30, 4  ;;  %s125_s29 = int_to_ptr.vmem [resolvable:$true] %s124_s29  ;;  %s147_s13 = int_to_ptr.vmem [resolvable:$true] %s146_s13 }
  0x65   :  { %s10443_s14 = scalar_lea.vmem %s125_s29, 256  ;;  %p10448_p4 = scmp.lt.s32.totalorder %s125_s29, %s125_s29 }
  0x66   :  { %p10444_p3 = scmp.ne.s32.totalorder %s125_s29, %s10443_s14  ;;  %p10449_p5 = scmp.lt.s32.totalorder %s10443_s14, %s10443_s14 }
  0x68   :  { %p10450_p6 = por %p10449_p5, %p10448_p4 }
  0x6a   :  { %p10451_p7 = pnand %p10450_p6, %p10444_p3 }
  0x6c   :  { %10454 = shalt.err (!%p10451_p7)
}
  0x6d   :  { %127 = dma.hbm_to_vmem [thread:$0]  %s11512_s9, 256, %s125_s29, [#allocation15]  }
  0x6e   :  { %s10463_s27 = scalar_lea.vmem %s147_s13, 16  ;;  %s10467_s7 = scalar_lea.vmem %s147_s13, 32 }
  0x6f   :  { %p10464_p8 = scmp.ne.s32.totalorder %s147_s13, %s10463_s27  ;;  %p10468_p9 = scmp.lt.s32.totalorder %s147_s13, %s147_s13 }
  0x70   :  { %p10469_p10 = scmp.lt.s32.totalorder %s10467_s7, %s10463_s27 }
  0x72   :  { %p10470_p11 = por %p10469_p10, %p10468_p9 }
  0x74   :  { %p10471_p12 = pnand %p10470_p11, %p10464_p8 }
  0x76   :  { %10474 = shalt.err (!%p10471_p12)
}
  0x77   :  { %149 = dma.hbm_to_vmem [thread:$0]  %s11514_s11, 16, %s147_s13, [#allocation18]  }
  0x78   :  { %10495 = dma.done.wait [#allocation3], 512  }
  0x79   :  { %10496 = vsyncadd [#allocation3], 4294966784 }
  0x7a   :  { %10497 = dma.done.wait [#allocation6], 11008  }
  0x7b   :  { %10498 = vsyncadd [#allocation6], 4294956288 }
  0x7c   :  { %10499 = dma.done.wait [#allocation9], 4160  }
  0x7d   :  { %10500 = vsyncadd [#allocation9], 4294963136 }
  0x7e   :  { %10501 = dma.done.wait [#allocation12], 16448  }
  0x7f   :  { %10502 = vsyncadd [#allocation12], 4294950848 }
  0x80   :  { %10503 = dma.done.wait [#allocation15], 65792  }
  0x81   :  { %10504 = vsyncadd [#allocation15], 4294901504 }
  0x82   :  { %10505 = dma.done.wait [#allocation18], 4112  }
  0x83   :  { %10506 = vsyncadd [#allocation18], 4294963184  ;;  %v8729_v0 = vld [vmem:[#allocation5 + $0xe4] ss:$16 sps:$4 sm:$0xff]   ;;  %v8731_v1 = vld [vmem:[#allocation5 + $0xec] ss:$16 sps:$4 sm:$0xff]  }
  0x84   :  { %656 = vmatprep.subr.bf16.mxu0 %v8729_v0  ;;  %v8733_v2 = vld [vmem:[#allocation5 + $0xe0] ss:$16 sps:$4 sm:$0xff]   ;;  %v8734_v3 = vld [vmem:[#allocation5 + $0xe8] ss:$16 sps:$4 sm:$0xff]   ;;  %769 = vmatprep.subr.bf16.mxu1 %v8731_v1  ;;  %v8735_v4 = vld [vmem:[#allocation5 + $0xc4] ss:$16 sps:$4 sm:$0xff]  }
  0x85   :  { %657 = vmatpush1.bf16.msra.mxu0 %v8733_v2  ;;  %770 = vmatpush1.bf16.msra.mxu1 %v8734_v3  ;;  %v8737_v5 = vld [vmem:[#allocation5 + $0xcc] ss:$16 sps:$4 sm:$0xff]   ;;  %v8739_v6 = vld [vmem:[#allocation5 + $0xc0] ss:$16 sps:$4 sm:$0xff]   ;;  %v8740_v7 = vld [vmem:[#allocation5 + $0xc8] ss:$16 sps:$4 sm:$0xff]  }
  0x86   :  { %658 = vmatprep.subr.bf16.mxu0 %v8735_v4  ;;  %771 = vmatprep.subr.bf16.mxu1 %v8737_v5  ;;  %v8741_v8 = vld [vmem:[#allocation5 + $0xa4] ss:$16 sps:$4 sm:$0xff]   ;;  %v8743_v9 = vld [vmem:[#allocation5 + $0xac] ss:$16 sps:$4 sm:$0xff]   ;;  %v8745_v10 = vld [vmem:[#allocation5 + $0xa0] ss:$16 sps:$4 sm:$0xff]  }
  0x87   :  { %v8746_v11 = vld [vmem:[#allocation5 + $0xa8] ss:$16 sps:$4 sm:$0xff]   ;;  %v8747_v12 = vld [vmem:[#allocation5 + $0x84] ss:$16 sps:$4 sm:$0xff]   ;;  %v8749_v13 = vld [vmem:[#allocation5 + $0x8c] ss:$16 sps:$4 sm:$0xff]  }
  0x88   :  { %v8751_v14 = vld [vmem:[#allocation5 + $0x80] ss:$16 sps:$4 sm:$0xff]   ;;  %v8752_v15 = vld [vmem:[#allocation5 + $0x88] ss:$16 sps:$4 sm:$0xff]   ;;  %v8753_v16 = vld [vmem:[#allocation5 + $0x64] ss:$16 sps:$4 sm:$0xff]  }
  0x89   :  { %659 = vmatpush1.bf16.msra.mxu0 %v8739_v6  ;;  %772 = vmatpush1.bf16.msra.mxu1 %v8740_v7  ;;  %v8755_v17 = vld [vmem:[#allocation5 + $0x6c] ss:$16 sps:$4 sm:$0xff]   ;;  %v8757_v18 = vld [vmem:[#allocation5 + $0x60] ss:$16 sps:$4 sm:$0xff]   ;;  %v8758_v19 = vld [vmem:[#allocation5 + $0x68] ss:$16 sps:$4 sm:$0xff]  }
  0x8a   :  { %660 = vmatprep.subr.bf16.mxu0 %v8741_v8  ;;  %773 = vmatprep.subr.bf16.mxu1 %v8743_v9  ;;  %v8759_v20 = vld [vmem:[#allocation5 + $0x44] ss:$16 sps:$4 sm:$0xff]   ;;  %v8761_v21 = vld [vmem:[#allocation5 + $0x4c] ss:$16 sps:$4 sm:$0xff]   ;;  %v8763_v22 = vld [vmem:[#allocation5 + $0x40] ss:$16 sps:$4 sm:$0xff]  }
  0x8b   :  { %v8764_v23 = vld [vmem:[#allocation5 + $0x48] ss:$16 sps:$4 sm:$0xff]   ;;  %v8765_v24 = vld [vmem:[#allocation5 + $0x24] ss:$16 sps:$4 sm:$0xff]   ;;  %v8767_v25 = vld [vmem:[#allocation5 + $0x2c] ss:$16 sps:$4 sm:$0xff]  }
  0x8c   :  { %v8769_v26 = vld [vmem:[#allocation5 + $0x20] ss:$16 sps:$4 sm:$0xff]   ;;  %v8770_v27 = vld [vmem:[#allocation5 + $0x28] ss:$16 sps:$4 sm:$0xff]   ;;  %v8771_v28 = vld [vmem:[#allocation5 + $0x4] ss:$16 sps:$4 sm:$0xff]  }
  0x8d   :  { %661 = vmatpush1.bf16.msra.mxu0 %v8745_v10  ;;  %774 = vmatpush1.bf16.msra.mxu1 %v8746_v11  ;;  %v8773_v29 = vld [vmem:[#allocation5 + $0xc] ss:$16 sps:$4 sm:$0xff]   ;;  %v252_v30 = vld [vmem:[#allocation5 + $0x1a0] sm:$0xff]  ;;  %v8776_v33 = vld [vmem:[#allocation5 + $0x8] ss:$16 sps:$4 sm:$0xff]   ;;  %vm643_vm0 = vcmask 1043456  }
  0x8e   :  { %662 = vmatprep.subr.bf16.mxu0 %v8747_v12  ;;  %775 = vmatprep.subr.bf16.mxu1 %v8749_v13  ;;  %v253_v31 = vld [vmem:[#allocation5 + $0x1a8] sm:$0xff]  ;;  %v8775_v32 = vld [vmem:[#allocation5] ss:$16 sps:$4 sm:$0xff]   ;;  %v7854_v34 = vcombine.high %v252_v30, %v252_v30  ;;  %v7853_v36 = vcombine.low %v252_v30, %v252_v30  ;;  %v8781_v38 = vld [vmem:[#allocation5 + $0x184] ss:$16 sps:$4 sm:$0xff]   ;;  %vm618_vm1 = vcmask 719872  }
  0x8f   :  { %v7856_v35 = vcombine.high %v253_v31, %v253_v31  ;;  %v7855_v37 = vcombine.low %v253_v31, %v253_v31  ;;  %v8783_v41 = vld [vmem:[#allocation5 + $0x18c] ss:$16 sps:$4 sm:$0xff]   ;;  %v8785_v42 = vld [vmem:[#allocation5 + $0x180] ss:$16 sps:$4 sm:$0xff]   ;;  %v8786_v43 = vld [vmem:[#allocation5 + $0x188] ss:$16 sps:$4 sm:$0xff]  }
  0x90   :  { %v645_v39 = vsel %vm643_vm0, %v7853_v36, 0  ;;  %v8787_v44 = vld [vmem:[#allocation5 + $0x164] ss:$16 sps:$4 sm:$0xff]   ;;  %v8789_v46 = vld [vmem:[#allocation5 + $0x16c] ss:$16 sps:$4 sm:$0xff]  }
  0x91   :  { %663 = vmatpush1.bf16.msra.mxu0 %v8751_v14  ;;  %776 = vmatpush1.bf16.msra.mxu1 %v8752_v15  ;;  %v651_v40 = vsel %vm643_vm0, %v7855_v37, 0  ;;  %v8813_v45 = vld [vmem:[%s11503_s0 + $0x4] ss:$8 sps:$4 sm:$0xff]   ;;  %v8791_v47 = vld [vmem:[#allocation5 + $0x160] ss:$16 sps:$4 sm:$0xff]  }
  0x92   :  { %664 = vmatprep.subr.bf16.mxu0 %v8753_v16  ;;  %777 = vmatprep.subr.bf16.mxu1 %v8755_v17  ;;  %v8792_v48 = vld [vmem:[#allocation5 + $0x168] ss:$16 sps:$4 sm:$0xff]   ;;  %v8793_v49 = vld [vmem:[#allocation5 + $0x144] ss:$16 sps:$4 sm:$0xff]   ;;  %v8795_v50 = vld [vmem:[#allocation5 + $0x14c] ss:$16 sps:$4 sm:$0xff]  }
  0x93   :  { %7858 = vmatprep.mubr.msk.bf16.mxu0 %vm618_vm1, %v8813_v45  ;;  %7867 = vmatprep.mubr.msk.bf16.mxu1 %vm618_vm1, %v8813_v45  ;;  %v8797_v51 = vld [vmem:[#allocation5 + $0x140] ss:$16 sps:$4 sm:$0xff]   ;;  %v8798_v52 = vld [vmem:[#allocation5 + $0x148] ss:$16 sps:$4 sm:$0xff]   ;;  %v8799_v53 = vld [vmem:[#allocation5 + $0x124] ss:$16 sps:$4 sm:$0xff]   ;;  %v256_v45 = vlaneseq }
  0x94   :  { %v8801_v54 = vld [vmem:[#allocation5 + $0x12c] ss:$16 sps:$4 sm:$0xff]   ;;  %v8803_v55 = vld [vmem:[#allocation5 + $0x120] ss:$16 sps:$4 sm:$0xff]   ;;  %v8804_v56 = vld [vmem:[#allocation5 + $0x128] ss:$16 sps:$4 sm:$0xff]  }
  0x95   :  { %665 = vmatpush1.bf16.msra.mxu0 %v8757_v18  ;;  %778 = vmatpush1.bf16.msra.mxu1 %v8758_v19  ;;  %v8805_v57 = vld [vmem:[#allocation5 + $0x104] ss:$16 sps:$4 sm:$0xff]   ;;  %v8807_v58 = vld [vmem:[#allocation5 + $0x10c] ss:$16 sps:$4 sm:$0xff]   ;;  %v8809_v59 = vld [vmem:[#allocation5 + $0x100] ss:$16 sps:$4 sm:$0xff]  }
  0x96   :  { %666 = vmatprep.subr.bf16.mxu0 %v8759_v20  ;;  %779 = vmatprep.subr.bf16.mxu1 %v8761_v21  ;;  %v8810_v60 = vld [vmem:[#allocation5 + $0x108] ss:$16 sps:$4 sm:$0xff]   ;;  %v10649_v61 = vld [vmem:[#allocation7 + $0xe4] ss:$16 sps:$4 sm:$0xff]   ;;  %v10651_v62 = vld [vmem:[#allocation7 + $0xec] ss:$16 sps:$4 sm:$0xff]  }
  0x97   :  { %v8811_v63 = vld [vmem:[%s11503_s0] ss:$8 sps:$4 sm:$0xff]   ;;  %v8817_v1 = vld [vmem:[%s11503_s0 + $0x14] ss:$8 sps:$4 sm:$0xff]   ;;  %v8819_v8 = vld [vmem:[%s11503_s0 + $0x10] ss:$8 sps:$4 sm:$0xff]  }
  0x98   :  { %v10656_v0 = vld [vmem:[#allocation7 + $0xe0] ss:$16 sps:$4 sm:$0xff]   ;;  %v10662_v2 = vld [vmem:[#allocation7 + $0xc4] ss:$16 sps:$4 sm:$0xff]   ;;  %v10665_v3 = vld [vmem:[#allocation7 + $0xe8] ss:$16 sps:$4 sm:$0xff]  }
  0x99   :  { %667 = vmatpush1.bf16.msra.mxu0 %v8763_v22  ;;  %780 = vmatpush1.bf16.msra.mxu1 %v8764_v23  ;;  %v10667_v4 = vld [vmem:[#allocation7 + $0xcc] ss:$16 sps:$4 sm:$0xff]   ;;  %v10671_v5 = vld [vmem:[#allocation7 + $0xc0] ss:$16 sps:$4 sm:$0xff]   ;;  %v10675_v6 = vld [vmem:[#allocation7 + $0xa4] ss:$16 sps:$4 sm:$0xff]  }
  0x9a   :  { %668 = vmatprep.subr.bf16.mxu0 %v8765_v24  ;;  %781 = vmatprep.subr.bf16.mxu1 %v8767_v25  ;;  %v10678_v7 = vld [vmem:[#allocation7 + $0xc8] ss:$16 sps:$4 sm:$0xff]   ;;  %v8823_v9 = vld [vmem:[%s11503_s0 + $0x24] ss:$8 sps:$4 sm:$0xff]   ;;  %v10688_v10 = vld [vmem:[#allocation7 + $0xa0] ss:$16 sps:$4 sm:$0xff]  }
  0x9b   :  { %v10691_v11 = vld [vmem:[#allocation7 + $0x84] ss:$16 sps:$4 sm:$0xff]   ;;  %v10693_v12 = vld [vmem:[#allocation7 + $0xac] ss:$16 sps:$4 sm:$0xff]   ;;  %v10696_v13 = vld [vmem:[#allocation7 + $0xa8] ss:$16 sps:$4 sm:$0xff]  }
  0x9c   :  { %v10698_v14 = vld [vmem:[#allocation7 + $0x80] ss:$16 sps:$4 sm:$0xff]   ;;  %v10700_v15 = vld [vmem:[#allocation7 + $0x8c] ss:$16 sps:$4 sm:$0xff]   ;;  %v10704_v16 = vld [vmem:[#allocation7 + $0x64] ss:$16 sps:$4 sm:$0xff]  }
  0x9d   :  { %669 = vmatpush1.bf16.msra.mxu0 %v8769_v26  ;;  %782 = vmatpush1.bf16.msra.mxu1 %v8770_v27  ;;  %v10706_v17 = vld [vmem:[#allocation7 + $0x88] ss:$16 sps:$4 sm:$0xff]   ;;  %v8832_v19 = vld [vmem:[%s11503_s0 + $0x34] ss:$8 sps:$4 sm:$0xff]   ;;  %v10718_v20 = vld [vmem:[#allocation7 + $0x60] ss:$16 sps:$4 sm:$0xff]  }
  0x9e   :  { %670 = vmatprep.subr.bf16.mxu0 %v8771_v28  ;;  %783 = vmatprep.subr.bf16.mxu1 %v8773_v29  ;;  %v8825_v18 = vld [vmem:[%s11503_s0 + $0x20] ss:$8 sps:$4 sm:$0xff]   ;;  %v10721_v21 = vld [vmem:[#allocation7 + $0x6c] ss:$16 sps:$4 sm:$0xff]   ;;  %v10723_v22 = vld [vmem:[#allocation7 + $0x44] ss:$16 sps:$4 sm:$0xff]  }
  0x9f   :  { %v10725_v23 = vld [vmem:[#allocation7 + $0x68] ss:$16 sps:$4 sm:$0xff]   ;;  %v10728_v24 = vld [vmem:[#allocation7 + $0x4c] ss:$16 sps:$4 sm:$0xff]   ;;  %v10732_v25 = vld [vmem:[#allocation7 + $0x40] ss:$16 sps:$4 sm:$0xff]  }
  0xa0   :  { %v10736_v26 = vld [vmem:[#allocation7 + $0x24] ss:$16 sps:$4 sm:$0xff]   ;;  %v10738_v27 = vld [vmem:[#allocation7 + $0x48] ss:$16 sps:$4 sm:$0xff]   ;;  %v10750_v30 = vld [vmem:[#allocation7 + $0x20] ss:$16 sps:$4 sm:$0xff]  }
  0xa1   :  { %671 = vmatpush1.bf16.msra.mxu0 %v8775_v32  ;;  %784 = vmatpush1.bf16.msra.mxu1 %v8776_v33  ;;  %v8834_v28 = vld [vmem:[%s11503_s0 + $0x30] ss:$8 sps:$4 sm:$0xff]   ;;  %v8841_v29 = vld [vmem:[%s11503_s0 + $0x44] ss:$8 sps:$4 sm:$0xff]   ;;  %v8843_v37 = vld [vmem:[%s11503_s0 + $0x40] ss:$8 sps:$4 sm:$0xff]  }
  0xa2   :  { %7857 = vmatprep.subr.msk.bf16.mxu0 %vm643_vm0, %v7854_v34  ;;  %7866 = vmatprep.subr.msk.bf16.mxu1 %vm643_vm0, %v7856_v35  ;;  %v10753_v31 = vld [vmem:[#allocation7 + $0x2c] ss:$16 sps:$4 sm:$0xff]   ;;  %v10755_v32 = vld [vmem:[#allocation7 + $0x4] ss:$16 sps:$4 sm:$0xff]   ;;  %v10757_v33 = vld [vmem:[#allocation7 + $0x28] ss:$16 sps:$4 sm:$0xff]  }
  0xa3   :  { %v10760_v34 = vld [vmem:[#allocation7 + $0xc] ss:$16 sps:$4 sm:$0xff]   ;;  %v10764_v35 = vld [vmem:[#allocation7] ss:$16 sps:$4 sm:$0xff]   ;;  %v10768_v36 = vld [vmem:[#allocation7 + $0x8] ss:$16 sps:$4 sm:$0xff]  }
  0xa5   :  { %677 = vmatpush2.bf16.msra.mxu0 %v645_v39  ;;  %790 = vmatpush2.bf16.msra.mxu1 %v651_v40  ;;  %v8852_v39 = vld [vmem:[%s11503_s0 + $0x50] ss:$8 sps:$4 sm:$0xff]   ;;  %v8859_v40 = vld [vmem:[%s11503_s0 + $0x64] ss:$8 sps:$4 sm:$0xff]  }
  0xa6   :  { %678 = vmatprep.subr.bf16.mxu0 %v8781_v38  ;;  %791 = vmatprep.subr.bf16.mxu1 %v8783_v41  ;;  %v8850_v38 = vld [vmem:[%s11503_s0 + $0x54] ss:$8 sps:$4 sm:$0xff]   ;;  %v8861_v41 = vld [vmem:[%s11503_s0 + $0x60] ss:$8 sps:$4 sm:$0xff]  }
  0xa9   :  { %679 = vmatpush2.bf16.msra.mxu0 %v8785_v42  ;;  %792 = vmatpush2.bf16.msra.mxu1 %v8786_v43  ;;  %v8871_v42 = vld [vmem:[%s11503_s0 + $0x74] ss:$8 sps:$4 sm:$0xff]   ;;  %v8873_v43 = vld [vmem:[%s11503_s0 + $0x70] ss:$8 sps:$4 sm:$0xff]   ;;  %s10525_s0 = smov [#allocation20]  }
  0xaa   :  { %680 = vmatprep.subr.bf16.mxu0 %v8787_v44  ;;  %793 = vmatprep.subr.bf16.mxu1 %v8789_v46  ;;  %v11516_v44 = vmov 0   ;;  %v257_v46 = vshrl.u32 %v256_v45, 7  ;;  %s7768_s17 = sshll.u32 %s10525_s0, 4  ;;  %s7769_s17 = int_to_ptr.vmem [resolvable:$true] %s7768_s17 }
  0xab   :  { %s10475_s18 = scalar_lea.vmem %s7769_s17, 256  ;;  %p10480_p0 = scmp.lt.s32.totalorder %s7769_s17, %s7769_s17 }
  0xac   :  { %p10476_p13 = scmp.ne.s32.totalorder %s7769_s17, %s10475_s18  ;;  %p10481_p1 = scmp.lt.s32.totalorder %s10475_s18, %s10475_s18 }
  0xad   :  { %681 = vmatpush2.bf16.msra.mxu0 %v8791_v47  ;;  %794 = vmatpush2.bf16.msra.mxu1 %v8792_v48 }
  0xae   :  { %682 = vmatprep.subr.bf16.mxu0 %v8793_v49  ;;  %795 = vmatprep.subr.bf16.mxu1 %v8795_v50  ;;  %v254_v49 = vld [vmem:[#allocation8] sm:$0xf]  ;;  %p10482_p2 = por %p10481_p1, %p10480_p0 }
  0xb0   :  { %p10483_p3 = pnand %p10482_p2, %p10476_p13 }
  0xb1   :  { %683 = vmatpush2.bf16.msra.mxu0 %v8797_v51  ;;  %796 = vmatpush2.bf16.msra.mxu1 %v8798_v52  ;;  %v10852_v52 = vsub.s32 0, %v257_v46 }
  0xb2   :  { %684 = vmatprep.subr.bf16.mxu0 %v8799_v53  ;;  %797 = vmatprep.subr.bf16.mxu1 %v8801_v54  ;;  %v10854_v53 = vsub.s32 2, %v257_v46 }
  0xb3   :  { %11526 = vst [vmem:[#allocation28_spill] sm:$0xff] %v10852_v52 }
  0xb4   :  { %11527 = vst [vmem:[#allocation29_spill] sm:$0xff] %v10854_v53 }
  0xb5   :  { %685 = vmatpush2.bf16.msra.mxu0 %v8803_v55  ;;  %798 = vmatpush2.bf16.msra.mxu1 %v8804_v56  ;;  %v10860_v56 = vsub.s32 1, %v257_v46 }
  0xb6   :  { %686 = vmatprep.subr.bf16.mxu0 %v8805_v57  ;;  %799 = vmatprep.subr.bf16.mxu1 %v8807_v58  ;;  %v10862_v57 = vsub.s32 3, %v257_v46 }
  0xb7   :  { %11528 = vst [vmem:[#allocation30_spill] sm:$0xff] %v10860_v56 }
  0xb8   :  { %11529 = vst [vmem:[#allocation31_spill] sm:$0xff] %v10862_v57 }
  0xb9   :  { %687 = vmatpush2.bf16.msra.mxu0 %v8809_v59  ;;  %800 = vmatpush2.bf16.msra.mxu1 %v8810_v60  ;;  %v10869_v60 = vrot.slane %v254_v49, %v10852_v52 }
  0xba   :  { %1074 = vmatprep.subr.bf16.mxu0 %v10649_v61  ;;  %1117 = vmatprep.subr.bf16.mxu1 %v10651_v62 }
  0xbc   :  { %689 = vmatmul.mubr.bf16.vlgmr.msra.gmra.mxu0 %v8811_v63  ;;  %802 = vmatmul.mubr.bf16.vlgmr.msra.gmra.mxu1 %v8811_v63 }
  0xbd   :  { %1075 = vmatpush1.bf16.msra.mxu0 %v10656_v0  ;;  %7859 = vmatprep.mubr.msk.bf16.mxu0 %vm618_vm1, %v8817_v1 }
  0xbe   :  { %7868 = vmatprep.mubr.msk.bf16.mxu1 %vm618_vm1, %v8817_v1  ;;  %1076 = vmatprep.subr.bf16.mxu0 %v10662_v2  ;;  %v10878_v1 = vrot.slane %v254_v49, %v10862_v57 }
  0xbf   :  { %1118 = vmatpush1.bf16.msra.mxu1 %v10665_v3 }
  0xc0   :  { %1119 = vmatprep.subr.bf16.mxu1 %v10667_v4 }
  0xc1   :  { %1077 = vmatpush1.bf16.msra.mxu0 %v10671_v5 }
  0xc2   :  { %1078 = vmatprep.subr.bf16.mxu0 %v10675_v6 }
  0xc3   :  { %1120 = vmatpush1.bf16.msra.mxu1 %v10678_v7 }
  0xc4   :  { %699 = vmatmul.mubr.bf16.gmra.mxu0 %v8819_v8  ;;  %812 = vmatmul.mubr.bf16.gmra.mxu1 %v8819_v8 }
  0xc5   :  { %7860 = vmatprep.mubr.msk.bf16.mxu0 %vm618_vm1, %v8823_v9  ;;  %7869 = vmatprep.mubr.msk.bf16.mxu1 %vm618_vm1, %v8823_v9 }
  0xc6   :  { %1079 = vmatpush1.bf16.msra.mxu0 %v10688_v10  ;;  %1121 = vmatprep.subr.bf16.mxu1 %v10693_v12 }
  0xc7   :  { %1080 = vmatprep.subr.bf16.mxu0 %v10691_v11  ;;  %1122 = vmatpush1.bf16.msra.mxu1 %v10696_v13 }
  0xc8   :  { %1123 = vmatprep.subr.bf16.mxu1 %v10700_v15 }
  0xca   :  { %1081 = vmatpush1.bf16.msra.mxu0 %v10698_v14 }
  0xcb   :  { %1082 = vmatprep.subr.bf16.mxu0 %v10704_v16  ;;  %1124 = vmatpush1.bf16.msra.mxu1 %v10706_v17 }
  0xcc   :  { %709 = vmatmul.mubr.bf16.gmra.mxu0 %v8825_v18  ;;  %822 = vmatmul.mubr.bf16.gmra.mxu1 %v8825_v18 }
  0xcd   :  { %7861 = vmatprep.mubr.msk.bf16.mxu0 %vm618_vm1, %v8832_v19  ;;  %7870 = vmatprep.mubr.msk.bf16.mxu1 %vm618_vm1, %v8832_v19 }
  0xce   :  { %1083 = vmatpush1.bf16.msra.mxu0 %v10718_v20  ;;  %1125 = vmatprep.subr.bf16.mxu1 %v10721_v21 }
  0xcf   :  { %1084 = vmatprep.subr.bf16.mxu0 %v10723_v22  ;;  %1126 = vmatpush1.bf16.msra.mxu1 %v10725_v23 }
  0xd0   :  { %1127 = vmatprep.subr.bf16.mxu1 %v10728_v24 }
  0xd2   :  { %1085 = vmatpush1.bf16.msra.mxu0 %v10732_v25 }
  0xd3   :  { %1086 = vmatprep.subr.bf16.mxu0 %v10736_v26  ;;  %1128 = vmatpush1.bf16.msra.mxu1 %v10738_v27 }
  0xd4   :  { %719 = vmatmul.mubr.bf16.gmra.mxu0 %v8834_v28  ;;  %832 = vmatmul.mubr.bf16.gmra.mxu1 %v8834_v28 }
  0xd5   :  { %7862 = vmatprep.mubr.msk.bf16.mxu0 %vm618_vm1, %v8841_v29  ;;  %7871 = vmatprep.mubr.msk.bf16.mxu1 %vm618_vm1, %v8841_v29 }
  0xd6   :  { %1087 = vmatpush1.bf16.msra.mxu0 %v10750_v30  ;;  %1129 = vmatprep.subr.bf16.mxu1 %v10753_v31 }
  0xd7   :  { %1088 = vmatprep.subr.bf16.mxu0 %v10755_v32  ;;  %1130 = vmatpush1.bf16.msra.mxu1 %v10757_v33 }
  0xd8   :  { %1131 = vmatprep.subr.bf16.mxu1 %v10760_v34 }
  0xda   :  { %1089 = vmatpush1.bf16.msra.mxu0 %v10764_v35 }
  0xdb   :  { %1132 = vmatpush1.bf16.msra.mxu1 %v10768_v36  ;;  %1217 = vmatprep.subr.bf16.mxu0 %v10649_v61 }
  0xdc   :  { %729 = vmatmul.mubr.bf16.gmra.mxu0 %v8843_v37  ;;  %842 = vmatmul.mubr.bf16.gmra.mxu1 %v8843_v37 }
  0xdd   :  { %7863 = vmatprep.mubr.msk.bf16.mxu0 %vm618_vm1, %v8850_v38  ;;  %7872 = vmatprep.mubr.msk.bf16.mxu1 %vm618_vm1, %v8850_v38 }
  0xde   :  { %1260 = vmatprep.subr.bf16.mxu1 %v10651_v62 }
  0xe4   :  { %739 = vmatmul.mubr.bf16.gmra.mxu0 %v8852_v39  ;;  %852 = vmatmul.mubr.bf16.gmra.mxu1 %v8852_v39 }
  0xe5   :  { %7864 = vmatprep.mubr.msk.bf16.mxu0 %vm618_vm1, %v8859_v40  ;;  %7873 = vmatprep.mubr.msk.bf16.mxu1 %vm618_vm1, %v8859_v40 }
  0xec   :  { %749 = vmatmul.mubr.bf16.gmra.mxu0 %v8861_v41  ;;  %862 = vmatmul.mubr.bf16.gmra.mxu1 %v8861_v41 }
  0xed   :  { %7865 = vmatprep.mubr.msk.bf16.mxu0 %vm618_vm1, %v8871_v42  ;;  %7874 = vmatprep.mubr.msk.bf16.mxu1 %vm618_vm1, %v8871_v42 }
  0xf4   :  { %759 = vmatmul.mubr.bf16.gmra.mxu0 %v8873_v43  ;;  %872 = vmatmul.mubr.bf16.gmra.mxu1 %v8873_v43 }
  0xf5   :  { %1106 = vmatprep.mubr.bf16.mxu0 %v11516_v44  ;;  %1149 = vmatprep.mubr.bf16.mxu1 %v11516_v44 }
  0xfc   :  { %1107 = vmatmul.mubr.bf16.vlgmr.msra.gmra.mxu0 %v11516_v44  ;;  %1150 = vmatmul.mubr.bf16.vlgmr.msra.gmra.mxu1 %v11516_v44 }
  0xfd   :  { %1218 = vmatpush1.bf16.msra.mxu0 %v10656_v0  ;;  %1261 = vmatpush1.bf16.msra.mxu1 %v10665_v3  ;;  %v10875_v0 = vrot.slane %v254_v49, %v10860_v56 }
  0xfe   :  { %1219 = vmatprep.subr.bf16.mxu0 %v10662_v2  ;;  %1262 = vmatprep.subr.bf16.mxu1 %v10667_v4 }
  0xff   :  { %1249 = vmatprep.mubr.bf16.mxu0 %v11516_v44  ;;  %1292 = vmatprep.mubr.bf16.mxu1 %v11516_v44 }
 0x101   :  { %1220 = vmatpush1.bf16.msra.mxu0 %v10671_v5  ;;  %1263 = vmatpush1.bf16.msra.mxu1 %v10678_v7 }
 0x102   :  { %1221 = vmatprep.subr.bf16.mxu0 %v10675_v6  ;;  %1264 = vmatprep.subr.bf16.mxu1 %v10693_v12 }
 0x105   :  { %1222 = vmatpush1.bf16.msra.mxu0 %v10688_v10  ;;  %1265 = vmatpush1.bf16.msra.mxu1 %v10696_v13 }
 0x106   :  { %1223 = vmatprep.subr.bf16.mxu0 %v10691_v11  ;;  %1266 = vmatprep.subr.bf16.mxu1 %v10700_v15 }
 0x109   :  { %1224 = vmatpush1.bf16.msra.mxu0 %v10698_v14  ;;  %1267 = vmatpush1.bf16.msra.mxu1 %v10706_v17 }
 0x10a   :  { %1225 = vmatprep.subr.bf16.mxu0 %v10704_v16  ;;  %1268 = vmatprep.subr.bf16.mxu1 %v10721_v21 }
 0x10d   :  { %1226 = vmatpush1.bf16.msra.mxu0 %v10718_v20  ;;  %1269 = vmatpush1.bf16.msra.mxu1 %v10725_v23 }
 0x10e   :  { %1227 = vmatprep.subr.bf16.mxu0 %v10723_v22  ;;  %1270 = vmatprep.subr.bf16.mxu1 %v10728_v24 }
 0x111   :  { %1228 = vmatpush1.bf16.msra.mxu0 %v10732_v25  ;;  %1271 = vmatpush1.bf16.msra.mxu1 %v10738_v27 }
 0x112   :  { %1229 = vmatprep.subr.bf16.mxu0 %v10736_v26  ;;  %1272 = vmatprep.subr.bf16.mxu1 %v10753_v31 }
 0x115   :  { %1230 = vmatpush1.bf16.msra.mxu0 %v10750_v30  ;;  %1273 = vmatpush1.bf16.msra.mxu1 %v10757_v33 }
 0x116   :  { %1231 = vmatprep.subr.bf16.mxu0 %v10755_v32  ;;  %1274 = vmatprep.subr.bf16.mxu1 %v10760_v34 }
 0x119   :  { %1232 = vmatpush1.bf16.msra.mxu0 %v10764_v35  ;;  %1275 = vmatpush1.bf16.msra.mxu1 %v10768_v36 }
 0x11a   :  { %1360 = vmatprep.subr.bf16.mxu0 %v10649_v61  ;;  %1403 = vmatprep.subr.bf16.mxu1 %v10651_v62  ;;  %v10872_v61 = vrot.slane %v254_v49, %v10854_v53 }
 0x17c   :  { %v10844_v47 = vpop.f32.mrf.mxu0  ;;  %v10846_v48 = vpop.f32.mrf.mxu1 }
 0x17e   :  { %v10848_v50 = vpop.f32.mrf.mxu0  ;;  %v10850_v51 = vpop.f32.mrf.mxu1 }
 0x180   :  { %v10856_v54 = vpop.f32.mrf.mxu0  ;;  %v10858_v55 = vpop.f32.mrf.mxu1 }
 0x182   :  { %v10864_v58 = vpop.f32.mrf.mxu0  ;;  %v10866_v59 = vpop.f32.mrf.mxu1 }
 0x184   :  { %v700_v62 = vpop.f32.mrf.mxu0  ;;  %v813_v63 = vpop.f32.mrf.mxu1 }
 0x185   :  { %v10881_v2 = vadd.f32 %v700_v62, %v10869_v60  ;;  %v10884_v3 = vadd.f32 %v813_v63, %v10872_v61 }
 0x186   :  { %v702_v4 = vpop.f32.mrf.mxu0  ;;  %v815_v5 = vpop.f32.mrf.mxu1 }
 0x187   :  { %v10887_v6 = vadd.f32 %v702_v4, %v10875_v0  ;;  %v10890_v7 = vadd.f32 %v815_v5, %v10878_v1 }
 0x188   :  { %v704_v8 = vpop.f32.mrf.mxu0  ;;  %v817_v9 = vpop.f32.mrf.mxu1 }
 0x189   :  { %v10893_v10 = vadd.f32 %v704_v8, %v10869_v60  ;;  %v10896_v11 = vadd.f32 %v817_v9, %v10872_v61 }
 0x18a   :  { %v706_v12 = vpop.f32.mrf.mxu0  ;;  %v819_v13 = vpop.f32.mrf.mxu1 }
 0x18b   :  { %v10899_v14 = vadd.f32 %v706_v12, %v10875_v0  ;;  %v10902_v15 = vadd.f32 %v819_v13, %v10878_v1 }
 0x18c   :  { %v710_v16 = vpop.f32.mrf.mxu0  ;;  %v823_v17 = vpop.f32.mrf.mxu1 }
 0x18d   :  { %v10905_v18 = vadd.f32 %v710_v16, %v10869_v60  ;;  %v10908_v19 = vadd.f32 %v823_v17, %v10872_v61 }
 0x18e   :  { %v712_v20 = vpop.f32.mrf.mxu0  ;;  %v825_v21 = vpop.f32.mrf.mxu1 }
 0x18f   :  { %v10911_v22 = vadd.f32 %v712_v20, %v10875_v0  ;;  %v10914_v23 = vadd.f32 %v825_v21, %v10878_v1 }
 0x190   :  { %v714_v24 = vpop.f32.mrf.mxu0  ;;  %v827_v25 = vpop.f32.mrf.mxu1 }
 0x191   :  { %v10917_v26 = vadd.f32 %v714_v24, %v10869_v60  ;;  %v10920_v27 = vadd.f32 %v827_v25, %v10872_v61 }
 0x192   :  { %v716_v28 = vpop.f32.mrf.mxu0  ;;  %v829_v29 = vpop.f32.mrf.mxu1 }
 0x193   :  { %11530 = vst [vmem:[#allocation32_spill] sm:$0xff] %v10920_v27  ;;  %v10923_v30 = vadd.f32 %v716_v28, %v10875_v0  ;;  %v10926_v31 = vadd.f32 %v829_v29, %v10878_v1 }
 0x194   :  { %v720_v32 = vpop.f32.mrf.mxu0  ;;  %v833_v33 = vpop.f32.mrf.mxu1 }
 0x195   :  { %11531 = vst [vmem:[#allocation33_spill] sm:$0xff] %v10926_v31  ;;  %v10929_v34 = vadd.f32 %v720_v32, %v10869_v60  ;;  %v10932_v35 = vadd.f32 %v833_v33, %v10872_v61 }
 0x196   :  { %v722_v36 = vpop.f32.mrf.mxu0  ;;  %v835_v37 = vpop.f32.mrf.mxu1 }
 0x197   :  { %11532 = vst [vmem:[#allocation34_spill] sm:$0xff] %v10929_v34  ;;  %11533 = vst [vmem:[#allocation35_spill] sm:$0xff] %v10932_v35  ;;  %v10935_v38 = vadd.f32 %v722_v36, %v10875_v0  ;;  %v10938_v39 = vadd.f32 %v835_v37, %v10878_v1 }
 0x198   :  { %v724_v40 = vpop.f32.mrf.mxu0  ;;  %v837_v41 = vpop.f32.mrf.mxu1 }
 0x199   :  { %11534 = vst [vmem:[#allocation36_spill] sm:$0xff] %v10935_v38  ;;  %11535 = vst [vmem:[#allocation37_spill] sm:$0xff] %v10938_v39  ;;  %v10941_v42 = vadd.f32 %v724_v40, %v10869_v60  ;;  %v10944_v43 = vadd.f32 %v837_v41, %v10872_v61 }
 0x19a   :  { %v726_v45 = vpop.f32.mrf.mxu0  ;;  %v839_v46 = vpop.f32.mrf.mxu1 }
 0x19b   :  { %11536 = vst [vmem:[#allocation38_spill] sm:$0xff] %v10941_v42  ;;  %11537 = vst [vmem:[#allocation39_spill] sm:$0xff] %v10944_v43  ;;  %v10947_v49 = vadd.f32 %v726_v45, %v10875_v0  ;;  %v10950_v62 = vadd.f32 %v839_v46, %v10878_v1 }
 0x19c   :  { %v730_v63 = vpop.f32.mrf.mxu0  ;;  %v843_v4 = vpop.f32.mrf.mxu1 }
 0x19d   :  { %11538 = vst [vmem:[#allocation40_spill] sm:$0xff] %v10947_v49  ;;  %11539 = vst [vmem:[#allocation41_spill] sm:$0xff] %v10950_v62  ;;  %v10953_v5 = vadd.f32 %v730_v63, %v10869_v60  ;;  %v10956_v8 = vadd.f32 %v843_v4, %v10872_v61 }
 0x19e   :  { %v732_v9 = vpop.f32.mrf.mxu0  ;;  %v845_v12 = vpop.f32.mrf.mxu1 }
 0x19f   :  { %11540 = vst [vmem:[#allocation42_spill] sm:$0xff] %v10953_v5  ;;  %11541 = vst [vmem:[#allocation43_spill] sm:$0xff] %v10956_v8  ;;  %v10959_v13 = vadd.f32 %v732_v9, %v10875_v0  ;;  %v10962_v16 = vadd.f32 %v845_v12, %v10878_v1  ;;  %v11165_v8 = vld [vmem:[#allocation7 + $0xec] ss:$16 sps:$4 sm:$0xff]  }
 0x1a0   :  { %v734_v17 = vpop.f32.mrf.mxu0  ;;  %v847_v20 = vpop.f32.mrf.mxu1 }
 0x1a1   :  { %11542 = vst [vmem:[#allocation44_spill] sm:$0xff] %v10959_v13  ;;  %11543 = vst [vmem:[#allocation45_spill] sm:$0xff] %v10962_v16  ;;  %v10965_v21 = vadd.f32 %v734_v17, %v10869_v60  ;;  %v10968_v24 = vadd.f32 %v847_v20, %v10872_v61 }
 0x1a2   :  { %v736_v25 = vpop.f32.mrf.mxu0  ;;  %v849_v28 = vpop.f32.mrf.mxu1 }
 0x1a3   :  { %11544 = vst [vmem:[#allocation46_spill] sm:$0xff] %v10965_v21  ;;  %11545 = vst [vmem:[#allocation47_spill] sm:$0xff] %v10968_v24  ;;  %v10971_v29 = vadd.f32 %v736_v25, %v10875_v0  ;;  %v10974_v32 = vadd.f32 %v849_v28, %v10878_v1  ;;  %v11159_v24 = vld [vmem:[#allocation7 + $0x8] ss:$16 sps:$4 sm:$0xff]  }
 0x1a4   :  { %v740_v33 = vpop.f32.mrf.mxu0  ;;  %v853_v36 = vpop.f32.mrf.mxu1 }
 0x1a5   :  { %11546 = vst [vmem:[#allocation48_spill] sm:$0xff] %v10971_v29  ;;  %11547 = vst [vmem:[#allocation49_spill] sm:$0xff] %v10974_v32  ;;  %v10977_v37 = vadd.f32 %v740_v33, %v10869_v60  ;;  %v10980_v40 = vadd.f32 %v853_v36, %v10872_v61  ;;  %v11162_v32 = vld [vmem:[#allocation7 + $0xe4] ss:$16 sps:$4 sm:$0xff]  }
 0x1a6   :  { %v742_v41 = vpop.f32.mrf.mxu0  ;;  %v855_v45 = vpop.f32.mrf.mxu1 }
 0x1a7   :  { %11548 = vst [vmem:[#allocation50_spill] sm:$0xff] %v10977_v37  ;;  %11549 = vst [vmem:[#allocation51_spill] sm:$0xff] %v10980_v40  ;;  %v10983_v46 = vadd.f32 %v742_v41, %v10875_v0  ;;  %v10986_v63 = vadd.f32 %v855_v45, %v10878_v1  ;;  %v11156_v37 = vld [vmem:[#allocation7] ss:$16 sps:$4 sm:$0xff]  }
 0x1a8   :  { %v744_v4 = vpop.f32.mrf.mxu0  ;;  %v857_v9 = vpop.f32.mrf.mxu1 }
 0x1a9   :  { %11550 = vst [vmem:[#allocation52_spill] sm:$0xff] %v10983_v46  ;;  %11551 = vst [vmem:[#allocation53_spill] sm:$0xff] %v10986_v63  ;;  %v10989_v12 = vadd.f32 %v744_v4, %v10869_v60  ;;  %v10992_v17 = vadd.f32 %v857_v9, %v10872_v61  ;;  %v11144_v63 = vld [vmem:[#allocation7 + $0x20] ss:$16 sps:$4 sm:$0xff]   ;;  %v11153_v46 = vld [vmem:[#allocation7 + $0xc] ss:$16 sps:$4 sm:$0xff]  }
 0x1aa   :  { %v746_v20 = vpop.f32.mrf.mxu0  ;;  %v859_v25 = vpop.f32.mrf.mxu1 }
 0x1ab   :  { %11552 = vst [vmem:[#allocation54_spill] sm:$0xff] %v10989_v12  ;;  %11553 = vst [vmem:[#allocation55_spill] sm:$0xff] %v10992_v17  ;;  %v10995_v28 = vadd.f32 %v746_v20, %v10875_v0  ;;  %v10998_v33 = vadd.f32 %v859_v25, %v10878_v1  ;;  %v11150_v12 = vld [vmem:[#allocation7 + $0x4] ss:$16 sps:$4 sm:$0xff]  }
 0x1ac   :  { %v750_v36 = vpop.f32.mrf.mxu0  ;;  %v863_v41 = vpop.f32.mrf.mxu1 }
 0x1ad   :  { %11554 = vst [vmem:[#allocation56_spill] sm:$0xff] %v10995_v28  ;;  %11555 = vst [vmem:[#allocation57_spill] sm:$0xff] %v10998_v33  ;;  %v11001_v45 = vadd.f32 %v750_v36, %v10869_v60  ;;  %v11004_v44 = vadd.f32 %v863_v41, %v10872_v61  ;;  %v11147_v28 = vld [vmem:[#allocation7 + $0x28] ss:$16 sps:$4 sm:$0xff]  }
 0x1ae   :  { %v752_v4 = vpop.f32.mrf.mxu0  ;;  %v865_v53 = vpop.f32.mrf.mxu1 }
 0x1af   :  { %11556 = vst [vmem:[#allocation58_spill] sm:$0xff] %v11001_v45  ;;  %11557 = vst [vmem:[#allocation59_spill] sm:$0xff] %v11004_v44  ;;  %v11007_v9 = vadd.f32 %v752_v4, %v10875_v0  ;;  %v11010_v57 = vadd.f32 %v865_v53, %v10878_v1 }
 0x1b0   :  { %v754_v20 = vpop.f32.mrf.mxu0  ;;  %v867_v56 = vpop.f32.mrf.mxu1 }
 0x1b1   :  { %11558 = vst [vmem:[#allocation60_spill] sm:$0xff] %v11007_v9  ;;  %11559 = vst [vmem:[#allocation61_spill] sm:$0xff] %v11010_v57  ;;  %v11013_v25 = vadd.f32 %v754_v20, %v10869_v60  ;;  %v11016_v52 = vadd.f32 %v867_v56, %v10872_v61 }
 0x1b2   :  { %v756_v36 = vpop.f32.mrf.mxu0  ;;  %v869_v45 = vpop.f32.mrf.mxu1 }
 0x1b3   :  { %11560 = vst [vmem:[#allocation62_spill] sm:$0xff] %v11013_v25  ;;  %11561 = vst [vmem:[#allocation63_spill] sm:$0xff] %v11016_v52  ;;  %v11019_v41 = vadd.f32 %v756_v36, %v10875_v0  ;;  %v11022_v44 = vadd.f32 %v869_v45, %v10878_v1 }
 0x1b4   :  { %v760_v4 = vpop.f32.mrf.mxu0  ;;  %v873_v9 = vpop.f32.mrf.mxu1 }
 0x1b5   :  { %11562 = vst [vmem:[#allocation64_spill] sm:$0xff] %v11019_v41  ;;  %11563 = vst [vmem:[#allocation65_spill] sm:$0xff] %v11022_v44  ;;  %v11025_v53 = vadd.f32 %v760_v4, %v10869_v60  ;;  %v11028_v57 = vadd.f32 %v873_v9, %v10872_v61  ;;  %v691_v9 = vadd.f32 %v10844_v47, %v10869_v60 }
 0x1b6   :  { %v762_v20 = vpop.f32.mrf.mxu0  ;;  %v875_v25 = vpop.f32.mrf.mxu1  ;;  %v697_v47 = vadd.f32 %v10864_v58, %v10875_v0 }
 0x1b7   :  { %11564 = vst [vmem:[#allocation66_spill] sm:$0xff] %v11025_v53  ;;  %11565 = vst [vmem:[#allocation67_spill] sm:$0xff] %v11028_v57  ;;  %v11031_v56 = vadd.f32 %v762_v20, %v10875_v0  ;;  %v11034_v52 = vadd.f32 %v875_v25, %v10878_v1 }
 0x1b8   :  { %v764_v36 = vpop.f32.mrf.mxu0  ;;  %v877_v41 = vpop.f32.mrf.mxu1 }
 0x1b9   :  { %11566 = vst [vmem:[#allocation68_spill] sm:$0xff] %v11031_v56  ;;  %11567 = vst [vmem:[#allocation69_spill] sm:$0xff] %v11034_v52  ;;  %v11037_v45 = vadd.f32 %v764_v36, %v10869_v60  ;;  %v11040_v44 = vadd.f32 %v877_v41, %v10872_v61  ;;  %v693_v52 = vadd.f32 %v10848_v50, %v10875_v0 }
 0x1ba   :  { %v766_v4 = vpop.f32.mrf.mxu0  ;;  %v879_v53 = vpop.f32.mrf.mxu1  ;;  %v695_v41 = vadd.f32 %v10856_v54, %v10869_v60  ;;  %v806_v54 = vadd.f32 %v10850_v51, %v10878_v1  ;;  %v804_v60 = vadd.f32 %v10846_v48, %v10872_v61 }
 0x1bb   :  { %11568 = vst [vmem:[#allocation70_spill] sm:$0xff] %v11037_v45  ;;  %11569 = vst [vmem:[#allocation71_spill] sm:$0xff] %v11040_v44  ;;  %v11045_v57 = vadd.f32 %v766_v4, %v10875_v0  ;;  %v11048_v20 = vadd.f32 %v879_v53, %v10878_v1 }
 0x1bc   :  { %v1108_v25 = vpop.f32.mrf.mxu0  ;;  %v1151_v45 = vpop.f32.mrf.mxu1 }
 0x1bd   :  { %11570 = vst [vmem:[#allocation72_spill] sm:$0xff] %v11045_v57  ;;  %11571 = vst [vmem:[#allocation73_spill] sm:$0xff] %v11048_v20  ;;  %v1160_v36 = vadd.f32 %v1108_v25, %v691_v9  ;;  %v1162_v0 = vadd.f32 %v1151_v45, %v804_v60 }
 0x1be   :  { %v1110_v56 = vpop.f32.mrf.mxu0  ;;  %v1153_v53 = vpop.f32.mrf.mxu1 }
 0x1bf   :  { %v7907_v44 = vmul.f32 -1.442695, %v1160_v36  ;;  %v1161_v17 = vadd.f32 %v1110_v56, %v693_v52  ;;  %v1163_v52 = vadd.f32 %v1153_v53, %v806_v54 }
 0x1c0   :  { %v1112_v33 = vpop.f32.mrf.mxu0  ;;  %v1155_v9 = vpop.f32.mrf.mxu1 }
 0x1c1   :  { %9929 = vpow2.f32 %v7907_v44  ;;  %v7909_v4 = vmul.f32 -1.442695, %v1161_v17  ;;  %v1164_v20 = vadd.f32 %v1112_v33, %v695_v41  ;;  %v810_v44 = vadd.f32 %v10866_v59, %v10878_v1 }
 0x1c2   :  { %v1114_v57 = vpop.f32.mrf.mxu0  ;;  %v1157_v58 = vpop.f32.mrf.mxu1  ;;  %v808_v17 = vadd.f32 %v10858_v55, %v10872_v61 }
 0x1c3   :  { %9931 = vpow2.f32 %v7909_v4  ;;  %v7908_v40 = vmul.f32 -1.442695, %v1164_v20  ;;  %v1165_v50 = vadd.f32 %v1114_v57, %v697_v47  ;;  %v7911_v57 = vmul.f32 -1.442695, %v1163_v52 }
 0x1c4   :  { %v1166_v56 = vadd.f32 %v1155_v9, %v808_v17 }
 0x1c5   :  { %9933 = vpow2.f32 %v7908_v40  ;;  %v7910_v25 = vmul.f32 -1.442695, %v1165_v50  ;;  %v1167_v40 = vadd.f32 %v1157_v58, %v810_v44 }
 0x1c7   :  { %9935 = vpow2.f32 %v7910_v25  ;;  %v7912_v36 = vmul.f32 -1.442695, %v1167_v40 }
 0x1c8   :  { %9937 = vtanh.f32 %v1162_v0 }
 0x1c9   :  { %9939 = vpow2.f32 %v7911_v57 }
 0x1ce   :  { %v9930_v33 = vpop.eup %9929 }
 0x1cf   :  { %v1174_v20 = vadd.f32 1.0, %v9930_v33 }
 0x1d0   :  { %v9932_v51 = vpop.eup %9931 }
 0x1d1   :  { %9941 = vrcp.f32 %v1174_v20  ;;  %v1186_v41 = vadd.f32 1.0, %v9932_v51 }
 0x1d2   :  { %v9934_v48 = vpop.eup %9933  ;;  %9943 = vtanh.f32 %v1166_v56 }
 0x1d3   :  { %9945 = vrcp.f32 %v1186_v41  ;;  %v1175_v47 = vadd.f32 1.0, %v9934_v48  ;;  %v11070_v48 = vld [vmem:[#allocation7 + $0xe0] ss:$16 sps:$4 sm:$0xff]  }
 0x1d4   :  { %v9936_v59 = vpop.eup %9935  ;;  %9947 = vpow2.f32 %v7912_v36 }
 0x1d5   :  { %9949 = vrcp.f32 %v1175_v47  ;;  %v1187_v1 = vadd.f32 1.0, %v9936_v59  ;;  %v9938_v55 = vpop.eup %9937  ;;  %v11073_v47 = vld [vmem:[#allocation7 + $0xe8] ss:$16 sps:$4 sm:$0xff]   ;;  %v11076_v59 = vld [vmem:[#allocation7 + $0xc4] ss:$16 sps:$4 sm:$0xff]  }
 0x1d6   :  { %v9940_v61 = vpop.eup %9939 }
 0x1d7   :  { %9951 = vrcp.f32 %v1187_v1  ;;  %v1200_v52 = vadd.f32 1.0, %v9940_v61  ;;  %v11079_v1 = vld [vmem:[#allocation7 + $0xcc] ss:$16 sps:$4 sm:$0xff]   ;;  %v11084_v61 = vld [vmem:[#allocation7 + $0xc0] ss:$16 sps:$4 sm:$0xff]  }
 0x1d9   :  { %9953 = vrcp.f32 %v1200_v52  ;;  %v11108_v52 = vld [vmem:[#allocation7 + $0x80] ss:$16 sps:$4 sm:$0xff]  }
 0x1de   :  { %v9942_v45 = vpop.eup %9941 }
 0x1df   :  { %v9944_v4 = vpop.eup %9943  ;;  %v1208_v53 = vmul.f32 %v9942_v45, %v9938_v55  ;;  %v11572_v55 = vmov 0   ;;  %v11087_v45 = vld [vmem:[#allocation7 + $0xc8] ss:$16 sps:$4 sm:$0xff]  }
 0x1e0   :  { %v9946_v50 = vpop.eup %9945 }
 0x1e1   :  { %v9948_v9 = vpop.eup %9947  ;;  %v1206_v25 = vmul.f32 0.0, %v9946_v50  ;;  %v11096_v50 = vld [vmem:[#allocation7 + $0xa0] ss:$16 sps:$4 sm:$0xff]  }
 0x1e2   :  { %v9950_v54 = vpop.eup %9949  ;;  %v1201_v0 = vadd.f32 1.0, %v9948_v9  ;;  %v11099_v9 = vld [vmem:[#allocation7 + $0xa8] ss:$16 sps:$4 sm:$0xff]  }
 0x1e3   :  { %v11064_v60 = vadd.f32 %v1208_v53, %v1206_v25  ;;  %v1209_v58 = vmul.f32 %v9950_v54, %v9944_v4  ;;  %v11090_v4 = vld [vmem:[#allocation7 + $0xa4] ss:$16 sps:$4 sm:$0xff]   ;;  %v11093_v53 = vld [vmem:[#allocation7 + $0xac] ss:$16 sps:$4 sm:$0xff]  }
 0x1e4   :  { %v9952_v44 = vpop.eup %9951  ;;  %v11102_v25 = vld [vmem:[#allocation7 + $0x84] ss:$16 sps:$4 sm:$0xff]   ;;  %v11105_v54 = vld [vmem:[#allocation7 + $0x8c] ss:$16 sps:$4 sm:$0xff]  }
 0x1e5   :  { %v1207_v17 = vmul.f32 0.0, %v9952_v44  ;;  %9955 = vtanh.f32 %v11064_v60  ;;  %v11114_v44 = vld [vmem:[#allocation7 + $0x64] ss:$16 sps:$4 sm:$0xff]  }
 0x1e6   :  { %9957 = vrcp.f32 %v1201_v0  ;;  %v9954_v40 = vpop.eup %9953  ;;  %v11117_v0 = vld [vmem:[#allocation7 + $0x6c] ss:$16 sps:$4 sm:$0xff]  }
 0x1e7   :  { %v11067_v57 = vadd.f32 %v1209_v58, %v1207_v17  ;;  %v11111_v58 = vld [vmem:[#allocation7 + $0x88] ss:$16 sps:$4 sm:$0xff]   ;;  %v11120_v17 = vld [vmem:[#allocation7 + $0x60] ss:$16 sps:$4 sm:$0xff]  }
 0x1e9   :  { %9959 = vtanh.f32 %v11067_v57 }
 0x1f2   :  { %v9956_v33 = vpop.eup %9955 }
 0x1f3   :  { %v9958_v56 = vpop.eup %9957  ;;  %v1214_v51 = vmul.f32 %v9956_v33, %v9954_v40  ;;  %v11123_v40 = vld [vmem:[#allocation7 + $0x68] ss:$16 sps:$4 sm:$0xff]   ;;  %v11126_v33 = vld [vmem:[#allocation7 + $0x44] ss:$16 sps:$4 sm:$0xff]  }
 0x1f6   :  { %v9960_v20 = vpop.eup %9959 }
 0x1f7   :  { %v1215_v36 = vmul.f32 %v9960_v20, %v9958_v56  ;;  %v11129_v56 = vld [vmem:[#allocation7 + $0x4c] ss:$16 sps:$4 sm:$0xff]   ;;  %v11132_v20 = vld [vmem:[#allocation7 + $0x40] ss:$16 sps:$4 sm:$0xff]  }
 0x1f9   :  { %v1216_v41 = vpack.c.bf16 %v1215_v36, %v1214_v51  ;;  %v11135_v51 = vld [vmem:[#allocation7 + $0x48] ss:$16 sps:$4 sm:$0xff]   ;;  %v11138_v36 = vld [vmem:[#allocation7 + $0x24] ss:$16 sps:$4 sm:$0xff]  }
 0x1fb   :  { %1250 = vmatmul.mubr.bf16.vlgmr.msra.gmra.mxu0 %v1216_v41  ;;  %1293 = vmatmul.mubr.bf16.vlgmr.msra.gmra.mxu1 %v1216_v41  ;;  %v11141_v41 = vld [vmem:[#allocation7 + $0x2c] ss:$16 sps:$4 sm:$0xff]  }
 0x1fc   :  { %1361 = vmatpush1.bf16.msra.mxu0 %v11070_v48  ;;  %1404 = vmatpush1.bf16.msra.mxu1 %v11073_v47 }
 0x1fd   :  { %1362 = vmatprep.subr.bf16.mxu0 %v11076_v59  ;;  %1405 = vmatprep.subr.bf16.mxu1 %v11079_v1 }
 0x1fe   :  { %1392 = vmatprep.mubr.bf16.mxu0 %v11572_v55  ;;  %1435 = vmatprep.mubr.bf16.mxu1 %v11572_v55 }
 0x200   :  { %1363 = vmatpush1.bf16.msra.mxu0 %v11084_v61  ;;  %1406 = vmatpush1.bf16.msra.mxu1 %v11087_v45 }
 0x201   :  { %1364 = vmatprep.subr.bf16.mxu0 %v11090_v4  ;;  %1407 = vmatprep.subr.bf16.mxu1 %v11093_v53 }
 0x204   :  { %1365 = vmatpush1.bf16.msra.mxu0 %v11096_v50  ;;  %1408 = vmatpush1.bf16.msra.mxu1 %v11099_v9 }
 0x205   :  { %1366 = vmatprep.subr.bf16.mxu0 %v11102_v25  ;;  %1409 = vmatprep.subr.bf16.mxu1 %v11105_v54 }
 0x208   :  { %1367 = vmatpush1.bf16.msra.mxu0 %v11108_v52  ;;  %1410 = vmatpush1.bf16.msra.mxu1 %v11111_v58 }
 0x209   :  { %1368 = vmatprep.subr.bf16.mxu0 %v11114_v44  ;;  %1411 = vmatprep.subr.bf16.mxu1 %v11117_v0 }
 0x20c   :  { %1369 = vmatpush1.bf16.msra.mxu0 %v11120_v17  ;;  %1412 = vmatpush1.bf16.msra.mxu1 %v11123_v40 }
 0x20d   :  { %1370 = vmatprep.subr.bf16.mxu0 %v11126_v33  ;;  %1413 = vmatprep.subr.bf16.mxu1 %v11129_v56 }
 0x210   :  { %1371 = vmatpush1.bf16.msra.mxu0 %v11132_v20  ;;  %1414 = vmatpush1.bf16.msra.mxu1 %v11135_v51 }
 0x211   :  { %1372 = vmatprep.subr.bf16.mxu0 %v11138_v36  ;;  %1415 = vmatprep.subr.bf16.mxu1 %v11141_v41 }
 0x214   :  { %1373 = vmatpush1.bf16.msra.mxu0 %v11144_v63  ;;  %1416 = vmatpush1.bf16.msra.mxu1 %v11147_v28 }
 0x215   :  { %1374 = vmatprep.subr.bf16.mxu0 %v11150_v12  ;;  %1417 = vmatprep.subr.bf16.mxu1 %v11153_v46 }
 0x218   :  { %1375 = vmatpush1.bf16.msra.mxu0 %v11156_v37  ;;  %1418 = vmatpush1.bf16.msra.mxu1 %v11159_v24 }
 0x219   :  { %1503 = vmatprep.subr.bf16.mxu0 %v11162_v32  ;;  %1546 = vmatprep.subr.bf16.mxu1 %v11165_v8 }
 0x2bb   :  { %v1251_v16 = vpop.f32.mrf.mxu0  ;;  %v1294_v21 = vpop.f32.mrf.mxu1 }
 0x2bc   :  { %v1303_v29 = vadd.f32 %v1251_v16, %v10881_v2 }
 0x2bd   :  { %v1253_v13 = vpop.f32.mrf.mxu0  ;;  %v1296_v39 = vpop.f32.mrf.mxu1 }
 0x2be   :  { %v7913_v5 = vmul.f32 -1.442695, %v1303_v29  ;;  %v1304_v43 = vadd.f32 %v1253_v13, %v10887_v6  ;;  %v1306_v2 = vadd.f32 %v1296_v39, %v10890_v7  ;;  %v1305_v6 = vadd.f32 %v1294_v21, %v10884_v3 }
 0x2bf   :  { %v1255_v62 = vpop.f32.mrf.mxu0  ;;  %v1298_v27 = vpop.f32.mrf.mxu1 }
 0x2c0   :  { %9961 = vpow2.f32 %v7913_v5  ;;  %v7915_v35 = vmul.f32 -1.442695, %v1304_v43  ;;  %v1307_v49 = vadd.f32 %v1255_v62, %v10893_v10  ;;  %v7917_v13 = vmul.f32 -1.442695, %v1306_v2 }
 0x2c1   :  { %v1257_v42 = vpop.f32.mrf.mxu0  ;;  %v1300_v16 = vpop.f32.mrf.mxu1  ;;  %v1309_v10 = vadd.f32 %v1298_v27, %v10896_v11 }
 0x2c2   :  { %9963 = vpow2.f32 %v7915_v35  ;;  %v7914_v38 = vmul.f32 -1.442695, %v1307_v49  ;;  %v1308_v34 = vadd.f32 %v1257_v42, %v10899_v14  ;;  %v1310_v43 = vadd.f32 %v1300_v16, %v10902_v15 }
 0x2c4   :  { %9965 = vpow2.f32 %v7914_v38  ;;  %v7916_v31 = vmul.f32 -1.442695, %v1308_v34  ;;  %v7918_v14 = vmul.f32 -1.442695, %v1310_v43 }
 0x2c6   :  { %9967 = vpow2.f32 %v7916_v31 }
 0x2c7   :  { %9969 = vtanh.f32 %v1305_v6 }
 0x2c8   :  { %9971 = vpow2.f32 %v7917_v13 }
 0x2cd   :  { %v9962_v5 = vpop.eup %9961 }
 0x2ce   :  { %v1317_v62 = vadd.f32 1.0, %v9962_v5 }
 0x2cf   :  { %v9964_v35 = vpop.eup %9963 }
 0x2d0   :  { %9973 = vrcp.f32 %v1317_v62  ;;  %v1329_v38 = vadd.f32 1.0, %v9964_v35 }
 0x2d1   :  { %v9966_v34 = vpop.eup %9965  ;;  %9975 = vtanh.f32 %v1309_v10 }
 0x2d2   :  { %9977 = vrcp.f32 %v1329_v38  ;;  %v1318_v7 = vadd.f32 1.0, %v9966_v34 }
 0x2d3   :  { %v9968_v31 = vpop.eup %9967  ;;  %9979 = vpow2.f32 %v7918_v14 }
 0x2d4   :  { %9981 = vrcp.f32 %v1318_v7  ;;  %v1330_v3 = vadd.f32 1.0, %v9968_v31  ;;  %v9970_v15 = vpop.eup %9969 }
 0x2d5   :  { %v9972_v39 = vpop.eup %9971 }
 0x2d6   :  { %9983 = vrcp.f32 %v1330_v3  ;;  %v1343_v16 = vadd.f32 1.0, %v9972_v39 }
 0x2d8   :  { %9985 = vrcp.f32 %v1343_v16 }
 0x2dd   :  { %v9974_v42 = vpop.eup %9973 }
 0x2de   :  { %v9976_v11 = vpop.eup %9975  ;;  %v1351_v27 = vmul.f32 %v9974_v42, %v9970_v15 }
 0x2df   :  { %v9978_v49 = vpop.eup %9977 }
 0x2e0   :  { %v9980_v21 = vpop.eup %9979  ;;  %v1349_v29 = vmul.f32 %v9978_v49, %v11064_v60 }
 0x2e1   :  { %v9982_v2 = vpop.eup %9981  ;;  %v1344_v5 = vadd.f32 1.0, %v9980_v21 }
 0x2e2   :  { %v11177_v6 = vadd.f32 %v1351_v27, %v1349_v29  ;;  %v1352_v13 = vmul.f32 %v9982_v2, %v9976_v11 }
 0x2e3   :  { %v9984_v43 = vpop.eup %9983 }
 0x2e4   :  { %v1350_v10 = vmul.f32 %v9984_v43, %v11067_v57  ;;  %9987 = vtanh.f32 %v11177_v6 }
 0x2e5   :  { %9989 = vrcp.f32 %v1344_v5  ;;  %v9986_v35 = vpop.eup %9985 }
 0x2e6   :  { %v11180_v62 = vadd.f32 %v1352_v13, %v1350_v10 }
 0x2e8   :  { %9991 = vtanh.f32 %v11180_v62 }
 0x2f1   :  { %v9988_v14 = vpop.eup %9987 }
 0x2f2   :  { %v9990_v60 = vpop.eup %9989  ;;  %v1357_v34 = vmul.f32 %v9988_v14, %v9986_v35  ;;  %v11573_v14 = vld [vmem:[#allocation33_spill] sm:$0xff] }
 0x2f5   :  { %v9992_v38 = vpop.eup %9991 }
 0x2f6   :  { %v1358_v7 = vmul.f32 %v9992_v38, %v9990_v60 }
 0x2f8   :  { %v1359_v31 = vpack.c.bf16 %v1358_v7, %v1357_v34  ;;  %v11574_v34 = vld [vmem:[#allocation32_spill] sm:$0xff] }
 0x2fa   :  { %1393 = vmatmul.mubr.bf16.vlgmr.msra.gmra.mxu0 %v1359_v31  ;;  %1436 = vmatmul.mubr.bf16.vlgmr.msra.gmra.mxu1 %v1359_v31 }
 0x2fb   :  { %1504 = vmatpush1.bf16.msra.mxu0 %v11070_v48  ;;  %1547 = vmatpush1.bf16.msra.mxu1 %v11073_v47 }
 0x2fc   :  { %1505 = vmatprep.subr.bf16.mxu0 %v11076_v59  ;;  %1548 = vmatprep.subr.bf16.mxu1 %v11079_v1 }
 0x2fd   :  { %1535 = vmatprep.mubr.bf16.mxu0 %v11572_v55  ;;  %1578 = vmatprep.mubr.bf16.mxu1 %v11572_v55 }
 0x2ff   :  { %1506 = vmatpush1.bf16.msra.mxu0 %v11084_v61  ;;  %1549 = vmatpush1.bf16.msra.mxu1 %v11087_v45 }
 0x300   :  { %1507 = vmatprep.subr.bf16.mxu0 %v11090_v4  ;;  %1550 = vmatprep.subr.bf16.mxu1 %v11093_v53 }
 0x303   :  { %1508 = vmatpush1.bf16.msra.mxu0 %v11096_v50  ;;  %1551 = vmatpush1.bf16.msra.mxu1 %v11099_v9 }
 0x304   :  { %1509 = vmatprep.subr.bf16.mxu0 %v11102_v25  ;;  %1552 = vmatprep.subr.bf16.mxu1 %v11105_v54 }
 0x307   :  { %1510 = vmatpush1.bf16.msra.mxu0 %v11108_v52  ;;  %1553 = vmatpush1.bf16.msra.mxu1 %v11111_v58 }
 0x308   :  { %1511 = vmatprep.subr.bf16.mxu0 %v11114_v44  ;;  %1554 = vmatprep.subr.bf16.mxu1 %v11117_v0 }
 0x30b   :  { %1512 = vmatpush1.bf16.msra.mxu0 %v11120_v17  ;;  %1555 = vmatpush1.bf16.msra.mxu1 %v11123_v40 }
 0x30c   :  { %1513 = vmatprep.subr.bf16.mxu0 %v11126_v33  ;;  %1556 = vmatprep.subr.bf16.mxu1 %v11129_v56 }
 0x30f   :  { %1514 = vmatpush1.bf16.msra.mxu0 %v11132_v20  ;;  %1557 = vmatpush1.bf16.msra.mxu1 %v11135_v51 }
 0x310   :  { %1515 = vmatprep.subr.bf16.mxu0 %v11138_v36  ;;  %1558 = vmatprep.subr.bf16.mxu1 %v11141_v41 }
 0x313   :  { %1516 = vmatpush1.bf16.msra.mxu0 %v11144_v63  ;;  %1559 = vmatpush1.bf16.msra.mxu1 %v11147_v28 }
 0x314   :  { %1517 = vmatprep.subr.bf16.mxu0 %v11150_v12  ;;  %1560 = vmatprep.subr.bf16.mxu1 %v11153_v46 }
 0x317   :  { %1518 = vmatpush1.bf16.msra.mxu0 %v11156_v37  ;;  %1561 = vmatpush1.bf16.msra.mxu1 %v11159_v24 }
 0x318   :  { %1646 = vmatprep.subr.bf16.mxu0 %v11162_v32  ;;  %1689 = vmatprep.subr.bf16.mxu1 %v11165_v8 }
 0x3ba   :  { %v1394_v57 = vpop.f32.mrf.mxu0  ;;  %v1437_v15 = vpop.f32.mrf.mxu1 }
 0x3bb   :  { %v1446_v3 = vadd.f32 %v1394_v57, %v10905_v18 }
 0x3bc   :  { %v1396_v39 = vpop.f32.mrf.mxu0  ;;  %v1439_v21 = vpop.f32.mrf.mxu1 }
 0x3bd   :  { %v7919_v42 = vmul.f32 -1.442695, %v1446_v3  ;;  %v1447_v11 = vadd.f32 %v1396_v39, %v10911_v22  ;;  %v1449_v18 = vadd.f32 %v1439_v21, %v10914_v23  ;;  %v1448_v22 = vadd.f32 %v1437_v15, %v10908_v19 }
 0x3be   :  { %v1398_v27 = vpop.f32.mrf.mxu0  ;;  %v1441_v43 = vpop.f32.mrf.mxu1 }
 0x3bf   :  { %9993 = vpow2.f32 %v7919_v42  ;;  %v7921_v49 = vmul.f32 -1.442695, %v1447_v11  ;;  %v1450_v29 = vadd.f32 %v1398_v27, %v10917_v26  ;;  %v7923_v35 = vmul.f32 -1.442695, %v1449_v18 }
 0x3c0   :  { %v1400_v2 = vpop.f32.mrf.mxu0  ;;  %v1443_v10 = vpop.f32.mrf.mxu1  ;;  %v1452_v26 = vadd.f32 %v1441_v43, %v11574_v34 }
 0x3c1   :  { %9995 = vpow2.f32 %v7921_v49  ;;  %v7920_v16 = vmul.f32 -1.442695, %v1450_v29  ;;  %v1451_v13 = vadd.f32 %v1400_v2, %v10923_v30  ;;  %v1453_v60 = vadd.f32 %v1443_v10, %v11573_v14 }
 0x3c3   :  { %9997 = vpow2.f32 %v7920_v16  ;;  %v7922_v5 = vmul.f32 -1.442695, %v1451_v13  ;;  %v7924_v30 = vmul.f32 -1.442695, %v1453_v60 }
 0x3c5   :  { %9999 = vpow2.f32 %v7922_v5 }
 0x3c6   :  { %10001 = vtanh.f32 %v1448_v22 }
 0x3c7   :  { %10003 = vpow2.f32 %v7923_v35 }
 0x3cc   :  { %v9994_v38 = vpop.eup %9993 }
 0x3cd   :  { %v1460_v7 = vadd.f32 1.0, %v9994_v38 }
 0x3ce   :  { %v9996_v31 = vpop.eup %9995 }
 0x3cf   :  { %10005 = vrcp.f32 %v1460_v7  ;;  %v1472_v57 = vadd.f32 1.0, %v9996_v31  ;;  %v11575_v31 = vld [vmem:[#allocation34_spill] sm:$0xff] }
 0x3d0   :  { %v9998_v3 = vpop.eup %9997  ;;  %10007 = vtanh.f32 %v1452_v26 }
 0x3d1   :  { %10009 = vrcp.f32 %v1472_v57  ;;  %v1461_v23 = vadd.f32 1.0, %v9998_v3 }
 0x3d2   :  { %v10000_v39 = vpop.eup %9999  ;;  %10011 = vpow2.f32 %v7924_v30 }
 0x3d3   :  { %10013 = vrcp.f32 %v1461_v23  ;;  %v1473_v19 = vadd.f32 1.0, %v10000_v39  ;;  %v10002_v15 = vpop.eup %10001  ;;  %v11576_v39 = vld [vmem:[#allocation36_spill] sm:$0xff] }
 0x3d4   :  { %v10004_v42 = vpop.eup %10003 }
 0x3d5   :  { %10015 = vrcp.f32 %v1473_v19  ;;  %v1486_v13 = vadd.f32 1.0, %v10004_v42 }
 0x3d7   :  { %10017 = vrcp.f32 %v1486_v13 }
 0x3dc   :  { %v10006_v11 = vpop.eup %10005 }
 0x3dd   :  { %v10008_v27 = vpop.eup %10007  ;;  %v1494_v49 = vmul.f32 %v10006_v11, %v10002_v15 }
 0x3de   :  { %v10010_v21 = vpop.eup %10009 }
 0x3df   :  { %v10012_v29 = vpop.eup %10011  ;;  %v1492_v2 = vmul.f32 %v10010_v21, %v11177_v6 }
 0x3e0   :  { %v10014_v16 = vpop.eup %10013  ;;  %v1487_v10 = vadd.f32 1.0, %v10012_v29 }
 0x3e1   :  { %v11227_v43 = vadd.f32 %v1494_v49, %v1492_v2  ;;  %v1495_v5 = vmul.f32 %v10014_v16, %v10008_v27  ;;  %v11577_v27 = vld [vmem:[#allocation38_spill] sm:$0xff]  ;;  %v11578_v2 = vld [vmem:[#allocation40_spill] sm:$0xff] }
 0x3e2   :  { %v10016_v18 = vpop.eup %10015 }
 0x3e3   :  { %v1493_v22 = vmul.f32 %v10016_v18, %v11180_v62  ;;  %10019 = vtanh.f32 %v11227_v43  ;;  %v11579_v18 = vld [vmem:[#allocation37_spill] sm:$0xff] }
 0x3e4   :  { %10021 = vrcp.f32 %v1487_v10  ;;  %v10018_v14 = vpop.eup %10017 }
 0x3e5   :  { %v11230_v35 = vadd.f32 %v1495_v5, %v1493_v22 }
 0x3e7   :  { %10023 = vtanh.f32 %v11230_v35 }
 0x3f0   :  { %v10020_v60 = vpop.eup %10019 }
 0x3f1   :  { %v10022_v6 = vpop.eup %10021  ;;  %v1500_v34 = vmul.f32 %v10020_v60, %v10018_v14  ;;  %v11580_v14 = vld [vmem:[#allocation35_spill] sm:$0xff] }
 0x3f4   :  { %v10024_v38 = vpop.eup %10023 }
 0x3f5   :  { %v1501_v26 = vmul.f32 %v10024_v38, %v10022_v6  ;;  %v11581_v38 = vld [vmem:[#allocation41_spill] sm:$0xff] }
 0x3f7   :  { %v1502_v7 = vpack.c.bf16 %v1501_v26, %v1500_v34 }
 0x3f9   :  { %1536 = vmatmul.mubr.bf16.vlgmr.msra.gmra.mxu0 %v1502_v7  ;;  %1579 = vmatmul.mubr.bf16.vlgmr.msra.gmra.mxu1 %v1502_v7  ;;  %v11582_v7 = vld [vmem:[#allocation39_spill] sm:$0xff] }
 0x3fa   :  { %1647 = vmatpush1.bf16.msra.mxu0 %v11070_v48  ;;  %1690 = vmatpush1.bf16.msra.mxu1 %v11073_v47 }
 0x3fb   :  { %1648 = vmatprep.subr.bf16.mxu0 %v11076_v59  ;;  %1691 = vmatprep.subr.bf16.mxu1 %v11079_v1 }
 0x3fc   :  { %1678 = vmatprep.mubr.bf16.mxu0 %v11572_v55  ;;  %1721 = vmatprep.mubr.bf16.mxu1 %v11572_v55 }
 0x3fe   :  { %1649 = vmatpush1.bf16.msra.mxu0 %v11084_v61  ;;  %1692 = vmatpush1.bf16.msra.mxu1 %v11087_v45 }
 0x3ff   :  { %1650 = vmatprep.subr.bf16.mxu0 %v11090_v4  ;;  %1693 = vmatprep.subr.bf16.mxu1 %v11093_v53 }
 0x402   :  { %1651 = vmatpush1.bf16.msra.mxu0 %v11096_v50  ;;  %1694 = vmatpush1.bf16.msra.mxu1 %v11099_v9 }
 0x403   :  { %1652 = vmatprep.subr.bf16.mxu0 %v11102_v25  ;;  %1695 = vmatprep.subr.bf16.mxu1 %v11105_v54 }
 0x406   :  { %1653 = vmatpush1.bf16.msra.mxu0 %v11108_v52  ;;  %1696 = vmatpush1.bf16.msra.mxu1 %v11111_v58 }
 0x407   :  { %1654 = vmatprep.subr.bf16.mxu0 %v11114_v44  ;;  %1697 = vmatprep.subr.bf16.mxu1 %v11117_v0 }
 0x40a   :  { %1655 = vmatpush1.bf16.msra.mxu0 %v11120_v17  ;;  %1698 = vmatpush1.bf16.msra.mxu1 %v11123_v40 }
 0x40b   :  { %1656 = vmatprep.subr.bf16.mxu0 %v11126_v33  ;;  %1699 = vmatprep.subr.bf16.mxu1 %v11129_v56 }
 0x40e   :  { %1657 = vmatpush1.bf16.msra.mxu0 %v11132_v20  ;;  %1700 = vmatpush1.bf16.msra.mxu1 %v11135_v51 }
 0x40f   :  { %1658 = vmatprep.subr.bf16.mxu0 %v11138_v36  ;;  %1701 = vmatprep.subr.bf16.mxu1 %v11141_v41 }
 0x412   :  { %1659 = vmatpush1.bf16.msra.mxu0 %v11144_v63  ;;  %1702 = vmatpush1.bf16.msra.mxu1 %v11147_v28 }
 0x413   :  { %1660 = vmatprep.subr.bf16.mxu0 %v11150_v12  ;;  %1703 = vmatprep.subr.bf16.mxu1 %v11153_v46 }
 0x416   :  { %1661 = vmatpush1.bf16.msra.mxu0 %v11156_v37  ;;  %1704 = vmatpush1.bf16.msra.mxu1 %v11159_v24 }
 0x417   :  { %1789 = vmatprep.subr.bf16.mxu0 %v11162_v32  ;;  %1832 = vmatprep.subr.bf16.mxu1 %v11165_v8 }
 0x4b9   :  { %v1537_v62 = vpop.f32.mrf.mxu0  ;;  %v1580_v57 = vpop.f32.mrf.mxu1 }
 0x4ba   :  { %v1589_v30 = vadd.f32 %v1537_v62, %v11575_v31  ;;  %v1591_v60 = vadd.f32 %v1580_v57, %v11580_v14 }
 0x4bb   :  { %v1539_v3 = vpop.f32.mrf.mxu0  ;;  %v1582_v11 = vpop.f32.mrf.mxu1 }
 0x4bc   :  { %v7925_v23 = vmul.f32 -1.442695, %v1589_v30  ;;  %v1590_v19 = vadd.f32 %v1539_v3, %v11576_v39  ;;  %v1592_v10 = vadd.f32 %v1582_v11, %v11579_v18 }
 0x4bd   :  { %v1541_v15 = vpop.f32.mrf.mxu0  ;;  %v1584_v13 = vpop.f32.mrf.mxu1 }
 0x4be   :  { %10025 = vpow2.f32 %v7925_v23  ;;  %v7927_v42 = vmul.f32 -1.442695, %v1590_v19  ;;  %v1593_v49 = vadd.f32 %v1541_v15, %v11577_v27  ;;  %v7929_v6 = vmul.f32 -1.442695, %v1592_v10 }
 0x4bf   :  { %v1543_v21 = vpop.f32.mrf.mxu0  ;;  %v1586_v22 = vpop.f32.mrf.mxu1  ;;  %v1595_v62 = vadd.f32 %v1584_v13, %v11582_v7 }
 0x4c0   :  { %10027 = vpow2.f32 %v7927_v42  ;;  %v7926_v29 = vmul.f32 -1.442695, %v1593_v49  ;;  %v1594_v16 = vadd.f32 %v1543_v21, %v11578_v2  ;;  %v1596_v34 = vadd.f32 %v1586_v22, %v11581_v38 }
 0x4c2   :  { %10029 = vpow2.f32 %v7926_v29  ;;  %v7928_v5 = vmul.f32 -1.442695, %v1594_v16  ;;  %v7930_v3 = vmul.f32 -1.442695, %v1596_v34 }
 0x4c4   :  { %10031 = vpow2.f32 %v7928_v5 }
 0x4c5   :  { %10033 = vtanh.f32 %v1591_v60 }
 0x4c6   :  { %10035 = vpow2.f32 %v7929_v6 }
 0x4cb   :  { %v10026_v26 = vpop.eup %10025 }
 0x4cc   :  { %v1603_v31 = vadd.f32 1.0, %v10026_v26 }
 0x4cd   :  { %v10028_v30 = vpop.eup %10027 }
 0x4ce   :  { %10037 = vrcp.f32 %v1603_v31  ;;  %v1615_v23 = vadd.f32 1.0, %v10028_v30  ;;  %v11583_v30 = vld [vmem:[#allocation42_spill] sm:$0xff] }
 0x4cf   :  { %v10030_v39 = vpop.eup %10029  ;;  %10039 = vtanh.f32 %v1595_v62 }
 0x4d0   :  { %10041 = vrcp.f32 %v1615_v23  ;;  %v1604_v19 = vadd.f32 1.0, %v10030_v39 }
 0x4d1   :  { %v10032_v15 = vpop.eup %10031  ;;  %10043 = vpow2.f32 %v7930_v3 }
 0x4d2   :  { %10045 = vrcp.f32 %v1604_v19  ;;  %v1616_v57 = vadd.f32 1.0, %v10032_v15  ;;  %v10034_v42 = vpop.eup %10033  ;;  %v11584_v15 = vld [vmem:[#allocation44_spill] sm:$0xff] }
 0x4d3   :  { %v10036_v11 = vpop.eup %10035 }
 0x4d4   :  { %10047 = vrcp.f32 %v1616_v57  ;;  %v1629_v5 = vadd.f32 1.0, %v10036_v11 }
 0x4d6   :  { %10049 = vrcp.f32 %v1629_v5 }
 0x4db   :  { %v10038_v27 = vpop.eup %10037 }
 0x4dc   :  { %v10040_v49 = vpop.eup %10039  ;;  %v1637_v21 = vmul.f32 %v10038_v27, %v10034_v42 }
 0x4dd   :  { %v10042_v29 = vpop.eup %10041 }
 0x4de   :  { %v10044_v2 = vpop.eup %10043  ;;  %v1635_v16 = vmul.f32 %v10042_v29, %v11227_v43 }
 0x4df   :  { %v10046_v13 = vpop.eup %10045  ;;  %v1630_v14 = vadd.f32 1.0, %v10044_v2 }
 0x4e0   :  { %v11277_v18 = vadd.f32 %v1637_v21, %v1635_v16  ;;  %v1638_v10 = vmul.f32 %v10046_v13, %v10040_v49  ;;  %v11585_v49 = vld [vmem:[#allocation46_spill] sm:$0xff]  ;;  %v11586_v16 = vld [vmem:[#allocation48_spill] sm:$0xff] }
 0x4e1   :  { %v10048_v22 = vpop.eup %10047 }
 0x4e2   :  { %v1636_v60 = vmul.f32 %v10048_v22, %v11230_v35  ;;  %10051 = vtanh.f32 %v11277_v18  ;;  %v11587_v22 = vld [vmem:[#allocation45_spill] sm:$0xff] }
 0x4e3   :  { %10053 = vrcp.f32 %v1630_v14  ;;  %v10050_v38 = vpop.eup %10049 }
 0x4e4   :  { %v11280_v6 = vadd.f32 %v1638_v10, %v1636_v60 }
 0x4e6   :  { %10055 = vtanh.f32 %v11280_v6 }
 0x4ef   :  { %v10052_v34 = vpop.eup %10051 }
 0x4f0   :  { %v10054_v43 = vpop.eup %10053  ;;  %v1643_v7 = vmul.f32 %v10052_v34, %v10050_v38  ;;  %v11588_v38 = vld [vmem:[#allocation43_spill] sm:$0xff] }
 0x4f3   :  { %v10056_v26 = vpop.eup %10055 }
 0x4f4   :  { %v1644_v62 = vmul.f32 %v10056_v26, %v10054_v43  ;;  %v11589_v26 = vld [vmem:[#allocation49_spill] sm:$0xff] }
 0x4f6   :  { %v1645_v31 = vpack.c.bf16 %v1644_v62, %v1643_v7 }
 0x4f8   :  { %1679 = vmatmul.mubr.bf16.vlgmr.msra.gmra.mxu0 %v1645_v31  ;;  %1722 = vmatmul.mubr.bf16.vlgmr.msra.gmra.mxu1 %v1645_v31  ;;  %v11590_v31 = vld [vmem:[#allocation47_spill] sm:$0xff] }
 0x4f9   :  { %1790 = vmatpush1.bf16.msra.mxu0 %v11070_v48  ;;  %1833 = vmatpush1.bf16.msra.mxu1 %v11073_v47 }
 0x4fa   :  { %1791 = vmatprep.subr.bf16.mxu0 %v11076_v59  ;;  %1834 = vmatprep.subr.bf16.mxu1 %v11079_v1 }
 0x4fb   :  { %1821 = vmatprep.mubr.bf16.mxu0 %v11572_v55  ;;  %1864 = vmatprep.mubr.bf16.mxu1 %v11572_v55 }
 0x4fd   :  { %1792 = vmatpush1.bf16.msra.mxu0 %v11084_v61  ;;  %1835 = vmatpush1.bf16.msra.mxu1 %v11087_v45 }
 0x4fe   :  { %1793 = vmatprep.subr.bf16.mxu0 %v11090_v4  ;;  %1836 = vmatprep.subr.bf16.mxu1 %v11093_v53 }
 0x501   :  { %1794 = vmatpush1.bf16.msra.mxu0 %v11096_v50  ;;  %1837 = vmatpush1.bf16.msra.mxu1 %v11099_v9 }
 0x502   :  { %1795 = vmatprep.subr.bf16.mxu0 %v11102_v25  ;;  %1838 = vmatprep.subr.bf16.mxu1 %v11105_v54 }
 0x505   :  { %1796 = vmatpush1.bf16.msra.mxu0 %v11108_v52  ;;  %1839 = vmatpush1.bf16.msra.mxu1 %v11111_v58 }
 0x506   :  { %1797 = vmatprep.subr.bf16.mxu0 %v11114_v44  ;;  %1840 = vmatprep.subr.bf16.mxu1 %v11117_v0 }
 0x509   :  { %1798 = vmatpush1.bf16.msra.mxu0 %v11120_v17  ;;  %1841 = vmatpush1.bf16.msra.mxu1 %v11123_v40 }
 0x50a   :  { %1799 = vmatprep.subr.bf16.mxu0 %v11126_v33  ;;  %1842 = vmatprep.subr.bf16.mxu1 %v11129_v56 }
 0x50d   :  { %1800 = vmatpush1.bf16.msra.mxu0 %v11132_v20  ;;  %1843 = vmatpush1.bf16.msra.mxu1 %v11135_v51 }
 0x50e   :  { %1801 = vmatprep.subr.bf16.mxu0 %v11138_v36  ;;  %1844 = vmatprep.subr.bf16.mxu1 %v11141_v41 }
 0x511   :  { %1802 = vmatpush1.bf16.msra.mxu0 %v11144_v63  ;;  %1845 = vmatpush1.bf16.msra.mxu1 %v11147_v28 }
 0x512   :  { %1803 = vmatprep.subr.bf16.mxu0 %v11150_v12  ;;  %1846 = vmatprep.subr.bf16.mxu1 %v11153_v46 }
 0x515   :  { %1804 = vmatpush1.bf16.msra.mxu0 %v11156_v37  ;;  %1847 = vmatpush1.bf16.msra.mxu1 %v11159_v24 }
 0x516   :  { %1932 = vmatprep.subr.bf16.mxu0 %v11162_v32  ;;  %1975 = vmatprep.subr.bf16.mxu1 %v11165_v8 }
 0x5b8   :  { %v1680_v35 = vpop.f32.mrf.mxu0  ;;  %v1723_v23 = vpop.f32.mrf.mxu1 }
 0x5b9   :  { %v1732_v3 = vadd.f32 %v1680_v35, %v11583_v30  ;;  %v1734_v34 = vadd.f32 %v1723_v23, %v11588_v38 }
 0x5ba   :  { %v1682_v39 = vpop.f32.mrf.mxu0  ;;  %v1725_v27 = vpop.f32.mrf.mxu1 }
 0x5bb   :  { %v7931_v19 = vmul.f32 -1.442695, %v1732_v3  ;;  %v1733_v57 = vadd.f32 %v1682_v39, %v11584_v15  ;;  %v1735_v14 = vadd.f32 %v1725_v27, %v11587_v22 }
 0x5bc   :  { %v1684_v42 = vpop.f32.mrf.mxu0  ;;  %v1727_v5 = vpop.f32.mrf.mxu1 }
 0x5bd   :  { %10057 = vpow2.f32 %v7931_v19  ;;  %v7933_v11 = vmul.f32 -1.442695, %v1733_v57  ;;  %v1736_v21 = vadd.f32 %v1684_v42, %v11585_v49  ;;  %v7935_v43 = vmul.f32 -1.442695, %v1735_v14 }
 0x5be   :  { %v1686_v29 = vpop.f32.mrf.mxu0  ;;  %v1729_v60 = vpop.f32.mrf.mxu1  ;;  %v1738_v35 = vadd.f32 %v1727_v5, %v11590_v31 }
 0x5bf   :  { %10059 = vpow2.f32 %v7933_v11  ;;  %v7932_v2 = vmul.f32 -1.442695, %v1736_v21  ;;  %v1737_v13 = vadd.f32 %v1686_v29, %v11586_v16  ;;  %v1739_v7 = vadd.f32 %v1729_v60, %v11589_v26 }
 0x5c1   :  { %10061 = vpow2.f32 %v7932_v2  ;;  %v7934_v10 = vmul.f32 -1.442695, %v1737_v13  ;;  %v7936_v39 = vmul.f32 -1.442695, %v1739_v7 }
 0x5c3   :  { %10063 = vpow2.f32 %v7934_v10 }
 0x5c4   :  { %10065 = vtanh.f32 %v1734_v34 }
 0x5c5   :  { %10067 = vpow2.f32 %v7935_v43 }
 0x5ca   :  { %v10058_v62 = vpop.eup %10057 }
 0x5cb   :  { %v1746_v30 = vadd.f32 1.0, %v10058_v62 }
 0x5cc   :  { %v10060_v3 = vpop.eup %10059 }
 0x5cd   :  { %10069 = vrcp.f32 %v1746_v30  ;;  %v1758_v19 = vadd.f32 1.0, %v10060_v3 }
 0x5ce   :  { %v10062_v15 = vpop.eup %10061  ;;  %10071 = vtanh.f32 %v1738_v35 }
 0x5cf   :  { %10073 = vrcp.f32 %v1758_v19  ;;  %v1747_v57 = vadd.f32 1.0, %v10062_v15 }
 0x5d0   :  { %v10064_v42 = vpop.eup %10063  ;;  %10075 = vpow2.f32 %v7936_v39 }
 0x5d1   :  { %10077 = vrcp.f32 %v1747_v57  ;;  %v1759_v23 = vadd.f32 1.0, %v10064_v42  ;;  %v10066_v11 = vpop.eup %10065 }
 0x5d2   :  { %v10068_v27 = vpop.eup %10067 }
 0x5d3   :  { %10079 = vrcp.f32 %v1759_v23  ;;  %v1772_v10 = vadd.f32 1.0, %v10068_v27 }
 0x5d5   :  { %10081 = vrcp.f32 %v1772_v10 }
 0x5da   :  { %v10070_v49 = vpop.eup %10069 }
 0x5db   :  { %v10072_v21 = vpop.eup %10071  ;;  %v1780_v29 = vmul.f32 %v10070_v49, %v10066_v11 }
 0x5dc   :  { %v10074_v2 = vpop.eup %10073 }
 0x5dd   :  { %v10076_v16 = vpop.eup %10075  ;;  %v1778_v13 = vmul.f32 %v10074_v2, %v11277_v18 }
 0x5de   :  { %v10078_v5 = vpop.eup %10077  ;;  %v1773_v38 = vadd.f32 1.0, %v10076_v16 }
 0x5df   :  { %v11327_v22 = vadd.f32 %v1780_v29, %v1778_v13  ;;  %v1781_v14 = vmul.f32 %v10078_v5, %v10072_v21 }
 0x5e0   :  { %v10080_v60 = vpop.eup %10079 }
 0x5e1   :  { %v1779_v34 = vmul.f32 %v10080_v60, %v11280_v6  ;;  %10083 = vtanh.f32 %v11327_v22 }
 0x5e2   :  { %10085 = vrcp.f32 %v1773_v38  ;;  %v10082_v26 = vpop.eup %10081 }
 0x5e3   :  { %v11330_v43 = vadd.f32 %v1781_v14, %v1779_v34 }
 0x5e5   :  { %10087 = vtanh.f32 %v11330_v43 }
 0x5ee   :  { %v10084_v7 = vpop.eup %10083 }
 0x5ef   :  { %v10086_v18 = vpop.eup %10085  ;;  %v1786_v31 = vmul.f32 %v10084_v7, %v10082_v26 }
 0x5f2   :  { %v10088_v62 = vpop.eup %10087 }
 0x5f3   :  { %v1787_v35 = vmul.f32 %v10088_v62, %v10086_v18 }
 0x5f5   :  { %v1788_v30 = vpack.c.bf16 %v1787_v35, %v1786_v31 }
 0x5f7   :  { %1822 = vmatmul.mubr.bf16.vlgmr.msra.gmra.mxu0 %v1788_v30  ;;  %1865 = vmatmul.mubr.bf16.vlgmr.msra.gmra.mxu1 %v1788_v30  ;;  %v10225_v30 = vld [vmem:[#allocation7 + $0xe0] ss:$16 sps:$4 sm:$0xff]  }
 0x5f8   :  { %1933 = vmatpush1.bf16.msra.mxu0 %v11070_v48  ;;  %1976 = vmatpush1.bf16.msra.mxu1 %v11073_v47  ;;  %v11591_v47 = vld [vmem:[#allocation50_spill] sm:$0xff] }
 0x5f9   :  { %1934 = vmatprep.subr.bf16.mxu0 %v11076_v59  ;;  %1977 = vmatprep.subr.bf16.mxu1 %v11079_v1 }
 0x5fa   :  { %1964 = vmatprep.mubr.bf16.mxu0 %v11572_v55  ;;  %2007 = vmatprep.mubr.bf16.mxu1 %v11572_v55 }
 0x5fc   :  { %1935 = vmatpush1.bf16.msra.mxu0 %v11084_v61  ;;  %1978 = vmatpush1.bf16.msra.mxu1 %v11087_v45  ;;  %v11592_v45 = vld [vmem:[#allocation52_spill] sm:$0xff] }
 0x5fd   :  { %1936 = vmatprep.subr.bf16.mxu0 %v11090_v4  ;;  %1979 = vmatprep.subr.bf16.mxu1 %v11093_v53  ;;  %v11593_v53 = vld [vmem:[#allocation54_spill] sm:$0xff] }
 0x600   :  { %1937 = vmatpush1.bf16.msra.mxu0 %v11096_v50  ;;  %1980 = vmatpush1.bf16.msra.mxu1 %v11099_v9 }
 0x601   :  { %1938 = vmatprep.subr.bf16.mxu0 %v11102_v25  ;;  %1981 = vmatprep.subr.bf16.mxu1 %v11105_v54  ;;  %v11595_v54 = vld [vmem:[#allocation53_spill] sm:$0xff] }
 0x604   :  { %1939 = vmatpush1.bf16.msra.mxu0 %v11108_v52  ;;  %1982 = vmatpush1.bf16.msra.mxu1 %v11111_v58 }
 0x605   :  { %1940 = vmatprep.subr.bf16.mxu0 %v11114_v44  ;;  %1983 = vmatprep.subr.bf16.mxu1 %v11117_v0  ;;  %v11596_v44 = vld [vmem:[#allocation51_spill] sm:$0xff] }
 0x608   :  { %1941 = vmatpush1.bf16.msra.mxu0 %v11120_v17  ;;  %1984 = vmatpush1.bf16.msra.mxu1 %v11123_v40  ;;  %v11597_v40 = vld [vmem:[#allocation57_spill] sm:$0xff] }
 0x609   :  { %1942 = vmatprep.subr.bf16.mxu0 %v11126_v33  ;;  %1985 = vmatprep.subr.bf16.mxu1 %v11129_v56 }
 0x60c   :  { %1943 = vmatpush1.bf16.msra.mxu0 %v11132_v20  ;;  %1986 = vmatpush1.bf16.msra.mxu1 %v11135_v51  ;;  %v11598_v20 = vld [vmem:[#allocation55_spill] sm:$0xff] }
 0x60d   :  { %1944 = vmatprep.subr.bf16.mxu0 %v11138_v36  ;;  %1987 = vmatprep.subr.bf16.mxu1 %v11141_v41 }
 0x610   :  { %1945 = vmatpush1.bf16.msra.mxu0 %v11144_v63  ;;  %1988 = vmatpush1.bf16.msra.mxu1 %v11147_v28 }
 0x611   :  { %1946 = vmatprep.subr.bf16.mxu0 %v11150_v12  ;;  %1989 = vmatprep.subr.bf16.mxu1 %v11153_v46 }
 0x614   :  { %1947 = vmatpush1.bf16.msra.mxu0 %v11156_v37  ;;  %1990 = vmatpush1.bf16.msra.mxu1 %v11159_v24 }
 0x615   :  { %2075 = vmatprep.subr.bf16.mxu0 %v11162_v32  ;;  %2118 = vmatprep.subr.bf16.mxu1 %v11165_v8  ;;  %v11594_v32 = vld [vmem:[#allocation56_spill] sm:$0xff] }
 0x6b7   :  { %v1823_v48 = vpop.f32.mrf.mxu0  ;;  %v1866_v1 = vpop.f32.mrf.mxu1 }
 0x6b8   :  { %v1875_v59 = vadd.f32 %v1823_v48, %v11591_v47  ;;  %v1877_v0 = vadd.f32 %v1866_v1, %v11596_v44  ;;  %v10227_v48 = vld [vmem:[#allocation7 + $0xc4] ss:$16 sps:$4 sm:$0xff]   ;;  %v10228_v47 = vld [vmem:[#allocation7 + $0xcc] ss:$16 sps:$4 sm:$0xff]   ;;  %v10230_v1 = vld [vmem:[#allocation7 + $0xc8] ss:$16 sps:$4 sm:$0xff]  }
 0x6b9   :  { %v1825_v61 = vpop.f32.mrf.mxu0  ;;  %v1868_v46 = vpop.f32.mrf.mxu1  ;;  %v10249_v44 = vld [vmem:[#allocation7 + $0x20] ss:$16 sps:$4 sm:$0xff]  }
 0x6ba   :  { %v7937_v63 = vmul.f32 -1.442695, %v1875_v59  ;;  %v1876_v28 = vadd.f32 %v1825_v61, %v11592_v45  ;;  %v1878_v52 = vadd.f32 %v1868_v46, %v11595_v54  ;;  %v10229_v59 = vld [vmem:[#allocation7 + $0xc0] ss:$16 sps:$4 sm:$0xff]   ;;  %v10231_v61 = vld [vmem:[#allocation7 + $0xa4] ss:$16 sps:$4 sm:$0xff]  }
 0x6bb   :  { %v1827_v4 = vpop.f32.mrf.mxu0  ;;  %v1870_v8 = vpop.f32.mrf.mxu1  ;;  %v10233_v45 = vld [vmem:[#allocation7 + $0xa0] ss:$16 sps:$4 sm:$0xff]   ;;  %v10246_v54 = vld [vmem:[#allocation7 + $0x48] ss:$16 sps:$4 sm:$0xff]  }
 0x6bc   :  { %10089 = vpow2.f32 %v7937_v63  ;;  %v7939_v12 = vmul.f32 -1.442695, %v1876_v28  ;;  %v1879_v37 = vadd.f32 %v1827_v4, %v11593_v53  ;;  %v7941_v17 = vmul.f32 -1.442695, %v1878_v52  ;;  %v10232_v63 = vld [vmem:[#allocation7 + $0xac] ss:$16 sps:$4 sm:$0xff]  }
 0x6bd   :  { %v1829_v50 = vpop.f32.mrf.mxu0  ;;  %v1872_v58 = vpop.f32.mrf.mxu1  ;;  %v1881_v51 = vadd.f32 %v1870_v8, %v11598_v20  ;;  %v10234_v28 = vld [vmem:[#allocation7 + $0xa8] ss:$16 sps:$4 sm:$0xff]   ;;  %v10235_v4 = vld [vmem:[#allocation7 + $0x84] ss:$16 sps:$4 sm:$0xff]   ;;  %v10237_v46 = vld [vmem:[#allocation7 + $0x80] ss:$16 sps:$4 sm:$0xff]  }
 0x6be   :  { %10091 = vpow2.f32 %v7939_v12  ;;  %v7938_v24 = vmul.f32 -1.442695, %v1879_v37  ;;  %v1880_v9 = vadd.f32 %v1829_v50, %v11594_v32  ;;  %v1882_v33 = vadd.f32 %v1872_v58, %v11597_v40  ;;  %v10236_v12 = vld [vmem:[#allocation7 + $0x8c] ss:$16 sps:$4 sm:$0xff]   ;;  %v10238_v53 = vld [vmem:[#allocation7 + $0x88] ss:$16 sps:$4 sm:$0xff]  }
 0x6bf   :  { %v10239_v37 = vld [vmem:[#allocation7 + $0x64] ss:$16 sps:$4 sm:$0xff]   ;;  %v10240_v50 = vld [vmem:[#allocation7 + $0x6c] ss:$16 sps:$4 sm:$0xff]   ;;  %v10242_v32 = vld [vmem:[#allocation7 + $0x68] ss:$16 sps:$4 sm:$0xff]  }
 0x6c0   :  { %10093 = vpow2.f32 %v7938_v24  ;;  %v7940_v25 = vmul.f32 -1.442695, %v1880_v9  ;;  %v7942_v6 = vmul.f32 -1.442695, %v1882_v33  ;;  %v10241_v24 = vld [vmem:[#allocation7 + $0x60] ss:$16 sps:$4 sm:$0xff]  }
 0x6c1   :  { %v10243_v9 = vld [vmem:[#allocation7 + $0x44] ss:$16 sps:$4 sm:$0xff]   ;;  %v10244_v8 = vld [vmem:[#allocation7 + $0x4c] ss:$16 sps:$4 sm:$0xff]   ;;  %v10253_v33 = vld [vmem:[#allocation7] ss:$16 sps:$4 sm:$0xff]  }
 0x6c2   :  { %10095 = vpow2.f32 %v7940_v25  ;;  %v10245_v25 = vld [vmem:[#allocation7 + $0x40] ss:$16 sps:$4 sm:$0xff]   ;;  %v10247_v52 = vld [vmem:[#allocation7 + $0x24] ss:$16 sps:$4 sm:$0xff]   ;;  %v10248_v58 = vld [vmem:[#allocation7 + $0x2c] ss:$16 sps:$4 sm:$0xff]  }
 0x6c3   :  { %10097 = vtanh.f32 %v1877_v0  ;;  %v10250_v0 = vld [vmem:[#allocation7 + $0x28] ss:$16 sps:$4 sm:$0xff]   ;;  %v10252_v40 = vld [vmem:[#allocation7 + $0xc] ss:$16 sps:$4 sm:$0xff]  }
 0x6c4   :  { %10099 = vpow2.f32 %v7941_v17  ;;  %v10251_v17 = vld [vmem:[#allocation7 + $0x4] ss:$16 sps:$4 sm:$0xff]   ;;  %v8885_v20 = vld [vmem:[#allocation11 + $0xe4] ss:$16 sps:$4 sm:$0xff]  }
 0x6c9   :  { %v10090_v56 = vpop.eup %10089 }
 0x6ca   :  { %v1889_v36 = vadd.f32 1.0, %v10090_v56  ;;  %v10254_v56 = vld [vmem:[#allocation7 + $0x8] ss:$16 sps:$4 sm:$0xff]  }
 0x6cb   :  { %v10092_v41 = vpop.eup %10091 }
 0x6cc   :  { %10101 = vrcp.f32 %v1889_v36  ;;  %v1901_v3 = vadd.f32 1.0, %v10092_v41  ;;  %v11599_v41 = vld [vmem:[#allocation58_spill] sm:$0xff] }
 0x6cd   :  { %v10094_v39 = vpop.eup %10093  ;;  %10103 = vtanh.f32 %v1881_v51  ;;  %v8888_v51 = vld [vmem:[#allocation11 + $0x2e4] ss:$16 sps:$4 sm:$0xff]  }
 0x6ce   :  { %10105 = vrcp.f32 %v1901_v3  ;;  %v1890_v19 = vadd.f32 1.0, %v10094_v39 }
 0x6cf   :  { %v10096_v15 = vpop.eup %10095  ;;  %10107 = vpow2.f32 %v7942_v6 }
 0x6d0   :  { %10109 = vrcp.f32 %v1890_v19  ;;  %v1902_v57 = vadd.f32 1.0, %v10096_v15  ;;  %v10098_v42 = vpop.eup %10097  ;;  %v11600_v15 = vld [vmem:[#allocation60_spill] sm:$0xff] }
 0x6d1   :  { %v10100_v23 = vpop.eup %10099 }
 0x6d2   :  { %10111 = vrcp.f32 %v1902_v57  ;;  %v1915_v13 = vadd.f32 1.0, %v10100_v23 }
 0x6d4   :  { %10113 = vrcp.f32 %v1915_v13 }
 0x6d9   :  { %v10102_v11 = vpop.eup %10101 }
 0x6da   :  { %v10104_v27 = vpop.eup %10103  ;;  %v1923_v49 = vmul.f32 %v10102_v11, %v10098_v42 }
 0x6db   :  { %v10106_v21 = vpop.eup %10105 }
 0x6dc   :  { %v10108_v29 = vpop.eup %10107  ;;  %v1921_v2 = vmul.f32 %v10106_v21, %v11327_v22 }
 0x6dd   :  { %v10110_v16 = vpop.eup %10109  ;;  %v1916_v60 = vadd.f32 1.0, %v10108_v29 }
 0x6de   :  { %v11377_v5 = vadd.f32 %v1923_v49, %v1921_v2  ;;  %v1924_v10 = vmul.f32 %v10110_v16, %v10104_v27  ;;  %v11601_v27 = vld [vmem:[#allocation62_spill] sm:$0xff]  ;;  %v11602_v2 = vld [vmem:[#allocation64_spill] sm:$0xff] }
 0x6df   :  { %v10112_v14 = vpop.eup %10111 }
 0x6e0   :  { %v1922_v38 = vmul.f32 %v10112_v14, %v11330_v43  ;;  %10115 = vtanh.f32 %v11377_v5  ;;  %v10226_v43 = vld [vmem:[#allocation7 + $0xe8] ss:$16 sps:$4 sm:$0xff]  }
 0x6e1   :  { %10117 = vrcp.f32 %v1916_v60  ;;  %v10114_v26 = vpop.eup %10113  ;;  %v11603_v14 = vld [vmem:[#allocation61_spill] sm:$0xff] }
 0x6e2   :  { %v11380_v34 = vadd.f32 %v1924_v10, %v1922_v38 }
 0x6e4   :  { %10119 = vtanh.f32 %v11380_v34 }
 0x6ed   :  { %v10116_v7 = vpop.eup %10115 }
 0x6ee   :  { %v10118_v22 = vpop.eup %10117  ;;  %v1929_v62 = vmul.f32 %v10116_v7, %v10114_v26  ;;  %v11604_v26 = vld [vmem:[#allocation59_spill] sm:$0xff] }
 0x6f1   :  { %v10120_v18 = vpop.eup %10119 }
 0x6f2   :  { %v1930_v31 = vmul.f32 %v10120_v18, %v10118_v22  ;;  %v11605_v18 = vld [vmem:[#allocation65_spill] sm:$0xff] }
 0x6f4   :  { %v1931_v35 = vpack.c.bf16 %v1930_v31, %v1929_v62 }
 0x6f6   :  { %1965 = vmatmul.mubr.bf16.vlgmr.msra.gmra.mxu0 %v1931_v35  ;;  %2008 = vmatmul.mubr.bf16.vlgmr.msra.gmra.mxu1 %v1931_v35  ;;  %v11606_v35 = vld [vmem:[#allocation63_spill] sm:$0xff] }
 0x6f7   :  { %2076 = vmatpush1.bf16.msra.mxu0 %v10225_v30  ;;  %2119 = vmatpush1.bf16.msra.mxu1 %v10226_v43 }
 0x6f8   :  { %2077 = vmatprep.subr.bf16.mxu0 %v10227_v48  ;;  %2120 = vmatprep.subr.bf16.mxu1 %v10228_v47 }
 0x6f9   :  { %2107 = vmatprep.mubr.bf16.mxu0 %v11572_v55  ;;  %2150 = vmatprep.mubr.bf16.mxu1 %v11572_v55 }
 0x6fb   :  { %2078 = vmatpush1.bf16.msra.mxu0 %v10229_v59  ;;  %2121 = vmatpush1.bf16.msra.mxu1 %v10230_v1 }
 0x6fc   :  { %2079 = vmatprep.subr.bf16.mxu0 %v10231_v61  ;;  %2122 = vmatprep.subr.bf16.mxu1 %v10232_v63 }
 0x6ff   :  { %2080 = vmatpush1.bf16.msra.mxu0 %v10233_v45  ;;  %2123 = vmatpush1.bf16.msra.mxu1 %v10234_v28 }
 0x700   :  { %2081 = vmatprep.subr.bf16.mxu0 %v10235_v4  ;;  %2124 = vmatprep.subr.bf16.mxu1 %v10236_v12 }
 0x703   :  { %2082 = vmatpush1.bf16.msra.mxu0 %v10237_v46  ;;  %2125 = vmatpush1.bf16.msra.mxu1 %v10238_v53 }
 0x704   :  { %2083 = vmatprep.subr.bf16.mxu0 %v10239_v37  ;;  %2126 = vmatprep.subr.bf16.mxu1 %v10240_v50 }
 0x707   :  { %2084 = vmatpush1.bf16.msra.mxu0 %v10241_v24  ;;  %2127 = vmatpush1.bf16.msra.mxu1 %v10242_v32 }
 0x708   :  { %2085 = vmatprep.subr.bf16.mxu0 %v10243_v9  ;;  %2128 = vmatprep.subr.bf16.mxu1 %v10244_v8 }
 0x70b   :  { %2086 = vmatpush1.bf16.msra.mxu0 %v10245_v25  ;;  %2129 = vmatpush1.bf16.msra.mxu1 %v10246_v54 }
 0x70c   :  { %2087 = vmatprep.subr.bf16.mxu0 %v10247_v52  ;;  %2130 = vmatprep.subr.bf16.mxu1 %v10248_v58 }
 0x70f   :  { %2088 = vmatpush1.bf16.msra.mxu0 %v10249_v44  ;;  %2131 = vmatpush1.bf16.msra.mxu1 %v10250_v0 }
 0x710   :  { %2089 = vmatprep.subr.bf16.mxu0 %v10251_v17  ;;  %2132 = vmatprep.subr.bf16.mxu1 %v10252_v40 }
 0x713   :  { %2090 = vmatpush1.bf16.msra.mxu0 %v10253_v33  ;;  %2133 = vmatpush1.bf16.msra.mxu1 %v10254_v56 }
 0x714   :  { %3042 = vmatprep.subr.bf16.mxu0 %v8885_v20  ;;  %3085 = vmatprep.subr.bf16.mxu1 %v8888_v51  ;;  %v8883_v20 = vld [vmem:[#allocation11 + $0xe0] ss:$16 sps:$4 sm:$0xff]  }
 0x715   :  { %v8886_v51 = vld [vmem:[#allocation11 + $0x2e0] ss:$16 sps:$4 sm:$0xff]  }
 0x7b6   :  { %v1966_v36 = vpop.f32.mrf.mxu0  ;;  %v2009_v3 = vpop.f32.mrf.mxu1 }
 0x7b7   :  { %v2018_v6 = vadd.f32 %v1966_v36, %v11599_v41  ;;  %v2020_v7 = vadd.f32 %v2009_v3, %v11604_v26  ;;  %v8891_v41 = vld [vmem:[#allocation11 + $0xc4] ss:$16 sps:$4 sm:$0xff]   ;;  %v11404_v3 = vld [vmem:[#allocation2 + $0xc] ss:$16 sps:$4 sm:$0xff]  }
 0x7b8   :  { %v1968_v39 = vpop.f32.mrf.mxu0  ;;  %v2011_v11 = vpop.f32.mrf.mxu1  ;;  %v8921_v26 = vld [vmem:[#allocation11 + $0x24] ss:$16 sps:$4 sm:$0xff]  }
 0x7b9   :  { %v7943_v19 = vmul.f32 -1.442695, %v2018_v6  ;;  %v2019_v57 = vadd.f32 %v1968_v39, %v11600_v15  ;;  %v2021_v60 = vadd.f32 %v2011_v11, %v11603_v14  ;;  %v8894_v6 = vld [vmem:[#allocation11 + $0x2c4] ss:$16 sps:$4 sm:$0xff]   ;;  %v8889_v39 = vld [vmem:[#allocation11 + $0xc0] ss:$16 sps:$4 sm:$0xff]  }
 0x7ba   :  { %v1970_v42 = vpop.f32.mrf.mxu0  ;;  %v2013_v13 = vpop.f32.mrf.mxu1  ;;  %v8897_v15 = vld [vmem:[#allocation11 + $0xa4] ss:$16 sps:$4 sm:$0xff]  }
 0x7bb   :  { %10121 = vpow2.f32 %v7943_v19  ;;  %v7945_v23 = vmul.f32 -1.442695, %v2019_v57  ;;  %v2022_v49 = vadd.f32 %v1970_v42, %v11601_v27  ;;  %v7947_v22 = vmul.f32 -1.442695, %v2021_v60  ;;  %v8892_v19 = vld [vmem:[#allocation11 + $0x2c0] ss:$16 sps:$4 sm:$0xff]  }
 0x7bc   :  { %v1972_v21 = vpop.f32.mrf.mxu0  ;;  %v2015_v38 = vpop.f32.mrf.mxu1  ;;  %v2024_v30 = vadd.f32 %v2013_v13, %v11606_v35  ;;  %v8900_v57 = vld [vmem:[#allocation11 + $0x2a4] ss:$16 sps:$4 sm:$0xff]   ;;  %v8895_v42 = vld [vmem:[#allocation11 + $0xa0] ss:$16 sps:$4 sm:$0xff]  }
 0x7bd   :  { %10123 = vpow2.f32 %v7945_v23  ;;  %v7944_v29 = vmul.f32 -1.442695, %v2022_v49  ;;  %v2023_v16 = vadd.f32 %v1972_v21, %v11602_v2  ;;  %v2025_v62 = vadd.f32 %v2015_v38, %v11605_v18  ;;  %v8898_v23 = vld [vmem:[#allocation11 + $0x2a0] ss:$16 sps:$4 sm:$0xff]   ;;  %v8903_v11 = vld [vmem:[#allocation11 + $0x84] ss:$16 sps:$4 sm:$0xff]  }
 0x7be   :  { %v8906_v27 = vld [vmem:[#allocation11 + $0x284] ss:$16 sps:$4 sm:$0xff]   ;;  %v8901_v49 = vld [vmem:[#allocation11 + $0x80] ss:$16 sps:$4 sm:$0xff]  }
 0x7bf   :  { %10125 = vpow2.f32 %v7944_v29  ;;  %v7946_v10 = vmul.f32 -1.442695, %v2023_v16  ;;  %v7948_v47 = vmul.f32 -1.442695, %v2025_v62  ;;  %v8904_v21 = vld [vmem:[#allocation11 + $0x280] ss:$16 sps:$4 sm:$0xff]  }
 0x7c0   :  { %v8909_v29 = vld [vmem:[#allocation11 + $0x64] ss:$16 sps:$4 sm:$0xff]   ;;  %v8907_v16 = vld [vmem:[#allocation11 + $0x60] ss:$16 sps:$4 sm:$0xff]  }
 0x7c1   :  { %10127 = vpow2.f32 %v7946_v10  ;;  %v8912_v2 = vld [vmem:[#allocation11 + $0x264] ss:$16 sps:$4 sm:$0xff]   ;;  %v8910_v13 = vld [vmem:[#allocation11 + $0x260] ss:$16 sps:$4 sm:$0xff]  }
 0x7c2   :  { %10129 = vtanh.f32 %v2020_v7  ;;  %v8915_v10 = vld [vmem:[#allocation11 + $0x44] ss:$16 sps:$4 sm:$0xff]   ;;  %v8913_v60 = vld [vmem:[#allocation11 + $0x40] ss:$16 sps:$4 sm:$0xff]  }
 0x7c3   :  { %10131 = vpow2.f32 %v7947_v22  ;;  %v8918_v14 = vld [vmem:[#allocation11 + $0x244] ss:$16 sps:$4 sm:$0xff]   ;;  %v8916_v38 = vld [vmem:[#allocation11 + $0x240] ss:$16 sps:$4 sm:$0xff]  }
 0x7c4   :  { %v8924_v7 = vld [vmem:[#allocation11 + $0x224] ss:$16 sps:$4 sm:$0xff]   ;;  %v8919_v22 = vld [vmem:[#allocation11 + $0x20] ss:$16 sps:$4 sm:$0xff]  }
 0x7c5   :  { %v8922_v18 = vld [vmem:[#allocation11 + $0x220] ss:$16 sps:$4 sm:$0xff]   ;;  %v8927_v62 = vld [vmem:[#allocation11 + $0x4] ss:$16 sps:$4 sm:$0xff]  }
 0x7c6   :  { %v8925_v35 = vld [vmem:[#allocation11] ss:$16 sps:$4 sm:$0xff]  }
 0x7c8   :  { %v10122_v31 = vpop.eup %10121 }
 0x7c9   :  { %v2032_v43 = vadd.f32 1.0, %v10122_v31  ;;  %v8930_v31 = vld [vmem:[#allocation11 + $0x204] ss:$16 sps:$4 sm:$0xff]  }
 0x7ca   :  { %v10124_v48 = vpop.eup %10123 }
 0x7cb   :  { %10133 = vrcp.f32 %v2032_v43  ;;  %v2044_v59 = vadd.f32 1.0, %v10124_v48  ;;  %v8933_v43 = vld [vmem:[#allocation11 + $0x1e4] ss:$16 sps:$4 sm:$0xff]  }
 0x7cc   :  { %v10126_v1 = vpop.eup %10125  ;;  %10135 = vtanh.f32 %v2024_v30  ;;  %v8928_v30 = vld [vmem:[#allocation11 + $0x200] ss:$16 sps:$4 sm:$0xff]   ;;  %v8936_v48 = vld [vmem:[#allocation11 + $0x3e4] ss:$16 sps:$4 sm:$0xff]  }
 0x7cd   :  { %10137 = vrcp.f32 %v2044_v59  ;;  %v2033_v61 = vadd.f32 1.0, %v10126_v1  ;;  %v8934_v59 = vld [vmem:[#allocation11 + $0x3e0] ss:$16 sps:$4 sm:$0xff]   ;;  %v8939_v1 = vld [vmem:[#allocation11 + $0x1c4] ss:$16 sps:$4 sm:$0xff]  }
 0x7ce   :  { %v10128_v63 = vpop.eup %10127  ;;  %10139 = vpow2.f32 %v7948_v47  ;;  %v8931_v47 = vld [vmem:[#allocation11 + $0x1e0] ss:$16 sps:$4 sm:$0xff]  }
 0x7cf   :  { %10141 = vrcp.f32 %v2033_v61  ;;  %v2045_v45 = vadd.f32 1.0, %v10128_v63  ;;  %v10130_v28 = vpop.eup %10129  ;;  %v8942_v61 = vld [vmem:[#allocation11 + $0x3c4] ss:$16 sps:$4 sm:$0xff]   ;;  %v8937_v63 = vld [vmem:[#allocation11 + $0x1c0] ss:$16 sps:$4 sm:$0xff]  }
 0x7d0   :  { %v10132_v4 = vpop.eup %10131 }
 0x7d1   :  { %10143 = vrcp.f32 %v2045_v45  ;;  %v2058_v9 = vadd.f32 1.0, %v10132_v4  ;;  %v8940_v45 = vld [vmem:[#allocation11 + $0x3c0] ss:$16 sps:$4 sm:$0xff]   ;;  %v8948_v4 = vld [vmem:[#allocation11 + $0x3a4] ss:$16 sps:$4 sm:$0xff]  }
 0x7d3   :  { %10145 = vrcp.f32 %v2058_v9  ;;  %v8960_v9 = vld [vmem:[#allocation11 + $0x364] ss:$16 sps:$4 sm:$0xff]  }
 0x7d8   :  { %v10134_v12 = vpop.eup %10133 }
 0x7d9   :  { %v10136_v46 = vpop.eup %10135  ;;  %v2066_v53 = vmul.f32 %v10134_v12, %v10130_v28  ;;  %v8945_v28 = vld [vmem:[#allocation11 + $0x1a4] ss:$16 sps:$4 sm:$0xff]   ;;  %v8943_v12 = vld [vmem:[#allocation11 + $0x1a0] ss:$16 sps:$4 sm:$0xff]  }
 0x7da   :  { %v10138_v37 = vpop.eup %10137 }
 0x7db   :  { %v10140_v50 = vpop.eup %10139  ;;  %v2064_v24 = vmul.f32 %v10138_v37, %v11377_v5  ;;  %v8954_v37 = vld [vmem:[#allocation11 + $0x384] ss:$16 sps:$4 sm:$0xff]  }
 0x7dc   :  { %v10142_v32 = vpop.eup %10141  ;;  %v2059_v52 = vadd.f32 1.0, %v10140_v50  ;;  %v8949_v50 = vld [vmem:[#allocation11 + $0x180] ss:$16 sps:$4 sm:$0xff]  }
 0x7dd   :  { %v11395_v8 = vadd.f32 %v2066_v53, %v2064_v24  ;;  %v2067_v25 = vmul.f32 %v10142_v32, %v10136_v46  ;;  %v8946_v46 = vld [vmem:[#allocation11 + $0x3a0] ss:$16 sps:$4 sm:$0xff]   ;;  %v8951_v53 = vld [vmem:[#allocation11 + $0x184] ss:$16 sps:$4 sm:$0xff]  }
 0x7de   :  { %v10144_v54 = vpop.eup %10143  ;;  %v8952_v24 = vld [vmem:[#allocation11 + $0x380] ss:$16 sps:$4 sm:$0xff]   ;;  %v8957_v32 = vld [vmem:[#allocation11 + $0x164] ss:$16 sps:$4 sm:$0xff]  }
 0x7df   :  { %v2065_v58 = vmul.f32 %v10144_v54, %v11380_v34  ;;  %10147 = vtanh.f32 %v11395_v8  ;;  %v11402_v34 = vld [vmem:[#allocation2 + $0x4] ss:$16 sps:$4 sm:$0xff]  }
 0x7e0   :  { %10149 = vrcp.f32 %v2059_v52  ;;  %v10146_v0 = vpop.eup %10145  ;;  %v8958_v54 = vld [vmem:[#allocation11 + $0x360] ss:$16 sps:$4 sm:$0xff]   ;;  %v8963_v52 = vld [vmem:[#allocation11 + $0x144] ss:$16 sps:$4 sm:$0xff]  }
 0x7e1   :  { %v11398_v44 = vadd.f32 %v2067_v25, %v2065_v58  ;;  %v8955_v25 = vld [vmem:[#allocation11 + $0x160] ss:$16 sps:$4 sm:$0xff]   ;;  %v8966_v58 = vld [vmem:[#allocation11 + $0x344] ss:$16 sps:$4 sm:$0xff]  }
 0x7e3   :  { %10151 = vtanh.f32 %v11398_v44 }
 0x7ec   :  { %v10148_v17 = vpop.eup %10147 }
 0x7ed   :  { %v10150_v5 = vpop.eup %10149  ;;  %v2072_v33 = vmul.f32 %v10148_v17, %v10146_v0  ;;  %v8961_v0 = vld [vmem:[#allocation11 + $0x140] ss:$16 sps:$4 sm:$0xff]  }
 0x7ee   :  { %v8964_v17 = vld [vmem:[#allocation11 + $0x340] ss:$16 sps:$4 sm:$0xff]  }
 0x7f0   :  { %v10152_v40 = vpop.eup %10151 }
 0x7f1   :  { %v2073_v56 = vmul.f32 %v10152_v40, %v10150_v5  ;;  %v8969_v5 = vld [vmem:[#allocation11 + $0x124] ss:$16 sps:$4 sm:$0xff]  }
 0x7f2   :  { %v8972_v40 = vld [vmem:[#allocation11 + $0x324] ss:$16 sps:$4 sm:$0xff]  }
 0x7f3   :  { %v2074_v36 = vpack.c.bf16 %v2073_v56, %v2072_v33  ;;  %v8967_v33 = vld [vmem:[#allocation11 + $0x120] ss:$16 sps:$4 sm:$0xff]  }
 0x7f4   :  { %v8970_v56 = vld [vmem:[#allocation11 + $0x320] ss:$16 sps:$4 sm:$0xff]  }
 0x7f5   :  { %2108 = vmatmul.mubr.bf16.vlgmr.msra.gmra.mxu0 %v2074_v36  ;;  %2151 = vmatmul.mubr.bf16.vlgmr.msra.gmra.mxu1 %v2074_v36  ;;  %v8973_v36 = vld [vmem:[#allocation11 + $0x100] ss:$16 sps:$4 sm:$0xff]  }
 0x7f6   :  { %3043 = vmatpush1.bf16.msra.mxu0 %v8883_v20  ;;  %3086 = vmatpush1.bf16.msra.mxu1 %v8886_v51  ;;  %v8975_v20 = vld [vmem:[#allocation11 + $0x104] ss:$16 sps:$4 sm:$0xff]  }
 0x7f7   :  { %3044 = vmatprep.subr.bf16.mxu0 %v8891_v41  ;;  %3087 = vmatprep.subr.bf16.mxu1 %v8894_v6  ;;  %v8978_v51 = vld [vmem:[#allocation11 + $0x304] ss:$16 sps:$4 sm:$0xff]   ;;  %v8976_v41 = vld [vmem:[#allocation11 + $0x300] ss:$16 sps:$4 sm:$0xff]   ;;  %v8987_v6 = vld [vmem:[#allocation11 + $0xec] ss:$16 sps:$4 sm:$0xff]  }
 0x7f8   :  { %3074 = vmatprep.mubr.bf16.mxu0 %v11402_v34  ;;  %3117 = vmatprep.mubr.bf16.mxu1 %v11404_v3 }
 0x7fa   :  { %3045 = vmatpush1.bf16.msra.mxu0 %v8889_v39  ;;  %3088 = vmatpush1.bf16.msra.mxu1 %v8892_v19  ;;  %v8990_v39 = vld [vmem:[#allocation11 + $0x2ec] ss:$16 sps:$4 sm:$0xff]  }
 0x7fb   :  { %3046 = vmatprep.subr.bf16.mxu0 %v8897_v15  ;;  %3089 = vmatprep.subr.bf16.mxu1 %v8900_v57  ;;  %v11408_v19 = vld [vmem:[#allocation2] ss:$16 sps:$4 sm:$0xff]   ;;  %v11410_v15 = vld [vmem:[#allocation2 + $0x8] ss:$16 sps:$4 sm:$0xff]   ;;  %v8985_v57 = vld [vmem:[#allocation11 + $0xe8] ss:$16 sps:$4 sm:$0xff]  }
 0x7fe   :  { %3047 = vmatpush1.bf16.msra.mxu0 %v8895_v42  ;;  %3090 = vmatpush1.bf16.msra.mxu1 %v8898_v23  ;;  %v8988_v42 = vld [vmem:[#allocation11 + $0x2e8] ss:$16 sps:$4 sm:$0xff]   ;;  %v8993_v23 = vld [vmem:[#allocation11 + $0xcc] ss:$16 sps:$4 sm:$0xff]  }
 0x7ff   :  { %3048 = vmatprep.subr.bf16.mxu0 %v8903_v11  ;;  %3091 = vmatprep.subr.bf16.mxu1 %v8906_v27  ;;  %v8996_v11 = vld [vmem:[#allocation11 + $0x2cc] ss:$16 sps:$4 sm:$0xff]   ;;  %v8991_v27 = vld [vmem:[#allocation11 + $0xc8] ss:$16 sps:$4 sm:$0xff]  }
 0x802   :  { %3049 = vmatpush1.bf16.msra.mxu0 %v8901_v49  ;;  %3092 = vmatpush1.bf16.msra.mxu1 %v8904_v21  ;;  %v8994_v49 = vld [vmem:[#allocation11 + $0x2c8] ss:$16 sps:$4 sm:$0xff]   ;;  %v8999_v21 = vld [vmem:[#allocation11 + $0xac] ss:$16 sps:$4 sm:$0xff]  }
 0x803   :  { %3050 = vmatprep.subr.bf16.mxu0 %v8909_v29  ;;  %3093 = vmatprep.subr.bf16.mxu1 %v8912_v2  ;;  %v9002_v29 = vld [vmem:[#allocation11 + $0x2ac] ss:$16 sps:$4 sm:$0xff]   ;;  %v8997_v2 = vld [vmem:[#allocation11 + $0xa8] ss:$16 sps:$4 sm:$0xff]  }
 0x806   :  { %3051 = vmatpush1.bf16.msra.mxu0 %v8907_v16  ;;  %3094 = vmatpush1.bf16.msra.mxu1 %v8910_v13  ;;  %v9000_v16 = vld [vmem:[#allocation11 + $0x2a8] ss:$16 sps:$4 sm:$0xff]   ;;  %v9005_v13 = vld [vmem:[#allocation11 + $0x8c] ss:$16 sps:$4 sm:$0xff]  }
 0x807   :  { %3052 = vmatprep.subr.bf16.mxu0 %v8915_v10  ;;  %3095 = vmatprep.subr.bf16.mxu1 %v8918_v14  ;;  %v9008_v10 = vld [vmem:[#allocation11 + $0x28c] ss:$16 sps:$4 sm:$0xff]   ;;  %v9003_v14 = vld [vmem:[#allocation11 + $0x88] ss:$16 sps:$4 sm:$0xff]  }
 0x80a   :  { %3053 = vmatpush1.bf16.msra.mxu0 %v8913_v60  ;;  %3096 = vmatpush1.bf16.msra.mxu1 %v8916_v38  ;;  %v9006_v60 = vld [vmem:[#allocation11 + $0x288] ss:$16 sps:$4 sm:$0xff]   ;;  %v9011_v38 = vld [vmem:[#allocation11 + $0x6c] ss:$16 sps:$4 sm:$0xff]  }
 0x80b   :  { %3054 = vmatprep.subr.bf16.mxu0 %v8921_v26  ;;  %3097 = vmatprep.subr.bf16.mxu1 %v8924_v7  ;;  %v9014_v26 = vld [vmem:[#allocation11 + $0x26c] ss:$16 sps:$4 sm:$0xff]  }
 0x80c   :  { %v9017_v7 = vld [vmem:[#allocation11 + $0x4c] ss:$16 sps:$4 sm:$0xff]  }
 0x80e   :  { %3055 = vmatpush1.bf16.msra.mxu0 %v8919_v22  ;;  %3098 = vmatpush1.bf16.msra.mxu1 %v8922_v18  ;;  %v9020_v22 = vld [vmem:[#allocation11 + $0x24c] ss:$16 sps:$4 sm:$0xff]   ;;  %v9015_v18 = vld [vmem:[#allocation11 + $0x48] ss:$16 sps:$4 sm:$0xff]  }
 0x80f   :  { %3056 = vmatprep.subr.bf16.mxu0 %v8927_v62  ;;  %3099 = vmatprep.subr.bf16.mxu1 %v8930_v31  ;;  %v9018_v62 = vld [vmem:[#allocation11 + $0x248] ss:$16 sps:$4 sm:$0xff]   ;;  %v9023_v31 = vld [vmem:[#allocation11 + $0x2c] ss:$16 sps:$4 sm:$0xff]  }
 0x812   :  { %3057 = vmatpush1.bf16.msra.mxu0 %v8925_v35  ;;  %3100 = vmatpush1.bf16.msra.mxu1 %v8928_v30  ;;  %v9026_v35 = vld [vmem:[#allocation11 + $0x22c] ss:$16 sps:$4 sm:$0xff]   ;;  %v9021_v30 = vld [vmem:[#allocation11 + $0x28] ss:$16 sps:$4 sm:$0xff]  }
 0x813   :  { %3058 = vmatprep.subr.bf16.mxu0 %v8933_v43  ;;  %3101 = vmatprep.subr.bf16.mxu1 %v8936_v48  ;;  %v9024_v43 = vld [vmem:[#allocation11 + $0x228] ss:$16 sps:$4 sm:$0xff]   ;;  %v9029_v48 = vld [vmem:[#allocation11 + $0xc] ss:$16 sps:$4 sm:$0xff]  }
 0x816   :  { %3059 = vmatpush2.bf16.msra.mxu0 %v8931_v47  ;;  %3102 = vmatpush2.bf16.msra.mxu1 %v8934_v59  ;;  %v9032_v47 = vld [vmem:[#allocation11 + $0x20c] ss:$16 sps:$4 sm:$0xff]   ;;  %v9027_v59 = vld [vmem:[#allocation11 + $0x8] ss:$16 sps:$4 sm:$0xff]  }
 0x817   :  { %3060 = vmatprep.subr.bf16.mxu0 %v8939_v1  ;;  %3103 = vmatprep.subr.bf16.mxu1 %v8942_v61  ;;  %v9030_v1 = vld [vmem:[#allocation11 + $0x208] ss:$16 sps:$4 sm:$0xff]   ;;  %v9035_v61 = vld [vmem:[#allocation11 + $0x1ec] ss:$16 sps:$4 sm:$0xff]  }
 0x81a   :  { %3061 = vmatpush2.bf16.msra.mxu0 %v8937_v63  ;;  %3104 = vmatpush2.bf16.msra.mxu1 %v8940_v45  ;;  %v9038_v63 = vld [vmem:[#allocation11 + $0x3ec] ss:$16 sps:$4 sm:$0xff]   ;;  %v9033_v45 = vld [vmem:[#allocation11 + $0x1e8] ss:$16 sps:$4 sm:$0xff]  }
 0x81b   :  { %3062 = vmatprep.subr.bf16.mxu0 %v8945_v28  ;;  %3105 = vmatprep.subr.bf16.mxu1 %v8948_v4  ;;  %v9036_v28 = vld [vmem:[#allocation11 + $0x3e8] ss:$16 sps:$4 sm:$0xff]   ;;  %v9041_v4 = vld [vmem:[#allocation11 + $0x1cc] ss:$16 sps:$4 sm:$0xff]  }
 0x81e   :  { %3063 = vmatpush2.bf16.msra.mxu0 %v8943_v12  ;;  %3106 = vmatpush2.bf16.msra.mxu1 %v8946_v46  ;;  %v9044_v12 = vld [vmem:[#allocation11 + $0x3cc] ss:$16 sps:$4 sm:$0xff]   ;;  %v9039_v46 = vld [vmem:[#allocation11 + $0x1c8] ss:$16 sps:$4 sm:$0xff]  }
 0x81f   :  { %3064 = vmatprep.subr.bf16.mxu0 %v8951_v53  ;;  %3107 = vmatprep.subr.bf16.mxu1 %v8954_v37  ;;  %v9042_v53 = vld [vmem:[#allocation11 + $0x3c8] ss:$16 sps:$4 sm:$0xff]   ;;  %v9047_v37 = vld [vmem:[#allocation11 + $0x1ac] ss:$16 sps:$4 sm:$0xff]  }
 0x822   :  { %3065 = vmatpush2.bf16.msra.mxu0 %v8949_v50  ;;  %3108 = vmatpush2.bf16.msra.mxu1 %v8952_v24  ;;  %v9050_v50 = vld [vmem:[#allocation11 + $0x3ac] ss:$16 sps:$4 sm:$0xff]   ;;  %v9045_v24 = vld [vmem:[#allocation11 + $0x1a8] ss:$16 sps:$4 sm:$0xff]  }
 0x823   :  { %3066 = vmatprep.subr.bf16.mxu0 %v8957_v32  ;;  %3109 = vmatprep.subr.bf16.mxu1 %v8960_v9  ;;  %v9048_v32 = vld [vmem:[#allocation11 + $0x3a8] ss:$16 sps:$4 sm:$0xff]   ;;  %v9053_v9 = vld [vmem:[#allocation11 + $0x18c] ss:$16 sps:$4 sm:$0xff]  }
 0x826   :  { %3067 = vmatpush2.bf16.msra.mxu0 %v8955_v25  ;;  %3110 = vmatpush2.bf16.msra.mxu1 %v8958_v54  ;;  %v9056_v25 = vld [vmem:[#allocation11 + $0x38c] ss:$16 sps:$4 sm:$0xff]   ;;  %v9051_v54 = vld [vmem:[#allocation11 + $0x188] ss:$16 sps:$4 sm:$0xff]  }
 0x827   :  { %3068 = vmatprep.subr.bf16.mxu0 %v8963_v52  ;;  %3111 = vmatprep.subr.bf16.mxu1 %v8966_v58  ;;  %v9054_v52 = vld [vmem:[#allocation11 + $0x388] ss:$16 sps:$4 sm:$0xff]   ;;  %v9059_v58 = vld [vmem:[#allocation11 + $0x16c] ss:$16 sps:$4 sm:$0xff]  }
 0x82a   :  { %3069 = vmatpush2.bf16.msra.mxu0 %v8961_v0  ;;  %3112 = vmatpush2.bf16.msra.mxu1 %v8964_v17  ;;  %v9062_v0 = vld [vmem:[#allocation11 + $0x36c] ss:$16 sps:$4 sm:$0xff]   ;;  %v9057_v17 = vld [vmem:[#allocation11 + $0x168] ss:$16 sps:$4 sm:$0xff]  }
 0x82b   :  { %3070 = vmatprep.subr.bf16.mxu0 %v8969_v5  ;;  %3113 = vmatprep.subr.bf16.mxu1 %v8972_v40  ;;  %v9060_v5 = vld [vmem:[#allocation11 + $0x368] ss:$16 sps:$4 sm:$0xff]   ;;  %v9065_v40 = vld [vmem:[#allocation11 + $0x14c] ss:$16 sps:$4 sm:$0xff]  }
 0x82e   :  { %3071 = vmatpush2.bf16.msra.mxu0 %v8967_v33  ;;  %3114 = vmatpush2.bf16.msra.mxu1 %v8970_v56  ;;  %v9068_v33 = vld [vmem:[#allocation11 + $0x34c] ss:$16 sps:$4 sm:$0xff]   ;;  %v9063_v56 = vld [vmem:[#allocation11 + $0x148] ss:$16 sps:$4 sm:$0xff]  }
 0x82f   :  { %3072 = vmatprep.subr.bf16.mxu0 %v8975_v20  ;;  %3115 = vmatprep.subr.bf16.mxu1 %v8978_v51  ;;  %v9066_v20 = vld [vmem:[#allocation11 + $0x348] ss:$16 sps:$4 sm:$0xff]   ;;  %v9071_v51 = vld [vmem:[#allocation11 + $0x12c] ss:$16 sps:$4 sm:$0xff]  }
 0x832   :  { %3073 = vmatpush2.bf16.msra.mxu0 %v8973_v36  ;;  %3116 = vmatpush2.bf16.msra.mxu1 %v8976_v41  ;;  %v9074_v36 = vld [vmem:[#allocation11 + $0x32c] ss:$16 sps:$4 sm:$0xff]   ;;  %v9069_v41 = vld [vmem:[#allocation11 + $0x128] ss:$16 sps:$4 sm:$0xff]  }
 0x833   :  { %3128 = vmatprep.subr.bf16.mxu0 %v8987_v6  ;;  %3171 = vmatprep.subr.bf16.mxu1 %v8990_v39  ;;  %v9072_v6 = vld [vmem:[#allocation11 + $0x328] ss:$16 sps:$4 sm:$0xff]   ;;  %v9077_v39 = vld [vmem:[#allocation11 + $0x10c] ss:$16 sps:$4 sm:$0xff]  }
 0x835   :  { %3075 = vmatmul.mubr.bf16.vlgmr.msra.gmra.mxu0 %v11408_v19  ;;  %3118 = vmatmul.mubr.bf16.vlgmr.msra.gmra.mxu1 %v11410_v15 }
 0x836   :  { %3129 = vmatpush1.bf16.msra.mxu0 %v8985_v57  ;;  %3172 = vmatpush1.bf16.msra.mxu1 %v8988_v42  ;;  %v9080_v57 = vld [vmem:[#allocation11 + $0x30c] ss:$16 sps:$4 sm:$0xff]   ;;  %v9075_v42 = vld [vmem:[#allocation11 + $0x108] ss:$16 sps:$4 sm:$0xff]  }
 0x837   :  { %3130 = vmatprep.subr.bf16.mxu0 %v8993_v23  ;;  %3173 = vmatprep.subr.bf16.mxu1 %v8996_v11  ;;  %v9078_v23 = vld [vmem:[#allocation11 + $0x308] ss:$16 sps:$4 sm:$0xff]   ;;  %v9083_v11 = vld [vmem:[#allocation10 + $0xe4] ss:$16 sps:$4 sm:$0xff]  }
 0x838   :  { %3160 = vmatprep.mubr.bf16.mxu0 %v11402_v34  ;;  %3203 = vmatprep.mubr.bf16.mxu1 %v11404_v3  ;;  %v9009_v34 = vld [vmem:[#allocation11 + $0x68] ss:$16 sps:$4 sm:$0xff]  }
 0x839   :  { %v9012_v3 = vld [vmem:[#allocation11 + $0x268] ss:$16 sps:$4 sm:$0xff]  }
 0x83a   :  { %3131 = vmatpush1.bf16.msra.mxu0 %v8991_v27  ;;  %3174 = vmatpush1.bf16.msra.mxu1 %v8994_v49  ;;  %v9086_v27 = vld [vmem:[#allocation10 + $0xec] ss:$16 sps:$4 sm:$0xff]   ;;  %v9081_v49 = vld [vmem:[#allocation10 + $0xe0] ss:$16 sps:$4 sm:$0xff]  }
 0x83b   :  { %3132 = vmatprep.subr.bf16.mxu0 %v8999_v21  ;;  %3175 = vmatprep.subr.bf16.mxu1 %v9002_v29  ;;  %v9084_v21 = vld [vmem:[#allocation10 + $0xe8] ss:$16 sps:$4 sm:$0xff]   ;;  %v9089_v29 = vld [vmem:[#allocation10 + $0xc4] ss:$16 sps:$4 sm:$0xff]  }
 0x83e   :  { %3133 = vmatpush1.bf16.msra.mxu0 %v8997_v2  ;;  %3176 = vmatpush1.bf16.msra.mxu1 %v9000_v16  ;;  %v9092_v2 = vld [vmem:[#allocation10 + $0xcc] ss:$16 sps:$4 sm:$0xff]   ;;  %v9087_v16 = vld [vmem:[#allocation10 + $0xc0] ss:$16 sps:$4 sm:$0xff]  }
 0x83f   :  { %3134 = vmatprep.subr.bf16.mxu0 %v9005_v13  ;;  %3177 = vmatprep.subr.bf16.mxu1 %v9008_v10  ;;  %v9090_v13 = vld [vmem:[#allocation10 + $0xc8] ss:$16 sps:$4 sm:$0xff]   ;;  %v9095_v10 = vld [vmem:[#allocation10 + $0xa4] ss:$16 sps:$4 sm:$0xff]  }
 0x842   :  { %3135 = vmatpush1.bf16.msra.mxu0 %v9003_v14  ;;  %3178 = vmatpush1.bf16.msra.mxu1 %v9006_v60  ;;  %v9098_v14 = vld [vmem:[#allocation10 + $0xac] ss:$16 sps:$4 sm:$0xff]   ;;  %v9093_v60 = vld [vmem:[#allocation10 + $0xa0] ss:$16 sps:$4 sm:$0xff]  }
 0x843   :  { %3136 = vmatprep.subr.bf16.mxu0 %v9011_v38  ;;  %3179 = vmatprep.subr.bf16.mxu1 %v9014_v26  ;;  %v9096_v38 = vld [vmem:[#allocation10 + $0xa8] ss:$16 sps:$4 sm:$0xff]   ;;  %v9099_v26 = vld [vmem:[#allocation10 + $0x80] ss:$16 sps:$4 sm:$0xff]  }
 0x846   :  { %3137 = vmatpush1.bf16.msra.mxu0 %v9009_v34  ;;  %3180 = vmatpush1.bf16.msra.mxu1 %v9012_v3  ;;  %v9102_v34 = vld [vmem:[#allocation10 + $0x88] ss:$16 sps:$4 sm:$0xff]   ;;  %v9107_v3 = vld [vmem:[#allocation10 + $0x64] ss:$16 sps:$4 sm:$0xff]  }
 0x847   :  { %3138 = vmatprep.subr.bf16.mxu0 %v9017_v7  ;;  %3181 = vmatprep.subr.bf16.mxu1 %v9020_v22  ;;  %v9110_v7 = vld [vmem:[#allocation10 + $0x6c] ss:$16 sps:$4 sm:$0xff]   ;;  %v9105_v22 = vld [vmem:[#allocation10 + $0x60] ss:$16 sps:$4 sm:$0xff]  }
 0x84a   :  { %3139 = vmatpush1.bf16.msra.mxu0 %v9015_v18  ;;  %3182 = vmatpush1.bf16.msra.mxu1 %v9018_v62  ;;  %v9113_v18 = vld [vmem:[#allocation10 + $0x44] ss:$16 sps:$4 sm:$0xff]   ;;  %v9116_v62 = vld [vmem:[#allocation10 + $0x4c] ss:$16 sps:$4 sm:$0xff]  }
 0x84b   :  { %3140 = vmatprep.subr.bf16.mxu0 %v9023_v31  ;;  %3183 = vmatprep.subr.bf16.mxu1 %v9026_v35  ;;  %v9111_v31 = vld [vmem:[#allocation10 + $0x40] ss:$16 sps:$4 sm:$0xff]   ;;  %v9114_v35 = vld [vmem:[#allocation10 + $0x48] ss:$16 sps:$4 sm:$0xff]  }
 0x84e   :  { %3141 = vmatpush1.bf16.msra.mxu0 %v9021_v30  ;;  %3184 = vmatpush1.bf16.msra.mxu1 %v9024_v43  ;;  %v9119_v30 = vld [vmem:[#allocation10 + $0x24] ss:$16 sps:$4 sm:$0xff]   ;;  %v9122_v43 = vld [vmem:[#allocation10 + $0x2c] ss:$16 sps:$4 sm:$0xff]  }
 0x84f   :  { %3142 = vmatprep.subr.bf16.mxu0 %v9029_v48  ;;  %3185 = vmatprep.subr.bf16.mxu1 %v9032_v47  ;;  %v9117_v48 = vld [vmem:[#allocation10 + $0x20] ss:$16 sps:$4 sm:$0xff]   ;;  %v9120_v47 = vld [vmem:[#allocation10 + $0x28] ss:$16 sps:$4 sm:$0xff]  }
 0x852   :  { %3143 = vmatpush1.bf16.msra.mxu0 %v9027_v59  ;;  %3186 = vmatpush1.bf16.msra.mxu1 %v9030_v1  ;;  %v9125_v59 = vld [vmem:[#allocation10 + $0x4] ss:$16 sps:$4 sm:$0xff]   ;;  %v9128_v1 = vld [vmem:[#allocation10 + $0xc] ss:$16 sps:$4 sm:$0xff]  }
 0x853   :  { %3144 = vmatprep.subr.bf16.mxu0 %v9035_v61  ;;  %3187 = vmatprep.subr.bf16.mxu1 %v9038_v63  ;;  %v9123_v61 = vld [vmem:[#allocation10] ss:$16 sps:$4 sm:$0xff]   ;;  %v9126_v63 = vld [vmem:[#allocation10 + $0x8] ss:$16 sps:$4 sm:$0xff]  }
 0x856   :  { %3145 = vmatpush2.bf16.msra.mxu0 %v9033_v45  ;;  %3188 = vmatpush2.bf16.msra.mxu1 %v9036_v28  ;;  %v9131_v45 = vld [vmem:[#allocation14 + $0xe4] ss:$16 sps:$4 sm:$0xff]  }
 0x857   :  { %3146 = vmatprep.subr.bf16.mxu0 %v9041_v4  ;;  %3189 = vmatprep.subr.bf16.mxu1 %v9044_v12  ;;  %v9134_v28 = vld [vmem:[#allocation14 + $0x2e4] ss:$16 sps:$4 sm:$0xff]  }
 0x858   :  { %v11607_v12 = vld [vmem:[#allocation66_spill] sm:$0xff] }
 0x85a   :  { %3147 = vmatpush2.bf16.msra.mxu0 %v9039_v46  ;;  %3190 = vmatpush2.bf16.msra.mxu1 %v9042_v53 }
 0x85b   :  { %3148 = vmatprep.subr.bf16.mxu0 %v9047_v37  ;;  %3191 = vmatprep.subr.bf16.mxu1 %v9050_v50 }
 0x85e   :  { %3149 = vmatpush2.bf16.msra.mxu0 %v9045_v24  ;;  %3192 = vmatpush2.bf16.msra.mxu1 %v9048_v32  ;;  %v11608_v24 = vld [vmem:[#allocation68_spill] sm:$0xff] }
 0x85f   :  { %3150 = vmatprep.subr.bf16.mxu0 %v9053_v9  ;;  %3193 = vmatprep.subr.bf16.mxu1 %v9056_v25 }
 0x862   :  { %3151 = vmatpush2.bf16.msra.mxu0 %v9051_v54  ;;  %3194 = vmatpush2.bf16.msra.mxu1 %v9054_v52  ;;  %v11609_v52 = vld [vmem:[#allocation70_spill] sm:$0xff] }
 0x863   :  { %3152 = vmatprep.subr.bf16.mxu0 %v9059_v58  ;;  %3195 = vmatprep.subr.bf16.mxu1 %v9062_v0 }
 0x866   :  { %3153 = vmatpush2.bf16.msra.mxu0 %v9057_v17  ;;  %3196 = vmatpush2.bf16.msra.mxu1 %v9060_v5  ;;  %v11610_v5 = vld [vmem:[#allocation72_spill] sm:$0xff] }
 0x867   :  { %3154 = vmatprep.subr.bf16.mxu0 %v9065_v40  ;;  %3197 = vmatprep.subr.bf16.mxu1 %v9068_v33 }
 0x86a   :  { %3155 = vmatpush2.bf16.msra.mxu0 %v9063_v56  ;;  %3198 = vmatpush2.bf16.msra.mxu1 %v9066_v20  ;;  %v11611_v20 = vld [vmem:[#allocation69_spill] sm:$0xff] }
 0x86b   :  { %3156 = vmatprep.subr.bf16.mxu0 %v9071_v51  ;;  %3199 = vmatprep.subr.bf16.mxu1 %v9074_v36 }
 0x86e   :  { %3157 = vmatpush2.bf16.msra.mxu0 %v9069_v41  ;;  %3200 = vmatpush2.bf16.msra.mxu1 %v9072_v6  ;;  %v11612_v41 = vld [vmem:[#allocation67_spill] sm:$0xff] }
 0x86f   :  { %3158 = vmatprep.subr.bf16.mxu0 %v9077_v39  ;;  %3201 = vmatprep.subr.bf16.mxu1 %v9080_v57  ;;  %v11613_v57 = vld [vmem:[#allocation73_spill] sm:$0xff] }
 0x872   :  { %3159 = vmatpush2.bf16.msra.mxu0 %v9075_v42  ;;  %3202 = vmatpush2.bf16.msra.mxu1 %v9078_v23 }
 0x873   :  { %3374 = vmatprep.subr.bf16.mxu0 %v9083_v11  ;;  %3417 = vmatprep.subr.bf16.mxu1 %v9086_v27  ;;  %v11614_v11 = vld [vmem:[#allocation71_spill] sm:$0xff] }
 0x875   :  { %3161 = vmatmul.mubr.bf16.vlgmr.msra.gmra.mxu0 %v11408_v19  ;;  %3204 = vmatmul.mubr.bf16.vlgmr.msra.gmra.mxu1 %v11410_v15  ;;  %v9101_v19 = vld [vmem:[#allocation10 + $0x84] ss:$16 sps:$4 sm:$0xff]   ;;  %v9104_v15 = vld [vmem:[#allocation10 + $0x8c] ss:$16 sps:$4 sm:$0xff]  }
 0x876   :  { %3375 = vmatpush1.bf16.msra.mxu0 %v9081_v49  ;;  %3418 = vmatpush1.bf16.msra.mxu1 %v9084_v21 }
 0x877   :  { %3376 = vmatprep.subr.bf16.mxu0 %v9089_v29  ;;  %3419 = vmatprep.subr.bf16.mxu1 %v9092_v2 }
 0x878   :  { %3406 = vmatprep.mubr.bf16.mxu0 %v11572_v55  ;;  %3449 = vmatprep.mubr.bf16.mxu1 %v11572_v55  ;;  %v9108_v55 = vld [vmem:[#allocation10 + $0x68] ss:$16 sps:$4 sm:$0xff]  }
 0x87a   :  { %3377 = vmatpush1.bf16.msra.mxu0 %v9087_v16  ;;  %3420 = vmatpush1.bf16.msra.mxu1 %v9090_v13 }
 0x87b   :  { %3378 = vmatprep.subr.bf16.mxu0 %v9095_v10  ;;  %3421 = vmatprep.subr.bf16.mxu1 %v9098_v14 }
 0x87e   :  { %3379 = vmatpush1.bf16.msra.mxu0 %v9093_v60  ;;  %3422 = vmatpush1.bf16.msra.mxu1 %v9096_v38 }
 0x87f   :  { %3380 = vmatprep.subr.bf16.mxu0 %v9101_v19  ;;  %3423 = vmatprep.subr.bf16.mxu1 %v9104_v15 }
 0x882   :  { %3381 = vmatpush1.bf16.msra.mxu0 %v9099_v26  ;;  %3424 = vmatpush1.bf16.msra.mxu1 %v9102_v34 }
 0x883   :  { %3382 = vmatprep.subr.bf16.mxu0 %v9107_v3  ;;  %3425 = vmatprep.subr.bf16.mxu1 %v9110_v7 }
 0x886   :  { %3383 = vmatpush1.bf16.msra.mxu0 %v9105_v22  ;;  %3426 = vmatpush1.bf16.msra.mxu1 %v9108_v55 }
 0x887   :  { %3384 = vmatprep.subr.bf16.mxu0 %v9113_v18  ;;  %3427 = vmatprep.subr.bf16.mxu1 %v9116_v62 }
 0x88a   :  { %3385 = vmatpush1.bf16.msra.mxu0 %v9111_v31  ;;  %3428 = vmatpush1.bf16.msra.mxu1 %v9114_v35 }
 0x88b   :  { %3386 = vmatprep.subr.bf16.mxu0 %v9119_v30  ;;  %3429 = vmatprep.subr.bf16.mxu1 %v9122_v43 }
 0x88e   :  { %3387 = vmatpush1.bf16.msra.mxu0 %v9117_v48  ;;  %3430 = vmatpush1.bf16.msra.mxu1 %v9120_v47 }
 0x88f   :  { %3388 = vmatprep.subr.bf16.mxu0 %v9125_v59  ;;  %3431 = vmatprep.subr.bf16.mxu1 %v9128_v1 }
 0x892   :  { %3389 = vmatpush1.bf16.msra.mxu0 %v9123_v61  ;;  %3432 = vmatpush1.bf16.msra.mxu1 %v9126_v63 }
 0x893   :  { %4292 = vmatprep.subr.bf16.mxu0 %v9131_v45  ;;  %4335 = vmatprep.subr.bf16.mxu1 %v9134_v28  ;;  %v9129_v45 = vld [vmem:[#allocation14 + $0xe0] ss:$16 sps:$4 sm:$0xff]  }
 0x8b5   :  { %v2109_v4 = vpop.f32.mrf.mxu0  ;;  %v2152_v53 = vpop.f32.mrf.mxu1 }
 0x8b6   :  { %v2161_v46 = vadd.f32 %v2109_v4, %v11607_v12  ;;  %v2163_v6 = vadd.f32 %v2152_v53, %v11612_v41  ;;  %v9137_v4 = vld [vmem:[#allocation14 + $0xc4] ss:$16 sps:$4 sm:$0xff]   ;;  %v9168_v41 = vld [vmem:[#allocation14 + $0x220] ss:$16 sps:$4 sm:$0xff]  }
 0x8b7   :  { %v2111_v37 = vpop.f32.mrf.mxu0  ;;  %v2154_v54 = vpop.f32.mrf.mxu1  ;;  %v9140_v12 = vld [vmem:[#allocation14 + $0x2c4] ss:$16 sps:$4 sm:$0xff]  }
 0x8b8   :  { %v7949_v50 = vmul.f32 -1.442695, %v2161_v46  ;;  %v2162_v32 = vadd.f32 %v2111_v37, %v11608_v24  ;;  %v2164_v51 = vadd.f32 %v2154_v54, %v11611_v20  ;;  %v9135_v46 = vld [vmem:[#allocation14 + $0xc0] ss:$16 sps:$4 sm:$0xff]   ;;  %v9143_v53 = vld [vmem:[#allocation14 + $0xa4] ss:$16 sps:$4 sm:$0xff]  }
 0x8b9   :  { %v2113_v9 = vpop.f32.mrf.mxu0  ;;  %v2156_v33 = vpop.f32.mrf.mxu1  ;;  %v9146_v37 = vld [vmem:[#allocation14 + $0x2a4] ss:$16 sps:$4 sm:$0xff]   ;;  %v9144_v24 = vld [vmem:[#allocation14 + $0x2a0] ss:$16 sps:$4 sm:$0xff]  }
 0x8ba   :  { %10153 = vpow2.f32 %v7949_v50  ;;  %v7951_v25 = vmul.f32 -1.442695, %v2162_v32  ;;  %v2165_v58 = vadd.f32 %v2113_v9, %v11609_v52  ;;  %v7953_v39 = vmul.f32 -1.442695, %v2164_v51  ;;  %v9141_v50 = vld [vmem:[#allocation14 + $0xa0] ss:$16 sps:$4 sm:$0xff]  }
 0x8bb   :  { %v2115_v0 = vpop.f32.mrf.mxu0  ;;  %v2158_v36 = vpop.f32.mrf.mxu1  ;;  %v2167_v27 = vadd.f32 %v2156_v33, %v11614_v11  ;;  %v9149_v32 = vld [vmem:[#allocation14 + $0x84] ss:$16 sps:$4 sm:$0xff]   ;;  %v9150_v54 = vld [vmem:[#allocation14 + $0x280] ss:$16 sps:$4 sm:$0xff]  }
 0x8bc   :  { %10155 = vpow2.f32 %v7951_v25  ;;  %v7950_v17 = vmul.f32 -1.442695, %v2165_v58  ;;  %v2166_v40 = vadd.f32 %v2115_v0, %v11610_v5  ;;  %v2168_v42 = vadd.f32 %v2158_v36, %v11613_v57  ;;  %v9152_v9 = vld [vmem:[#allocation14 + $0x284] ss:$16 sps:$4 sm:$0xff]   ;;  %v9147_v25 = vld [vmem:[#allocation14 + $0x80] ss:$16 sps:$4 sm:$0xff]  }
 0x8bd   :  { %v9155_v52 = vld [vmem:[#allocation14 + $0x64] ss:$16 sps:$4 sm:$0xff]   ;;  %v9153_v0 = vld [vmem:[#allocation14 + $0x60] ss:$16 sps:$4 sm:$0xff]  }
 0x8be   :  { %10157 = vpow2.f32 %v7950_v17  ;;  %v7952_v56 = vmul.f32 -1.442695, %v2166_v40  ;;  %v7954_v29 = vmul.f32 -1.442695, %v2168_v42  ;;  %v9158_v58 = vld [vmem:[#allocation14 + $0x264] ss:$16 sps:$4 sm:$0xff]  }
 0x8bf   :  { %v9156_v17 = vld [vmem:[#allocation14 + $0x260] ss:$16 sps:$4 sm:$0xff]   ;;  %v9161_v5 = vld [vmem:[#allocation14 + $0x44] ss:$16 sps:$4 sm:$0xff]  }
 0x8c0   :  { %10159 = vpow2.f32 %v7952_v56  ;;  %v9164_v40 = vld [vmem:[#allocation14 + $0x244] ss:$16 sps:$4 sm:$0xff]   ;;  %v9159_v33 = vld [vmem:[#allocation14 + $0x40] ss:$16 sps:$4 sm:$0xff]  }
 0x8c1   :  { %10161 = vtanh.f32 %v2163_v6  ;;  %v9162_v56 = vld [vmem:[#allocation14 + $0x240] ss:$16 sps:$4 sm:$0xff]   ;;  %v9167_v20 = vld [vmem:[#allocation14 + $0x24] ss:$16 sps:$4 sm:$0xff]  }
 0x8c2   :  { %10163 = vpow2.f32 %v7953_v39  ;;  %v9170_v51 = vld [vmem:[#allocation14 + $0x224] ss:$16 sps:$4 sm:$0xff]   ;;  %v9165_v36 = vld [vmem:[#allocation14 + $0x20] ss:$16 sps:$4 sm:$0xff]  }
 0x8c3   :  { %v9173_v6 = vld [vmem:[#allocation14 + $0x4] ss:$16 sps:$4 sm:$0xff]   ;;  %v9171_v57 = vld [vmem:[#allocation14] ss:$16 sps:$4 sm:$0xff]  }
 0x8c4   :  { %v9176_v39 = vld [vmem:[#allocation14 + $0x204] ss:$16 sps:$4 sm:$0xff]   ;;  %v9174_v42 = vld [vmem:[#allocation14 + $0x200] ss:$16 sps:$4 sm:$0xff]  }
 0x8c5   :  { %v9182_v11 = vld [vmem:[#allocation14 + $0x3e4] ss:$16 sps:$4 sm:$0xff]  }
 0x8c7   :  { %v10154_v23 = vpop.eup %10153 }
 0x8c8   :  { %v2175_v49 = vadd.f32 1.0, %v10154_v23  ;;  %v9179_v23 = vld [vmem:[#allocation14 + $0x1e4] ss:$16 sps:$4 sm:$0xff]  }
 0x8c9   :  { %v10156_v21 = vpop.eup %10155 }
 0x8ca   :  { %10165 = vrcp.f32 %v2175_v49  ;;  %v2187_v2 = vadd.f32 1.0, %v10156_v21  ;;  %v9180_v49 = vld [vmem:[#allocation14 + $0x3e0] ss:$16 sps:$4 sm:$0xff]   ;;  %v9185_v21 = vld [vmem:[#allocation14 + $0x1c4] ss:$16 sps:$4 sm:$0xff]  }
 0x8cb   :  { %v10158_v16 = vpop.eup %10157  ;;  %10167 = vtanh.f32 %v2167_v27  ;;  %v9177_v27 = vld [vmem:[#allocation14 + $0x1e0] ss:$16 sps:$4 sm:$0xff]  }
 0x8cc   :  { %10169 = vrcp.f32 %v2187_v2  ;;  %v2176_v13 = vadd.f32 1.0, %v10158_v16  ;;  %v9183_v2 = vld [vmem:[#allocation14 + $0x1c0] ss:$16 sps:$4 sm:$0xff]  }
 0x8cd   :  { %v10160_v10 = vpop.eup %10159  ;;  %10171 = vpow2.f32 %v7954_v29  ;;  %v9188_v29 = vld [vmem:[#allocation14 + $0x3c4] ss:$16 sps:$4 sm:$0xff]   ;;  %v9186_v16 = vld [vmem:[#allocation14 + $0x3c0] ss:$16 sps:$4 sm:$0xff]  }
 0x8ce   :  { %10173 = vrcp.f32 %v2176_v13  ;;  %v2188_v14 = vadd.f32 1.0, %v10160_v10  ;;  %v10162_v60 = vpop.eup %10161  ;;  %v9191_v13 = vld [vmem:[#allocation14 + $0x1a4] ss:$16 sps:$4 sm:$0xff]  }
 0x8cf   :  { %v10164_v38 = vpop.eup %10163  ;;  %v9194_v10 = vld [vmem:[#allocation14 + $0x3a4] ss:$16 sps:$4 sm:$0xff]  }
 0x8d0   :  { %10175 = vrcp.f32 %v2188_v14  ;;  %v2201_v3 = vadd.f32 1.0, %v10164_v38  ;;  %v9189_v14 = vld [vmem:[#allocation14 + $0x1a0] ss:$16 sps:$4 sm:$0xff]   ;;  %v9197_v38 = vld [vmem:[#allocation14 + $0x184] ss:$16 sps:$4 sm:$0xff]  }
 0x8d2   :  { %10177 = vrcp.f32 %v2201_v3  ;;  %v9206_v3 = vld [vmem:[#allocation14 + $0x364] ss:$16 sps:$4 sm:$0xff]  }
 0x8d7   :  { %v10166_v19 = vpop.eup %10165 }
 0x8d8   :  { %v10168_v15 = vpop.eup %10167  ;;  %v2209_v26 = vmul.f32 %v10166_v19, %v10162_v60  ;;  %v9192_v60 = vld [vmem:[#allocation14 + $0x3a0] ss:$16 sps:$4 sm:$0xff]   ;;  %v9200_v19 = vld [vmem:[#allocation14 + $0x384] ss:$16 sps:$4 sm:$0xff]  }
 0x8d9   :  { %v10170_v34 = vpop.eup %10169 }
 0x8da   :  { %v10172_v7 = vpop.eup %10171  ;;  %v2207_v22 = vmul.f32 %v10170_v34, %v11395_v8  ;;  %v9132_v8 = vld [vmem:[#allocation14 + $0x2e0] ss:$16 sps:$4 sm:$0xff]   ;;  %v9203_v34 = vld [vmem:[#allocation14 + $0x164] ss:$16 sps:$4 sm:$0xff]  }
 0x8db   :  { %v10174_v55 = vpop.eup %10173  ;;  %v2202_v35 = vadd.f32 1.0, %v10172_v7  ;;  %v9201_v7 = vld [vmem:[#allocation14 + $0x160] ss:$16 sps:$4 sm:$0xff]  }
 0x8dc   :  { %v2211_v18 = vadd.f32 %v2209_v26, %v2207_v22  ;;  %v2210_v62 = vmul.f32 %v10174_v55, %v10168_v15  ;;  %v9195_v15 = vld [vmem:[#allocation14 + $0x180] ss:$16 sps:$4 sm:$0xff]   ;;  %v9209_v55 = vld [vmem:[#allocation14 + $0x144] ss:$16 sps:$4 sm:$0xff]  }
 0x8dd   :  { %v10176_v31 = vpop.eup %10175  ;;  %v9198_v26 = vld [vmem:[#allocation14 + $0x380] ss:$16 sps:$4 sm:$0xff]  }
 0x8de   :  { %10179 = vtanh.f32 %v2211_v18  ;;  %v2208_v30 = vmul.f32 %v10176_v31, %v11398_v44  ;;  %v9138_v44 = vld [vmem:[#allocation14 + $0x2c0] ss:$16 sps:$4 sm:$0xff]   ;;  %v9212_v18 = vld [vmem:[#allocation14 + $0x344] ss:$16 sps:$4 sm:$0xff]  }
 0x8df   :  { %10181 = vrcp.f32 %v2202_v35  ;;  %v10178_v48 = vpop.eup %10177  ;;  %v9204_v22 = vld [vmem:[#allocation14 + $0x360] ss:$16 sps:$4 sm:$0xff]   ;;  %v9215_v35 = vld [vmem:[#allocation14 + $0x124] ss:$16 sps:$4 sm:$0xff]  }
 0x8e0   :  { %v2212_v43 = vadd.f32 %v2210_v62, %v2208_v30  ;;  %v9207_v62 = vld [vmem:[#allocation14 + $0x140] ss:$16 sps:$4 sm:$0xff]   ;;  %v9218_v30 = vld [vmem:[#allocation14 + $0x324] ss:$16 sps:$4 sm:$0xff]  }
 0x8e1   :  { %v9210_v31 = vld [vmem:[#allocation14 + $0x340] ss:$16 sps:$4 sm:$0xff]  }
 0x8e2   :  { %10183 = vtanh.f32 %v2212_v43  ;;  %v9213_v43 = vld [vmem:[#allocation14 + $0x120] ss:$16 sps:$4 sm:$0xff]  }
 0x8eb   :  { %v10180_v47 = vpop.eup %10179 }
 0x8ec   :  { %v2215_v59 = vmul.f32 %v10180_v47, %v10178_v48  ;;  %v10182_v1 = vpop.eup %10181  ;;  %v9216_v48 = vld [vmem:[#allocation14 + $0x320] ss:$16 sps:$4 sm:$0xff]  }
 0x8ed   :  { %v9219_v47 = vld [vmem:[#allocation14 + $0x100] ss:$16 sps:$4 sm:$0xff]  }
 0x8ef   :  { %v10184_v61 = vpop.eup %10183 }
 0x8f0   :  { %v2216_v63 = vmul.f32 %v10184_v61, %v10182_v1  ;;  %v9222_v1 = vld [vmem:[#allocation14 + $0x300] ss:$16 sps:$4 sm:$0xff]   ;;  %v9224_v61 = vld [vmem:[#allocation14 + $0x304] ss:$16 sps:$4 sm:$0xff]  }
 0x8f2   :  { %v2221_v28 = vpack.c.bf16 %v2216_v63, %v2215_v59  ;;  %v9221_v59 = vld [vmem:[#allocation14 + $0x104] ss:$16 sps:$4 sm:$0xff]   ;;  %v9227_v63 = vld [vmem:[#allocation14 + $0xec] ss:$16 sps:$4 sm:$0xff]  }
 0x8f4   :  { %3407 = vmatmul.mubr.bf16.vlgmr.msra.gmra.mxu0 %v2221_v28  ;;  %3450 = vmatmul.mubr.bf16.vlgmr.msra.gmra.mxu1 %v2221_v28 }
 0x8f5   :  { %4293 = vmatpush1.bf16.msra.mxu0 %v9129_v45  ;;  %4336 = vmatpush1.bf16.msra.mxu1 %v9132_v8  ;;  %v9230_v45 = vld [vmem:[#allocation14 + $0x2ec] ss:$16 sps:$4 sm:$0xff]   ;;  %v3076_v8 = vpop.f32.mrf.mxu0  ;;  %v3119_v28 = vpop.f32.mrf.mxu1 }
 0x8f6   :  { %4294 = vmatprep.subr.bf16.mxu0 %v9137_v4  ;;  %4337 = vmatprep.subr.bf16.mxu1 %v9140_v12 }
 0x8f7   :  { %v3078_v4 = vpop.f32.mrf.mxu0  ;;  %v3121_v12 = vpop.f32.mrf.mxu1 }
 0x8f9   :  { %4295 = vmatpush1.bf16.msra.mxu0 %v9135_v46  ;;  %4338 = vmatpush1.bf16.msra.mxu1 %v9138_v44  ;;  %v3080_v46 = vpop.f32.mrf.mxu0  ;;  %v3123_v44 = vpop.f32.mrf.mxu1 }
 0x8fa   :  { %4296 = vmatprep.subr.bf16.mxu0 %v9143_v53  ;;  %4339 = vmatprep.subr.bf16.mxu1 %v9146_v37 }
 0x8fb   :  { %v3082_v53 = vpop.f32.mrf.mxu0  ;;  %v3125_v37 = vpop.f32.mrf.mxu1 }
 0x8fd   :  { %4297 = vmatpush1.bf16.msra.mxu0 %v9141_v50  ;;  %4340 = vmatpush1.bf16.msra.mxu1 %v9144_v24 }
 0x8fe   :  { %4298 = vmatprep.subr.bf16.mxu0 %v9149_v32  ;;  %4341 = vmatprep.subr.bf16.mxu1 %v9152_v9 }
 0x901   :  { %4299 = vmatpush1.bf16.msra.mxu0 %v9147_v25  ;;  %4342 = vmatpush1.bf16.msra.mxu1 %v9150_v54 }
 0x902   :  { %4300 = vmatprep.subr.bf16.mxu0 %v9155_v52  ;;  %4343 = vmatprep.subr.bf16.mxu1 %v9158_v58 }
 0x905   :  { %4301 = vmatpush1.bf16.msra.mxu0 %v9153_v0  ;;  %4344 = vmatpush1.bf16.msra.mxu1 %v9156_v17  ;;  %v3460_v0 = vld [vmem:[#allocation13] sm:$0xf] }
 0x906   :  { %4302 = vmatprep.subr.bf16.mxu0 %v9161_v5  ;;  %4345 = vmatprep.subr.bf16.mxu1 %v9164_v40  ;;  %v3122_v40 = vadd.f32 %v3121_v12, %v3078_v4  ;;  %v9225_v12 = vld [vmem:[#allocation14 + $0xe8] ss:$16 sps:$4 sm:$0xff]  }
 0x909   :  { %4303 = vmatpush1.bf16.msra.mxu0 %v9159_v33  ;;  %4346 = vmatpush1.bf16.msra.mxu1 %v9162_v56  ;;  %v3120_v56 = vadd.f32 %v3119_v28, %v3076_v8 }
 0x90a   :  { %4304 = vmatprep.subr.bf16.mxu0 %v9167_v20  ;;  %4347 = vmatprep.subr.bf16.mxu1 %v9170_v51  ;;  %v3124_v20 = vadd.f32 %v3123_v44, %v3080_v46  ;;  %v9228_v46 = vld [vmem:[#allocation14 + $0x2e8] ss:$16 sps:$4 sm:$0xff]  }
 0x90d   :  { %4305 = vmatpush1.bf16.msra.mxu0 %v9165_v36  ;;  %4348 = vmatpush1.bf16.msra.mxu1 %v9168_v41  ;;  %v11615_v36 = vld [vmem:[#allocation28_spill] sm:$0xff] }
 0x90e   :  { %4306 = vmatprep.subr.bf16.mxu0 %v9173_v6  ;;  %4349 = vmatprep.subr.bf16.mxu1 %v9176_v39  ;;  %v3465_v41 = vrot.slane %v3460_v0, %v11615_v36 }
 0x911   :  { %4307 = vmatpush1.bf16.msra.mxu0 %v9171_v57  ;;  %4350 = vmatpush1.bf16.msra.mxu1 %v9174_v42  ;;  %v11616_v42 = vld [vmem:[#allocation30_spill] sm:$0xff] }
 0x912   :  { %4308 = vmatprep.subr.bf16.mxu0 %v9179_v23  ;;  %4351 = vmatprep.subr.bf16.mxu1 %v9182_v11  ;;  %v3469_v23 = vrot.slane %v3460_v0, %v11616_v42 }
 0x915   :  { %4309 = vmatpush2.bf16.msra.mxu0 %v9177_v27  ;;  %4352 = vmatpush2.bf16.msra.mxu1 %v9180_v49  ;;  %v11617_v27 = vld [vmem:[#allocation31_spill] sm:$0xff] }
 0x916   :  { %4310 = vmatprep.subr.bf16.mxu0 %v9185_v21  ;;  %4353 = vmatprep.subr.bf16.mxu1 %v9188_v29  ;;  %v3477_v49 = vrot.slane %v3460_v0, %v11617_v27 }
 0x919   :  { %4311 = vmatpush2.bf16.msra.mxu0 %v9183_v2  ;;  %4354 = vmatpush2.bf16.msra.mxu1 %v9186_v16  ;;  %v11618_v16 = vld [vmem:[#allocation29_spill] sm:$0xff] }
 0x91a   :  { %4312 = vmatprep.subr.bf16.mxu0 %v9191_v13  ;;  %4355 = vmatprep.subr.bf16.mxu1 %v9194_v10  ;;  %v3473_v13 = vrot.slane %v3460_v0, %v11618_v16  ;;  %v9248_v0 = vld [vmem:[#allocation14 + $0x28c] ss:$16 sps:$4 sm:$0xff]  }
 0x91d   :  { %4313 = vmatpush2.bf16.msra.mxu0 %v9189_v14  ;;  %4356 = vmatpush2.bf16.msra.mxu1 %v9192_v60  ;;  %v3126_v60 = vadd.f32 %v3125_v37, %v3082_v53  ;;  %v9233_v37 = vld [vmem:[#allocation14 + $0xcc] ss:$16 sps:$4 sm:$0xff]  }
 0x91e   :  { %4314 = vmatprep.subr.bf16.mxu0 %v9197_v38  ;;  %4357 = vmatprep.subr.bf16.mxu1 %v9200_v19 }
 0x921   :  { %4315 = vmatpush2.bf16.msra.mxu0 %v9195_v15  ;;  %4358 = vmatpush2.bf16.msra.mxu1 %v9198_v26 }
 0x922   :  { %4316 = vmatprep.subr.bf16.mxu0 %v9203_v34  ;;  %4359 = vmatprep.subr.bf16.mxu1 %v9206_v3 }
 0x925   :  { %4317 = vmatpush2.bf16.msra.mxu0 %v9201_v7  ;;  %4360 = vmatpush2.bf16.msra.mxu1 %v9204_v22 }
 0x926   :  { %4318 = vmatprep.subr.bf16.mxu0 %v9209_v55  ;;  %4361 = vmatprep.subr.bf16.mxu1 %v9212_v18 }
 0x929   :  { %4319 = vmatpush2.bf16.msra.mxu0 %v9207_v62  ;;  %4362 = vmatpush2.bf16.msra.mxu1 %v9210_v31 }
 0x92a   :  { %4320 = vmatprep.subr.bf16.mxu0 %v9215_v35  ;;  %4363 = vmatprep.subr.bf16.mxu1 %v9218_v30 }
 0x92d   :  { %4321 = vmatpush2.bf16.msra.mxu0 %v9213_v43  ;;  %4364 = vmatpush2.bf16.msra.mxu1 %v9216_v48 }
 0x92e   :  { %4322 = vmatprep.subr.bf16.mxu0 %v9221_v59  ;;  %4365 = vmatprep.subr.bf16.mxu1 %v9224_v61 }
 0x931   :  { %4323 = vmatpush2.bf16.msra.mxu0 %v9219_v47  ;;  %4366 = vmatpush2.bf16.msra.mxu1 %v9222_v1 }
 0x932   :  { %4378 = vmatprep.subr.bf16.mxu0 %v9227_v63  ;;  %4421 = vmatprep.subr.bf16.mxu1 %v9230_v45 }
 0x935   :  { %v3162_v50 = vpop.f32.mrf.mxu0  ;;  %v3205_v24 = vpop.f32.mrf.mxu1 }
 0x936   :  { %v3206_v51 = vadd.f32 %v3205_v24, %v3162_v50  ;;  %v9236_v50 = vld [vmem:[#allocation14 + $0x2cc] ss:$16 sps:$4 sm:$0xff]   ;;  %v9231_v24 = vld [vmem:[#allocation14 + $0xc8] ss:$16 sps:$4 sm:$0xff]  }
 0x937   :  { %v3164_v32 = vpop.f32.mrf.mxu0  ;;  %v3207_v9 = vpop.f32.mrf.mxu1 }
 0x938   :  { %v3208_v33 = vadd.f32 %v3207_v9, %v3164_v32  ;;  %v9234_v32 = vld [vmem:[#allocation14 + $0x2c8] ss:$16 sps:$4 sm:$0xff]   ;;  %v9239_v9 = vld [vmem:[#allocation14 + $0xac] ss:$16 sps:$4 sm:$0xff]  }
 0x939   :  { %v3166_v25 = vpop.f32.mrf.mxu0  ;;  %v3209_v54 = vpop.f32.mrf.mxu1 }
 0x93a   :  { %v3210_v21 = vadd.f32 %v3209_v54, %v3166_v25  ;;  %v9242_v25 = vld [vmem:[#allocation14 + $0x2ac] ss:$16 sps:$4 sm:$0xff]   ;;  %v9237_v54 = vld [vmem:[#allocation14 + $0xa8] ss:$16 sps:$4 sm:$0xff]  }
 0x93b   :  { %v3168_v52 = vpop.f32.mrf.mxu0  ;;  %v3211_v58 = vpop.f32.mrf.mxu1 }
 0x93c   :  { %v3212_v38 = vadd.f32 %v3211_v58, %v3168_v52  ;;  %v9240_v52 = vld [vmem:[#allocation14 + $0x2a8] ss:$16 sps:$4 sm:$0xff]   ;;  %v9245_v58 = vld [vmem:[#allocation14 + $0x8c] ss:$16 sps:$4 sm:$0xff]  }
 0x9b4   :  { %v3408_v17 = vpop.f32.mrf.mxu0  ;;  %v3451_v5 = vpop.f32.mrf.mxu1 }
 0x9b5   :  { %v3409_v29 = vadd.f32 %v3408_v17, %v3120_v56  ;;  %v3452_v2 = vadd.f32 %v3451_v5, %v3206_v51  ;;  %v9243_v17 = vld [vmem:[#allocation14 + $0x88] ss:$16 sps:$4 sm:$0xff]   ;;  %v9257_v51 = vld [vmem:[#allocation14 + $0x4c] ss:$16 sps:$4 sm:$0xff]  }
 0x9b6   :  { %v3410_v6 = vpop.f32.mrf.mxu0  ;;  %v3453_v39 = vpop.f32.mrf.mxu1  ;;  %v9246_v5 = vld [vmem:[#allocation14 + $0x288] ss:$16 sps:$4 sm:$0xff]  }
 0x9b7   :  { %v3411_v57 = vadd.f32 %v3410_v6, %v3122_v40  ;;  %v3454_v11 = vadd.f32 %v3453_v39, %v3208_v33  ;;  %v3482_v18 = vadd.f32 %v3465_v41, %v3409_v29  ;;  %v3484_v62 = vadd.f32 %v3473_v13, %v3452_v2  ;;  %v9251_v40 = vld [vmem:[#allocation14 + $0x6c] ss:$16 sps:$4 sm:$0xff]   ;;  %v9249_v56 = vld [vmem:[#allocation14 + $0x68] ss:$16 sps:$4 sm:$0xff]  }
 0x9b8   :  { %v3412_v10 = vpop.f32.mrf.mxu0  ;;  %v3455_v14 = vpop.f32.mrf.mxu1  ;;  %v9254_v33 = vld [vmem:[#allocation14 + $0x26c] ss:$16 sps:$4 sm:$0xff]   ;;  %v9255_v6 = vld [vmem:[#allocation14 + $0x48] ss:$16 sps:$4 sm:$0xff]  }
 0x9b9   :  { %v3413_v19 = vadd.f32 %v3412_v10, %v3124_v20  ;;  %v3456_v15 = vadd.f32 %v3455_v14, %v3210_v21  ;;  %v3483_v3 = vadd.f32 %v3469_v23, %v3411_v57  ;;  %v3485_v7 = vadd.f32 %v3477_v49, %v3454_v11  ;;  %v9252_v20 = vld [vmem:[#allocation14 + $0x268] ss:$16 sps:$4 sm:$0xff]   ;;  %v9263_v57 = vld [vmem:[#allocation14 + $0x2c] ss:$16 sps:$4 sm:$0xff]  }
 0x9ba   :  { %v3414_v26 = vpop.f32.mrf.mxu0  ;;  %v3457_v34 = vpop.f32.mrf.mxu1  ;;  %v3490_v45 = vmax.f32 %v3482_v18, 0.0  ;;  %v3492_v8 = vmax.f32 %v3484_v62, 0.0  ;;  %v9258_v39 = vld [vmem:[#allocation14 + $0x248] ss:$16 sps:$4 sm:$0xff]   ;;  %v9269_v21 = vld [vmem:[#allocation14 + $0xc] ss:$16 sps:$4 sm:$0xff]  }
 0x9bb   :  { %v3415_v22 = vadd.f32 %v3414_v26, %v3126_v60  ;;  %v3458_v55 = vadd.f32 %v3457_v34, %v3212_v38  ;;  %v3486_v31 = vadd.f32 %v3465_v41, %v3413_v19  ;;  %v3488_v35 = vadd.f32 %v3473_v13, %v3456_v15  ;;  %v9260_v41 = vld [vmem:[#allocation14 + $0x24c] ss:$16 sps:$4 sm:$0xff]   ;;  %v9261_v11 = vld [vmem:[#allocation14 + $0x28] ss:$16 sps:$4 sm:$0xff]  }
 0x9bc   :  { %v3491_v59 = vmax.f32 %v3483_v3, 0.0  ;;  %v3493_v1 = vmax.f32 %v3485_v7, 0.0  ;;  %v9272_v29 = vld [vmem:[#allocation14 + $0x20c] ss:$16 sps:$4 sm:$0xff]   ;;  %v9267_v2 = vld [vmem:[#allocation14 + $0x8] ss:$16 sps:$4 sm:$0xff]  }
 0x9bd   :  { %v3487_v30 = vadd.f32 %v3469_v23, %v3415_v22  ;;  %v3489_v43 = vadd.f32 %v3477_v49, %v3458_v55  ;;  %v3494_v48 = vmax.f32 %v3486_v31, 0.0  ;;  %v3496_v47 = vmax.f32 %v3488_v35, 0.0  ;;  %v9266_v23 = vld [vmem:[#allocation14 + $0x22c] ss:$16 sps:$4 sm:$0xff]   ;;  %v9264_v49 = vld [vmem:[#allocation14 + $0x228] ss:$16 sps:$4 sm:$0xff]  }
 0x9be   :  { %v9270_v13 = vld [vmem:[#allocation14 + $0x208] ss:$16 sps:$4 sm:$0xff]   ;;  %v9275_v10 = vld [vmem:[#allocation14 + $0x1ec] ss:$16 sps:$4 sm:$0xff]  }
 0x9bf   :  { %v3495_v61 = vmax.f32 %v3487_v30, 0.0  ;;  %v3497_v63 = vmax.f32 %v3489_v43, 0.0  ;;  %v11434_v44 = vpack.c.bf16 %v3494_v48, %v3490_v45  ;;  %v11436_v53 = vpack.c.bf16 %v3496_v47, %v3492_v8  ;;  %v9278_v14 = vld [vmem:[#allocation14 + $0x3ec] ss:$16 sps:$4 sm:$0xff]   ;;  %v9273_v60 = vld [vmem:[#allocation14 + $0x1e8] ss:$16 sps:$4 sm:$0xff]  }
 0x9c0   :  { %v9276_v38 = vld [vmem:[#allocation14 + $0x3e8] ss:$16 sps:$4 sm:$0xff]   ;;  %v9281_v19 = vld [vmem:[#allocation14 + $0x1cc] ss:$16 sps:$4 sm:$0xff]  }
 0x9c1   :  { %v3499_v28 = vpack.c.bf16 %v3495_v61, %v3491_v59  ;;  %v3501_v4 = vpack.c.bf16 %v3497_v63, %v3493_v1  ;;  %v9284_v15 = vld [vmem:[#allocation14 + $0x3cc] ss:$16 sps:$4 sm:$0xff]   ;;  %v9279_v26 = vld [vmem:[#allocation14 + $0x1c8] ss:$16 sps:$4 sm:$0xff]  }
 0x9c2   :  { %v9282_v34 = vld [vmem:[#allocation14 + $0x3c8] ss:$16 sps:$4 sm:$0xff]   ;;  %v9287_v3 = vld [vmem:[#allocation14 + $0x1ac] ss:$16 sps:$4 sm:$0xff]  }
 0x9c3   :  { %4324 = vmatprep.mubr.bf16.mxu0 %v3499_v28  ;;  %4367 = vmatprep.mubr.bf16.mxu1 %v3501_v4  ;;  %v9290_v7 = vld [vmem:[#allocation14 + $0x3ac] ss:$16 sps:$4 sm:$0xff]   ;;  %v9285_v22 = vld [vmem:[#allocation14 + $0x1a8] ss:$16 sps:$4 sm:$0xff]  }
 0x9c4   :  { %4325 = vmatmul.mubr.bf16.vlgmr.msra.gmra.mxu0 %v11434_v44  ;;  %4368 = vmatmul.mubr.bf16.vlgmr.msra.gmra.mxu1 %v11436_v53  ;;  %v9288_v55 = vld [vmem:[#allocation14 + $0x3a8] ss:$16 sps:$4 sm:$0xff]   ;;  %v9293_v18 = vld [vmem:[#allocation14 + $0x18c] ss:$16 sps:$4 sm:$0xff]  }
 0x9c5   :  { %4379 = vmatpush1.bf16.msra.mxu0 %v9225_v12  ;;  %4422 = vmatpush1.bf16.msra.mxu1 %v9228_v46  ;;  %v9296_v62 = vld [vmem:[#allocation14 + $0x38c] ss:$16 sps:$4 sm:$0xff]   ;;  %v9291_v31 = vld [vmem:[#allocation14 + $0x188] ss:$16 sps:$4 sm:$0xff]  }
 0x9c6   :  { %4410 = vmatprep.mubr.bf16.mxu0 %v3499_v28  ;;  %4453 = vmatprep.mubr.bf16.mxu1 %v3501_v4  ;;  %v9294_v35 = vld [vmem:[#allocation14 + $0x388] ss:$16 sps:$4 sm:$0xff]   ;;  %v9299_v30 = vld [vmem:[#allocation14 + $0x16c] ss:$16 sps:$4 sm:$0xff]  }
 0x9c7   :  { %4380 = vmatprep.subr.bf16.mxu0 %v9233_v37  ;;  %4423 = vmatprep.subr.bf16.mxu1 %v9236_v50  ;;  %v9302_v43 = vld [vmem:[#allocation14 + $0x36c] ss:$16 sps:$4 sm:$0xff]   ;;  %v9297_v48 = vld [vmem:[#allocation14 + $0x168] ss:$16 sps:$4 sm:$0xff]  }
 0x9c8   :  { %v9300_v47 = vld [vmem:[#allocation14 + $0x368] ss:$16 sps:$4 sm:$0xff]   ;;  %v9305_v59 = vld [vmem:[#allocation14 + $0x14c] ss:$16 sps:$4 sm:$0xff]  }
 0x9c9   :  { %4381 = vmatpush1.bf16.msra.mxu0 %v9231_v24  ;;  %4424 = vmatpush1.bf16.msra.mxu1 %v9234_v32  ;;  %v9308_v1 = vld [vmem:[#allocation14 + $0x34c] ss:$16 sps:$4 sm:$0xff]   ;;  %v9303_v61 = vld [vmem:[#allocation14 + $0x148] ss:$16 sps:$4 sm:$0xff]   ;;  %v9323_v24 = vld [vmem:[#allocation14 + $0x4e4] ss:$16 sps:$4 sm:$0xff]  }
 0x9ca   :  { %4382 = vmatprep.subr.bf16.mxu0 %v9239_v9  ;;  %4425 = vmatprep.subr.bf16.mxu1 %v9242_v25  ;;  %v9306_v63 = vld [vmem:[#allocation14 + $0x348] ss:$16 sps:$4 sm:$0xff]   ;;  %v9311_v45 = vld [vmem:[#allocation14 + $0x12c] ss:$16 sps:$4 sm:$0xff]   ;;  %v9321_v32 = vld [vmem:[#allocation14 + $0x4e0] ss:$16 sps:$4 sm:$0xff]  }
 0x9cb   :  { %v9314_v8 = vld [vmem:[#allocation14 + $0x32c] ss:$16 sps:$4 sm:$0xff]   ;;  %v9309_v28 = vld [vmem:[#allocation14 + $0x128] ss:$16 sps:$4 sm:$0xff]   ;;  %v9326_v9 = vld [vmem:[#allocation14 + $0x4c4] ss:$16 sps:$4 sm:$0xff]  }
 0x9cc   :  { %v9312_v4 = vld [vmem:[#allocation14 + $0x328] ss:$16 sps:$4 sm:$0xff]   ;;  %v9317_v12 = vld [vmem:[#allocation14 + $0x10c] ss:$16 sps:$4 sm:$0xff]   ;;  %v9324_v25 = vld [vmem:[#allocation14 + $0x4c0] ss:$16 sps:$4 sm:$0xff]  }
 0x9cd   :  { %4383 = vmatpush1.bf16.msra.mxu0 %v9237_v54  ;;  %4426 = vmatpush1.bf16.msra.mxu1 %v9240_v52  ;;  %v9320_v46 = vld [vmem:[#allocation14 + $0x30c] ss:$16 sps:$4 sm:$0xff]   ;;  %v9315_v37 = vld [vmem:[#allocation14 + $0x108] ss:$16 sps:$4 sm:$0xff]   ;;  %v9329_v54 = vld [vmem:[#allocation14 + $0x4a4] ss:$16 sps:$4 sm:$0xff]  }
 0x9ce   :  { %4384 = vmatprep.subr.bf16.mxu0 %v9245_v58  ;;  %4427 = vmatprep.subr.bf16.mxu1 %v9248_v0  ;;  %v9318_v50 = vld [vmem:[#allocation14 + $0x308] ss:$16 sps:$4 sm:$0xff]   ;;  %v9327_v52 = vld [vmem:[#allocation14 + $0x4a0] ss:$16 sps:$4 sm:$0xff]   ;;  %v9332_v58 = vld [vmem:[#allocation14 + $0x484] ss:$16 sps:$4 sm:$0xff]  }
 0x9cf   :  { %v9330_v0 = vld [vmem:[#allocation14 + $0x480] ss:$16 sps:$4 sm:$0xff]  }
 0x9d1   :  { %4385 = vmatpush1.bf16.msra.mxu0 %v9243_v17  ;;  %4428 = vmatpush1.bf16.msra.mxu1 %v9246_v5  ;;  %v9335_v17 = vld [vmem:[#allocation14 + $0x464] ss:$16 sps:$4 sm:$0xff]   ;;  %v9333_v5 = vld [vmem:[#allocation14 + $0x460] ss:$16 sps:$4 sm:$0xff]  }
 0x9d2   :  { %4386 = vmatprep.subr.bf16.mxu0 %v9251_v40  ;;  %4429 = vmatprep.subr.bf16.mxu1 %v9254_v33  ;;  %v9369_v40 = vld [vmem:[#allocation14 + $0x6e0] ss:$16 sps:$4 sm:$0xff]   ;;  %v9371_v33 = vld [vmem:[#allocation14 + $0x6e4] ss:$16 sps:$4 sm:$0xff]  }
 0x9d5   :  { %4387 = vmatpush1.bf16.msra.mxu0 %v9249_v56  ;;  %4430 = vmatpush1.bf16.msra.mxu1 %v9252_v20  ;;  %v9375_v56 = vld [vmem:[#allocation14 + $0x6c0] ss:$16 sps:$4 sm:$0xff]   ;;  %v9377_v20 = vld [vmem:[#allocation14 + $0x6c4] ss:$16 sps:$4 sm:$0xff]  }
 0x9d6   :  { %4388 = vmatprep.subr.bf16.mxu0 %v9257_v51  ;;  %4431 = vmatprep.subr.bf16.mxu1 %v9260_v41  ;;  %v9341_v51 = vld [vmem:[#allocation14 + $0x424] ss:$16 sps:$4 sm:$0xff]   ;;  %v9339_v41 = vld [vmem:[#allocation14 + $0x420] ss:$16 sps:$4 sm:$0xff]  }
 0x9d9   :  { %4389 = vmatpush1.bf16.msra.mxu0 %v9255_v6  ;;  %4432 = vmatpush1.bf16.msra.mxu1 %v9258_v39  ;;  %v9381_v6 = vld [vmem:[#allocation14 + $0x6a0] ss:$16 sps:$4 sm:$0xff]   ;;  %v9383_v39 = vld [vmem:[#allocation14 + $0x6a4] ss:$16 sps:$4 sm:$0xff]  }
 0x9da   :  { %4390 = vmatprep.subr.bf16.mxu0 %v9263_v57  ;;  %4433 = vmatprep.subr.bf16.mxu1 %v9266_v23  ;;  %v9344_v57 = vld [vmem:[#allocation14 + $0x404] ss:$16 sps:$4 sm:$0xff]   ;;  %v9342_v23 = vld [vmem:[#allocation14 + $0x400] ss:$16 sps:$4 sm:$0xff]  }
 0x9dd   :  { %4391 = vmatpush1.bf16.msra.mxu0 %v9261_v11  ;;  %4434 = vmatpush1.bf16.msra.mxu1 %v9264_v49  ;;  %v9387_v11 = vld [vmem:[#allocation14 + $0x680] ss:$16 sps:$4 sm:$0xff]   ;;  %v9389_v49 = vld [vmem:[#allocation14 + $0x684] ss:$16 sps:$4 sm:$0xff]  }
 0x9de   :  { %4392 = vmatprep.subr.bf16.mxu0 %v9269_v21  ;;  %4435 = vmatprep.subr.bf16.mxu1 %v9272_v29  ;;  %v9347_v21 = vld [vmem:[#allocation14 + $0x5e4] ss:$16 sps:$4 sm:$0xff]   ;;  %v9345_v29 = vld [vmem:[#allocation14 + $0x5e0] ss:$16 sps:$4 sm:$0xff]  }
 0x9e1   :  { %4393 = vmatpush1.bf16.msra.mxu0 %v9267_v2  ;;  %4436 = vmatpush1.bf16.msra.mxu1 %v9270_v13  ;;  %v9393_v2 = vld [vmem:[#allocation14 + $0x660] ss:$16 sps:$4 sm:$0xff]   ;;  %v9395_v13 = vld [vmem:[#allocation14 + $0x664] ss:$16 sps:$4 sm:$0xff]  }
 0x9e2   :  { %4394 = vmatprep.subr.bf16.mxu0 %v9275_v10  ;;  %4437 = vmatprep.subr.bf16.mxu1 %v9278_v14  ;;  %v9350_v10 = vld [vmem:[#allocation14 + $0x5c4] ss:$16 sps:$4 sm:$0xff]   ;;  %v9348_v14 = vld [vmem:[#allocation14 + $0x5c0] ss:$16 sps:$4 sm:$0xff]  }
 0x9e5   :  { %4395 = vmatpush2.bf16.msra.mxu0 %v9273_v60  ;;  %4438 = vmatpush2.bf16.msra.mxu1 %v9276_v38  ;;  %v9399_v60 = vld [vmem:[#allocation14 + $0x640] ss:$16 sps:$4 sm:$0xff]   ;;  %v9401_v38 = vld [vmem:[#allocation14 + $0x644] ss:$16 sps:$4 sm:$0xff]  }
 0x9e6   :  { %4396 = vmatprep.subr.bf16.mxu0 %v9281_v19  ;;  %4439 = vmatprep.subr.bf16.mxu1 %v9284_v15  ;;  %v9353_v19 = vld [vmem:[#allocation14 + $0x5a4] ss:$16 sps:$4 sm:$0xff]   ;;  %v9351_v15 = vld [vmem:[#allocation14 + $0x5a0] ss:$16 sps:$4 sm:$0xff]  }
 0x9e9   :  { %4397 = vmatpush2.bf16.msra.mxu0 %v9279_v26  ;;  %4440 = vmatpush2.bf16.msra.mxu1 %v9282_v34  ;;  %v9405_v26 = vld [vmem:[#allocation14 + $0x620] ss:$16 sps:$4 sm:$0xff]   ;;  %v9407_v34 = vld [vmem:[#allocation14 + $0x624] ss:$16 sps:$4 sm:$0xff]  }
 0x9ea   :  { %4398 = vmatprep.subr.bf16.mxu0 %v9287_v3  ;;  %4441 = vmatprep.subr.bf16.mxu1 %v9290_v7  ;;  %v9356_v3 = vld [vmem:[#allocation14 + $0x584] ss:$16 sps:$4 sm:$0xff]   ;;  %v9354_v7 = vld [vmem:[#allocation14 + $0x580] ss:$16 sps:$4 sm:$0xff]  }
 0x9ed   :  { %4399 = vmatpush2.bf16.msra.mxu0 %v9285_v22  ;;  %4442 = vmatpush2.bf16.msra.mxu1 %v9288_v55  ;;  %v9411_v22 = vld [vmem:[#allocation14 + $0x600] ss:$16 sps:$4 sm:$0xff]   ;;  %v9413_v55 = vld [vmem:[#allocation14 + $0x604] ss:$16 sps:$4 sm:$0xff]  }
 0x9ee   :  { %4400 = vmatprep.subr.bf16.mxu0 %v9293_v18  ;;  %4443 = vmatprep.subr.bf16.mxu1 %v9296_v62  ;;  %v9359_v18 = vld [vmem:[#allocation14 + $0x564] ss:$16 sps:$4 sm:$0xff]   ;;  %v9357_v62 = vld [vmem:[#allocation14 + $0x560] ss:$16 sps:$4 sm:$0xff]  }
 0x9f1   :  { %4401 = vmatpush2.bf16.msra.mxu0 %v9291_v31  ;;  %4444 = vmatpush2.bf16.msra.mxu1 %v9294_v35  ;;  %v9417_v31 = vld [vmem:[#allocation14 + $0x7e0] ss:$16 sps:$4 sm:$0xff]   ;;  %v9419_v35 = vld [vmem:[#allocation14 + $0x7e4] ss:$16 sps:$4 sm:$0xff]  }
 0x9f2   :  { %4402 = vmatprep.subr.bf16.mxu0 %v9299_v30  ;;  %4445 = vmatprep.subr.bf16.mxu1 %v9302_v43  ;;  %v9362_v30 = vld [vmem:[#allocation14 + $0x544] ss:$16 sps:$4 sm:$0xff]   ;;  %v9360_v43 = vld [vmem:[#allocation14 + $0x540] ss:$16 sps:$4 sm:$0xff]  }
 0x9f5   :  { %4403 = vmatpush2.bf16.msra.mxu0 %v9297_v48  ;;  %4446 = vmatpush2.bf16.msra.mxu1 %v9300_v47  ;;  %v9423_v48 = vld [vmem:[#allocation14 + $0x7c0] ss:$16 sps:$4 sm:$0xff]   ;;  %v9425_v47 = vld [vmem:[#allocation14 + $0x7c4] ss:$16 sps:$4 sm:$0xff]  }
 0x9f6   :  { %4404 = vmatprep.subr.bf16.mxu0 %v9305_v59  ;;  %4447 = vmatprep.subr.bf16.mxu1 %v9308_v1  ;;  %v9365_v59 = vld [vmem:[#allocation14 + $0x524] ss:$16 sps:$4 sm:$0xff]   ;;  %v9363_v1 = vld [vmem:[#allocation14 + $0x520] ss:$16 sps:$4 sm:$0xff]  }
 0x9f9   :  { %4405 = vmatpush2.bf16.msra.mxu0 %v9303_v61  ;;  %4448 = vmatpush2.bf16.msra.mxu1 %v9306_v63  ;;  %v9429_v61 = vld [vmem:[#allocation14 + $0x7a0] ss:$16 sps:$4 sm:$0xff]   ;;  %v9431_v63 = vld [vmem:[#allocation14 + $0x7a4] ss:$16 sps:$4 sm:$0xff]  }
 0x9fa   :  { %4406 = vmatprep.subr.bf16.mxu0 %v9311_v45  ;;  %4449 = vmatprep.subr.bf16.mxu1 %v9314_v8  ;;  %v9368_v45 = vld [vmem:[#allocation14 + $0x504] ss:$16 sps:$4 sm:$0xff]   ;;  %v9366_v8 = vld [vmem:[#allocation14 + $0x500] ss:$16 sps:$4 sm:$0xff]  }
 0x9fd   :  { %4407 = vmatpush2.bf16.msra.mxu0 %v9309_v28  ;;  %4450 = vmatpush2.bf16.msra.mxu1 %v9312_v4  ;;  %v9435_v28 = vld [vmem:[#allocation14 + $0x780] ss:$16 sps:$4 sm:$0xff]   ;;  %v9437_v4 = vld [vmem:[#allocation14 + $0x784] ss:$16 sps:$4 sm:$0xff]  }
 0x9fe   :  { %4408 = vmatprep.subr.bf16.mxu0 %v9317_v12  ;;  %4451 = vmatprep.subr.bf16.mxu1 %v9320_v46  ;;  %v9374_v12 = vld [vmem:[#allocation14 + $0x4ec] ss:$16 sps:$4 sm:$0xff]   ;;  %v9441_v46 = vld [vmem:[#allocation14 + $0x760] ss:$16 sps:$4 sm:$0xff]  }
 0xa01   :  { %4409 = vmatpush2.bf16.msra.mxu0 %v9315_v37  ;;  %4452 = vmatpush2.bf16.msra.mxu1 %v9318_v50  ;;  %v9443_v37 = vld [vmem:[#allocation14 + $0x764] ss:$16 sps:$4 sm:$0xff]  }
 0xa02   :  { %5268 = vmatprep.subr.bf16.mxu0 %v9323_v24  ;;  %5311 = vmatprep.subr.bf16.mxu1 %v9371_v33  ;;  %v9449_v50 = vld [vmem:[#allocation14 + $0x744] ss:$16 sps:$4 sm:$0xff]   ;;  %v9447_v24 = vld [vmem:[#allocation14 + $0x740] ss:$16 sps:$4 sm:$0xff]  }
 0xa04   :  { %4411 = vmatmul.mubr.bf16.vlgmr.msra.gmra.mxu0 %v11434_v44  ;;  %4454 = vmatmul.mubr.bf16.vlgmr.msra.gmra.mxu1 %v11436_v53  ;;  %v9338_v44 = vld [vmem:[#allocation14 + $0x444] ss:$16 sps:$4 sm:$0xff]   ;;  %v9336_v53 = vld [vmem:[#allocation14 + $0x440] ss:$16 sps:$4 sm:$0xff]  }
 0xa05   :  { %5269 = vmatpush1.bf16.msra.mxu0 %v9321_v32  ;;  %5312 = vmatpush1.bf16.msra.mxu1 %v9369_v40  ;;  %v9455_v32 = vld [vmem:[#allocation14 + $0x724] ss:$16 sps:$4 sm:$0xff]  }
 0xa06   :  { %5270 = vmatprep.subr.bf16.mxu0 %v9326_v9  ;;  %5313 = vmatprep.subr.bf16.mxu1 %v9377_v20  ;;  %v9453_v9 = vld [vmem:[#allocation14 + $0x720] ss:$16 sps:$4 sm:$0xff]  }
 0xa09   :  { %5271 = vmatpush1.bf16.msra.mxu0 %v9324_v25  ;;  %5314 = vmatpush1.bf16.msra.mxu1 %v9375_v56  ;;  %v9461_v25 = vld [vmem:[#allocation14 + $0x704] ss:$16 sps:$4 sm:$0xff]  }
 0xa0a   :  { %5272 = vmatprep.subr.bf16.mxu0 %v9329_v54  ;;  %5315 = vmatprep.subr.bf16.mxu1 %v9383_v39  ;;  %v9459_v54 = vld [vmem:[#allocation14 + $0x700] ss:$16 sps:$4 sm:$0xff]  }
 0xa0d   :  { %5273 = vmatpush1.bf16.msra.mxu0 %v9327_v52  ;;  %5316 = vmatpush1.bf16.msra.mxu1 %v9381_v6  ;;  %v9467_v52 = vld [vmem:[#allocation14 + $0x6ec] ss:$16 sps:$4 sm:$0xff]  }
 0xa0e   :  { %5274 = vmatprep.subr.bf16.mxu0 %v9332_v58  ;;  %5317 = vmatprep.subr.bf16.mxu1 %v9389_v49  ;;  %v11442_v58 = vld [vmem:[#allocation16] ss:$4 sm:$0xf] }
 0xa11   :  { %5275 = vmatpush1.bf16.msra.mxu0 %v9330_v0  ;;  %5318 = vmatpush1.bf16.msra.mxu1 %v9387_v11  ;;  %v3639_v0 = vrot.slane %v11442_v58, %v11616_v42 }
 0xa12   :  { %5276 = vmatprep.subr.bf16.mxu0 %v9335_v17  ;;  %5319 = vmatprep.subr.bf16.mxu1 %v9395_v13  ;;  %v3635_v17 = vrot.slane %v11442_v58, %v11615_v36 }
 0xa15   :  { %5277 = vmatpush1.bf16.msra.mxu0 %v9333_v5  ;;  %5320 = vmatpush1.bf16.msra.mxu1 %v9393_v2 }
 0xa16   :  { %5278 = vmatprep.subr.bf16.mxu0 %v9338_v44  ;;  %5321 = vmatprep.subr.bf16.mxu1 %v9401_v38 }
 0xa19   :  { %5279 = vmatpush1.bf16.msra.mxu0 %v9336_v53  ;;  %5322 = vmatpush1.bf16.msra.mxu1 %v9399_v60  ;;  %v9372_v60 = vld [vmem:[#allocation14 + $0x4e8] ss:$16 sps:$4 sm:$0xff]  }
 0xa1a   :  { %5280 = vmatprep.subr.bf16.mxu0 %v9341_v51  ;;  %5323 = vmatprep.subr.bf16.mxu1 %v9407_v34  ;;  %v9384_v34 = vld [vmem:[#allocation14 + $0x4a8] ss:$16 sps:$4 sm:$0xff]  }
 0xa1d   :  { %5281 = vmatpush1.bf16.msra.mxu0 %v9339_v41  ;;  %5324 = vmatpush1.bf16.msra.mxu1 %v9405_v26  ;;  %v9386_v26 = vld [vmem:[#allocation14 + $0x4ac] ss:$16 sps:$4 sm:$0xff]  }
 0xa1e   :  { %5282 = vmatprep.subr.bf16.mxu0 %v9344_v57  ;;  %5325 = vmatprep.subr.bf16.mxu1 %v9413_v55  ;;  %v9396_v55 = vld [vmem:[#allocation14 + $0x468] ss:$16 sps:$4 sm:$0xff]  }
 0xa21   :  { %5283 = vmatpush1.bf16.msra.mxu0 %v9342_v23  ;;  %5326 = vmatpush1.bf16.msra.mxu1 %v9411_v22  ;;  %v9398_v22 = vld [vmem:[#allocation14 + $0x46c] ss:$16 sps:$4 sm:$0xff]  }
 0xa22   :  { %5284 = vmatprep.subr.bf16.mxu0 %v9347_v21  ;;  %5327 = vmatprep.subr.bf16.mxu1 %v9419_v35  ;;  %v9408_v35 = vld [vmem:[#allocation14 + $0x428] ss:$16 sps:$4 sm:$0xff]  }
 0xa25   :  { %5285 = vmatpush2.bf16.msra.mxu0 %v9345_v29  ;;  %5328 = vmatpush2.bf16.msra.mxu1 %v9417_v31  ;;  %v9410_v31 = vld [vmem:[#allocation14 + $0x42c] ss:$16 sps:$4 sm:$0xff]  }
 0xa26   :  { %5286 = vmatprep.subr.bf16.mxu0 %v9350_v10  ;;  %5329 = vmatprep.subr.bf16.mxu1 %v9425_v47  ;;  %v9420_v47 = vld [vmem:[#allocation14 + $0x5e8] ss:$16 sps:$4 sm:$0xff]  }
 0xa29   :  { %5287 = vmatpush2.bf16.msra.mxu0 %v9348_v14  ;;  %5330 = vmatpush2.bf16.msra.mxu1 %v9423_v48  ;;  %v9422_v48 = vld [vmem:[#allocation14 + $0x5ec] ss:$16 sps:$4 sm:$0xff]  }
 0xa2a   :  { %5288 = vmatprep.subr.bf16.mxu0 %v9353_v19  ;;  %5331 = vmatprep.subr.bf16.mxu1 %v9431_v63  ;;  %v9380_v19 = vld [vmem:[#allocation14 + $0x4cc] ss:$16 sps:$4 sm:$0xff]   ;;  %v9432_v63 = vld [vmem:[#allocation14 + $0x5a8] ss:$16 sps:$4 sm:$0xff]  }
 0xa2d   :  { %5289 = vmatpush2.bf16.msra.mxu0 %v9351_v15  ;;  %5332 = vmatpush2.bf16.msra.mxu1 %v9429_v61  ;;  %v9378_v15 = vld [vmem:[#allocation14 + $0x4c8] ss:$16 sps:$4 sm:$0xff]   ;;  %v9434_v61 = vld [vmem:[#allocation14 + $0x5ac] ss:$16 sps:$4 sm:$0xff]  }
 0xa2e   :  { %5290 = vmatprep.subr.bf16.mxu0 %v9356_v3  ;;  %5333 = vmatprep.subr.bf16.mxu1 %v9437_v4  ;;  %v9392_v3 = vld [vmem:[#allocation14 + $0x48c] ss:$16 sps:$4 sm:$0xff]   ;;  %v9444_v4 = vld [vmem:[#allocation14 + $0x568] ss:$16 sps:$4 sm:$0xff]  }
 0xa31   :  { %5291 = vmatpush2.bf16.msra.mxu0 %v9354_v7  ;;  %5334 = vmatpush2.bf16.msra.mxu1 %v9435_v28  ;;  %v9390_v7 = vld [vmem:[#allocation14 + $0x488] ss:$16 sps:$4 sm:$0xff]   ;;  %v9446_v28 = vld [vmem:[#allocation14 + $0x56c] ss:$16 sps:$4 sm:$0xff]  }
 0xa32   :  { %5292 = vmatprep.subr.bf16.mxu0 %v9359_v18  ;;  %5335 = vmatprep.subr.bf16.mxu1 %v9443_v37  ;;  %v9404_v18 = vld [vmem:[#allocation14 + $0x44c] ss:$16 sps:$4 sm:$0xff]   ;;  %v3643_v37 = vrot.slane %v11442_v58, %v11618_v16 }
 0xa35   :  { %5293 = vmatpush2.bf16.msra.mxu0 %v9357_v62  ;;  %5336 = vmatpush2.bf16.msra.mxu1 %v9441_v46  ;;  %v9402_v62 = vld [vmem:[#allocation14 + $0x448] ss:$16 sps:$4 sm:$0xff]   ;;  %v3647_v46 = vrot.slane %v11442_v58, %v11617_v27 }
 0xa36   :  { %5294 = vmatprep.subr.bf16.mxu0 %v9362_v30  ;;  %5337 = vmatprep.subr.bf16.mxu1 %v9449_v50  ;;  %v9416_v30 = vld [vmem:[#allocation14 + $0x40c] ss:$16 sps:$4 sm:$0xff]  }
 0xa39   :  { %5295 = vmatpush2.bf16.msra.mxu0 %v9360_v43  ;;  %5338 = vmatpush2.bf16.msra.mxu1 %v9447_v24  ;;  %v9414_v43 = vld [vmem:[#allocation14 + $0x408] ss:$16 sps:$4 sm:$0xff]  }
 0xa3a   :  { %5296 = vmatprep.subr.bf16.mxu0 %v9365_v59  ;;  %5339 = vmatprep.subr.bf16.mxu1 %v9455_v32  ;;  %v9428_v59 = vld [vmem:[#allocation14 + $0x5cc] ss:$16 sps:$4 sm:$0xff]   ;;  %v9450_v32 = vld [vmem:[#allocation14 + $0x548] ss:$16 sps:$4 sm:$0xff]  }
 0xa3d   :  { %5297 = vmatpush2.bf16.msra.mxu0 %v9363_v1  ;;  %5340 = vmatpush2.bf16.msra.mxu1 %v9453_v9  ;;  %v9426_v1 = vld [vmem:[#allocation14 + $0x5c8] ss:$16 sps:$4 sm:$0xff]  }
 0xa3e   :  { %5298 = vmatprep.subr.bf16.mxu0 %v9368_v45  ;;  %5341 = vmatprep.subr.bf16.mxu1 %v9461_v25  ;;  %v9440_v45 = vld [vmem:[#allocation14 + $0x58c] ss:$16 sps:$4 sm:$0xff]  }
 0xa41   :  { %5299 = vmatpush2.bf16.msra.mxu0 %v9366_v8  ;;  %5342 = vmatpush2.bf16.msra.mxu1 %v9459_v54  ;;  %v9438_v8 = vld [vmem:[#allocation14 + $0x588] ss:$16 sps:$4 sm:$0xff]   ;;  %v9458_v54 = vld [vmem:[#allocation14 + $0x52c] ss:$16 sps:$4 sm:$0xff]  }
 0xa42   :  { %5354 = vmatprep.subr.bf16.mxu0 %v9374_v12  ;;  %5397 = vmatprep.subr.bf16.mxu1 %v9467_v52  ;;  %v9452_v12 = vld [vmem:[#allocation14 + $0x54c] ss:$16 sps:$4 sm:$0xff]  }
 0xa84   :  { %v4326_v5 = vpop.f32.mrf.mxu0  ;;  %v4369_v40 = vpop.f32.mrf.mxu1 }
 0xa85   :  { %v4327_v56 = vadd.f32 %v4326_v5, %v3635_v17 }
 0xa86   :  { %v4328_v33 = vpop.f32.mrf.mxu0  ;;  %v4371_v44 = vpop.f32.mrf.mxu1 }
 0xa87   :  { %v4329_v53 = vadd.f32 %v4328_v33, %v3639_v0  ;;  %v4370_v11 = vadd.f32 %v4369_v40, %v4327_v56  ;;  %v9456_v33 = vld [vmem:[#allocation14 + $0x528] ss:$16 sps:$4 sm:$0xff]  }
 0xa88   :  { %v4330_v20 = vpop.f32.mrf.mxu0  ;;  %v4373_v51 = vpop.f32.mrf.mxu1 }
 0xa89   :  { %v4331_v41 = vadd.f32 %v4330_v20, %v3635_v17  ;;  %v4372_v39 = vadd.f32 %v4371_v44, %v4329_v53  ;;  %v4464_v10 = vmax.f32 %v4370_v11, 0.0  ;;  %v9464_v53 = vld [vmem:[#allocation14 + $0x50c] ss:$16 sps:$4 sm:$0xff]  }
 0xa8a   :  { %v4332_v6 = vpop.f32.mrf.mxu0  ;;  %v4375_v49 = vpop.f32.mrf.mxu1 }
 0xa8b   :  { %v4374_v57 = vadd.f32 %v4373_v51, %v4331_v41  ;;  %v4333_v23 = vadd.f32 %v4332_v6, %v3639_v0  ;;  %v4465_v2 = vmax.f32 %v4372_v39, 0.0  ;;  %v9462_v39 = vld [vmem:[#allocation14 + $0x508] ss:$16 sps:$4 sm:$0xff]  }
 0xa8d   :  { %v4376_v21 = vadd.f32 %v4375_v49, %v4333_v23  ;;  %v4468_v29 = vmax.f32 %v4374_v57, 0.0 }
 0xa8f   :  { %v4469_v13 = vmax.f32 %v4376_v21, 0.0  ;;  %v11448_v38 = vpack.c.bf16 %v4468_v29, %v4464_v10  ;;  %v9465_v29 = vld [vmem:[#allocation14 + $0x6e8] ss:$16 sps:$4 sm:$0xff]  }
 0xa90   :  { %v9468_v10 = vld [vmem:[#allocation14 + $0x6c8] ss:$16 sps:$4 sm:$0xff]  }
 0xa91   :  { %v4473_v14 = vpack.c.bf16 %v4469_v13, %v4465_v2  ;;  %v9470_v13 = vld [vmem:[#allocation14 + $0x6cc] ss:$16 sps:$4 sm:$0xff]  }
 0xa93   :  { %5300 = vmatprep.mubr.bf16.mxu0 %v4473_v14 }
 0xa94   :  { %5301 = vmatmul.mubr.bf16.vlgmr.msra.gmra.mxu0 %v11448_v38 }
 0xa95   :  { %5355 = vmatpush1.bf16.msra.mxu0 %v9372_v60  ;;  %5386 = vmatprep.mubr.bf16.mxu0 %v4473_v14  ;;  %v9473_v14 = vld [vmem:[#allocation14 + $0x6ac] ss:$16 sps:$4 sm:$0xff]   ;;  %v9471_v60 = vld [vmem:[#allocation14 + $0x6a8] ss:$16 sps:$4 sm:$0xff]  }
 0xa96   :  { %5356 = vmatprep.subr.bf16.mxu0 %v9380_v19  ;;  %v9476_v19 = vld [vmem:[#allocation14 + $0x68c] ss:$16 sps:$4 sm:$0xff]  }
 0xa99   :  { %5357 = vmatpush1.bf16.msra.mxu0 %v9378_v15  ;;  %v9513_v15 = vld [vmem:[#allocation14 + $0x8e0] ss:$16 sps:$4 sm:$0xff]  }
 0xa9a   :  { %5358 = vmatprep.subr.bf16.mxu0 %v9386_v26  ;;  %v9515_v26 = vld [vmem:[#allocation14 + $0x8e4] ss:$16 sps:$4 sm:$0xff]  }
 0xa9d   :  { %5359 = vmatpush1.bf16.msra.mxu0 %v9384_v34  ;;  %v9518_v34 = vld [vmem:[#allocation14 + $0x8c4] ss:$16 sps:$4 sm:$0xff]  }
 0xa9e   :  { %5360 = vmatprep.subr.bf16.mxu0 %v9392_v3  ;;  %v9474_v3 = vld [vmem:[#allocation14 + $0x688] ss:$16 sps:$4 sm:$0xff]  }
 0xaa1   :  { %5361 = vmatpush1.bf16.msra.mxu0 %v9390_v7  ;;  %v9479_v7 = vld [vmem:[#allocation14 + $0x66c] ss:$16 sps:$4 sm:$0xff]  }
 0xaa2   :  { %5362 = vmatprep.subr.bf16.mxu0 %v9398_v22  ;;  %v9516_v22 = vld [vmem:[#allocation14 + $0x8c0] ss:$16 sps:$4 sm:$0xff]  }
 0xaa5   :  { %5363 = vmatpush1.bf16.msra.mxu0 %v9396_v55  ;;  %v9477_v55 = vld [vmem:[#allocation14 + $0x668] ss:$16 sps:$4 sm:$0xff]  }
 0xaa6   :  { %5364 = vmatprep.subr.bf16.mxu0 %v9404_v18  ;;  %v9482_v18 = vld [vmem:[#allocation14 + $0x64c] ss:$16 sps:$4 sm:$0xff]  }
 0xaa9   :  { %5365 = vmatpush1.bf16.msra.mxu0 %v9402_v62  ;;  %v9519_v62 = vld [vmem:[#allocation14 + $0x8a0] ss:$16 sps:$4 sm:$0xff]  }
 0xaaa   :  { %5366 = vmatprep.subr.bf16.mxu0 %v9410_v31  ;;  %v9524_v31 = vld [vmem:[#allocation14 + $0x884] ss:$16 sps:$4 sm:$0xff]  }
 0xaad   :  { %5367 = vmatpush1.bf16.msra.mxu0 %v9408_v35  ;;  %v9480_v35 = vld [vmem:[#allocation14 + $0x648] ss:$16 sps:$4 sm:$0xff]  }
 0xaae   :  { %5368 = vmatprep.subr.bf16.mxu0 %v9416_v30  ;;  %v9485_v30 = vld [vmem:[#allocation14 + $0x62c] ss:$16 sps:$4 sm:$0xff]  }
 0xab1   :  { %5369 = vmatpush1.bf16.msra.mxu0 %v9414_v43  ;;  %v9522_v43 = vld [vmem:[#allocation14 + $0x880] ss:$16 sps:$4 sm:$0xff]  }
 0xab2   :  { %5370 = vmatprep.subr.bf16.mxu0 %v9422_v48  ;;  %v9527_v48 = vld [vmem:[#allocation14 + $0x864] ss:$16 sps:$4 sm:$0xff]  }
 0xab5   :  { %5371 = vmatpush2.bf16.msra.mxu0 %v9420_v47  ;;  %v9483_v47 = vld [vmem:[#allocation14 + $0x628] ss:$16 sps:$4 sm:$0xff]  }
 0xab6   :  { %5372 = vmatprep.subr.bf16.mxu0 %v9428_v59  ;;  %v9488_v59 = vld [vmem:[#allocation14 + $0x60c] ss:$16 sps:$4 sm:$0xff]  }
 0xab9   :  { %5373 = vmatpush2.bf16.msra.mxu0 %v9426_v1  ;;  %v9525_v1 = vld [vmem:[#allocation14 + $0x860] ss:$16 sps:$4 sm:$0xff]  }
 0xaba   :  { %5374 = vmatprep.subr.bf16.mxu0 %v9434_v61  ;;  %v9530_v61 = vld [vmem:[#allocation14 + $0x844] ss:$16 sps:$4 sm:$0xff]  }
 0xabd   :  { %5375 = vmatpush2.bf16.msra.mxu0 %v9432_v63  ;;  %v9486_v63 = vld [vmem:[#allocation14 + $0x608] ss:$16 sps:$4 sm:$0xff]  }
 0xabe   :  { %5376 = vmatprep.subr.bf16.mxu0 %v9440_v45  ;;  %v9491_v45 = vld [vmem:[#allocation14 + $0x7ec] ss:$16 sps:$4 sm:$0xff]  }
 0xac1   :  { %5377 = vmatpush2.bf16.msra.mxu0 %v9438_v8  ;;  %v9528_v8 = vld [vmem:[#allocation14 + $0x840] ss:$16 sps:$4 sm:$0xff]  }
 0xac2   :  { %5378 = vmatprep.subr.bf16.mxu0 %v9446_v28  ;;  %v9533_v28 = vld [vmem:[#allocation14 + $0x824] ss:$16 sps:$4 sm:$0xff]  }
 0xac4   :  { %v4412_v50 = vpop.f32.mrf.mxu0  ;;  %v4455_v24 = vpop.f32.mrf.mxu1 }
 0xac5   :  { %5379 = vmatpush2.bf16.msra.mxu0 %v9444_v4  ;;  %v4413_v0 = vadd.f32 %v4412_v50, %v3643_v37  ;;  %v9489_v4 = vld [vmem:[#allocation14 + $0x7e8] ss:$16 sps:$4 sm:$0xff]  }
 0xac6   :  { %v4414_v9 = vpop.f32.mrf.mxu0  ;;  %v4457_v25 = vpop.f32.mrf.mxu1  ;;  %5380 = vmatprep.subr.bf16.mxu0 %v9452_v12  ;;  %v9494_v12 = vld [vmem:[#allocation14 + $0x7cc] ss:$16 sps:$4 sm:$0xff]   ;;  %v9492_v50 = vld [vmem:[#allocation14 + $0x7c8] ss:$16 sps:$4 sm:$0xff]  }
 0xac7   :  { %v4415_v52 = vadd.f32 %v4414_v9, %v3647_v46  ;;  %v4456_v51 = vadd.f32 %v4455_v24, %v4413_v0  ;;  %v9497_v24 = vld [vmem:[#allocation14 + $0x7ac] ss:$16 sps:$4 sm:$0xff]   ;;  %v9539_v9 = vld [vmem:[#allocation14 + $0x9e4] ss:$16 sps:$4 sm:$0xff]  }
 0xac8   :  { %v4416_v17 = vpop.f32.mrf.mxu0  ;;  %v4459_v5 = vpop.f32.mrf.mxu1  ;;  %v9542_v0 = vld [vmem:[#allocation14 + $0x9c4] ss:$16 sps:$4 sm:$0xff]  }
 0xac9   :  { %v4417_v40 = vadd.f32 %v4416_v17, %v3643_v37  ;;  %5381 = vmatpush2.bf16.msra.mxu0 %v9450_v32  ;;  %v4458_v56 = vadd.f32 %v4457_v25, %v4415_v52  ;;  %v4466_v49 = vmax.f32 %v4456_v51, 0.0  ;;  %v9536_v37 = vld [vmem:[#allocation14 + $0x804] ss:$16 sps:$4 sm:$0xff]   ;;  %v9534_v32 = vld [vmem:[#allocation14 + $0x800] ss:$16 sps:$4 sm:$0xff]  }
 0xaca   :  { %v4418_v44 = vpop.f32.mrf.mxu0  ;;  %5382 = vmatprep.subr.bf16.mxu0 %v9458_v54  ;;  %v4461_v41 = vpop.f32.mrf.mxu1  ;;  %v9495_v25 = vld [vmem:[#allocation14 + $0x7a8] ss:$16 sps:$4 sm:$0xff]   ;;  %v9500_v54 = vld [vmem:[#allocation14 + $0x78c] ss:$16 sps:$4 sm:$0xff]   ;;  %v9537_v52 = vld [vmem:[#allocation14 + $0x9e0] ss:$16 sps:$4 sm:$0xff]  }
 0xacb   :  { %v4460_v58 = vadd.f32 %v4459_v5, %v4417_v40  ;;  %v4419_v20 = vadd.f32 %v4418_v44, %v3647_v46  ;;  %v4467_v23 = vmax.f32 %v4458_v56, 0.0  ;;  %v9531_v46 = vld [vmem:[#allocation14 + $0x820] ss:$16 sps:$4 sm:$0xff]   ;;  %v9498_v17 = vld [vmem:[#allocation14 + $0x788] ss:$16 sps:$4 sm:$0xff]  }
 0xacc   :  { %v9503_v5 = vld [vmem:[#allocation14 + $0x76c] ss:$16 sps:$4 sm:$0xff]   ;;  %v9540_v40 = vld [vmem:[#allocation14 + $0x9c0] ss:$16 sps:$4 sm:$0xff]   ;;  %v9501_v44 = vld [vmem:[#allocation14 + $0x768] ss:$16 sps:$4 sm:$0xff]  }
 0xacd   :  { %v4462_v6 = vadd.f32 %v4461_v41, %v4419_v20  ;;  %5383 = vmatpush2.bf16.msra.mxu0 %v9456_v33  ;;  %v4470_v57 = vmax.f32 %v4460_v58, 0.0  ;;  %v9545_v33 = vld [vmem:[#allocation14 + $0x9a4] ss:$16 sps:$4 sm:$0xff]   ;;  %v9543_v56 = vld [vmem:[#allocation14 + $0x9a0] ss:$16 sps:$4 sm:$0xff]  }
 0xace   :  { %5384 = vmatprep.subr.bf16.mxu0 %v9464_v53  ;;  %v9506_v53 = vld [vmem:[#allocation14 + $0x74c] ss:$16 sps:$4 sm:$0xff]   ;;  %v9548_v58 = vld [vmem:[#allocation14 + $0x984] ss:$16 sps:$4 sm:$0xff]   ;;  %v9504_v20 = vld [vmem:[#allocation14 + $0x748] ss:$16 sps:$4 sm:$0xff]  }
 0xacf   :  { %v4471_v11 = vmax.f32 %v4462_v6, 0.0  ;;  %v11455_v2 = vpack.c.bf16 %v4470_v57, %v4466_v49  ;;  %v9509_v51 = vld [vmem:[#allocation14 + $0x72c] ss:$16 sps:$4 sm:$0xff]   ;;  %v9546_v41 = vld [vmem:[#allocation14 + $0x980] ss:$16 sps:$4 sm:$0xff]  }
 0xad0   :  { %v9551_v6 = vld [vmem:[#allocation14 + $0x964] ss:$16 sps:$4 sm:$0xff]   ;;  %v9512_v57 = vld [vmem:[#allocation14 + $0x70c] ss:$16 sps:$4 sm:$0xff]  }
 0xad1   :  { %v4475_v21 = vpack.c.bf16 %v4471_v11, %v4467_v23  ;;  %5385 = vmatpush2.bf16.msra.mxu0 %v9462_v39  ;;  %v9507_v39 = vld [vmem:[#allocation14 + $0x728] ss:$16 sps:$4 sm:$0xff]   ;;  %v9549_v23 = vld [vmem:[#allocation14 + $0x960] ss:$16 sps:$4 sm:$0xff]   ;;  %v9554_v49 = vld [vmem:[#allocation14 + $0x944] ss:$16 sps:$4 sm:$0xff]  }
 0xad2   :  { %6244 = vmatprep.subr.bf16.mxu0 %v9515_v26  ;;  %v9510_v11 = vld [vmem:[#allocation14 + $0x708] ss:$16 sps:$4 sm:$0xff]   ;;  %v9567_v26 = vld [vmem:[#allocation14 + $0xac0] ss:$16 sps:$4 sm:$0xff]  }
 0xad3   :  { %5343 = vmatprep.mubr.bf16.mxu1 %v4475_v21 }
 0xad4   :  { %5344 = vmatmul.mubr.bf16.vlgmr.msra.gmra.mxu1 %v11455_v2  ;;  %5387 = vmatmul.mubr.bf16.vlgmr.msra.gmra.mxu0 %v11448_v38  ;;  %v9521_v38 = vld [vmem:[#allocation14 + $0x8a4] ss:$16 sps:$4 sm:$0xff]  }
 0xad5   :  { %5398 = vmatpush1.bf16.msra.mxu1 %v9465_v29  ;;  %5429 = vmatprep.mubr.bf16.mxu1 %v4475_v21  ;;  %v9552_v21 = vld [vmem:[#allocation14 + $0x940] ss:$16 sps:$4 sm:$0xff]   ;;  %v9557_v29 = vld [vmem:[#allocation14 + $0x924] ss:$16 sps:$4 sm:$0xff]  }
 0xad6   :  { %5399 = vmatprep.subr.bf16.mxu1 %v9470_v13  ;;  %6245 = vmatpush1.bf16.msra.mxu0 %v9513_v15  ;;  %v9555_v13 = vld [vmem:[#allocation14 + $0x920] ss:$16 sps:$4 sm:$0xff]   ;;  %v9566_v15 = vld [vmem:[#allocation14 + $0x8ec] ss:$16 sps:$4 sm:$0xff]  }
 0xad7   :  { %6246 = vmatprep.subr.bf16.mxu0 %v9518_v34  ;;  %v9573_v34 = vld [vmem:[#allocation14 + $0xaa0] ss:$16 sps:$4 sm:$0xff]  }
 0xad9   :  { %5400 = vmatpush1.bf16.msra.mxu1 %v9468_v10  ;;  %v9560_v10 = vld [vmem:[#allocation14 + $0x904] ss:$16 sps:$4 sm:$0xff]  }
 0xada   :  { %5401 = vmatprep.subr.bf16.mxu1 %v9473_v14  ;;  %6247 = vmatpush1.bf16.msra.mxu0 %v9516_v22  ;;  %v9558_v14 = vld [vmem:[#allocation14 + $0x900] ss:$16 sps:$4 sm:$0xff]   ;;  %v9581_v22 = vld [vmem:[#allocation14 + $0xa84] ss:$16 sps:$4 sm:$0xff]  }
 0xadb   :  { %6248 = vmatprep.subr.bf16.mxu0 %v9521_v38  ;;  %v9585_v38 = vld [vmem:[#allocation14 + $0xa60] ss:$16 sps:$4 sm:$0xff]  }
 0xadd   :  { %5402 = vmatpush1.bf16.msra.mxu1 %v9471_v60  ;;  %v9561_v60 = vld [vmem:[#allocation14 + $0xae0] ss:$16 sps:$4 sm:$0xff]  }
 0xade   :  { %5403 = vmatprep.subr.bf16.mxu1 %v9476_v19  ;;  %6249 = vmatpush1.bf16.msra.mxu0 %v9519_v62  ;;  %v9563_v19 = vld [vmem:[#allocation14 + $0xae4] ss:$16 sps:$4 sm:$0xff]  }
 0xadf   :  { %6250 = vmatprep.subr.bf16.mxu0 %v9524_v31  ;;  %v9593_v62 = vld [vmem:[#allocation14 + $0xa44] ss:$16 sps:$4 sm:$0xff]   ;;  %v9597_v31 = vld [vmem:[#allocation14 + $0xa20] ss:$16 sps:$4 sm:$0xff]  }
 0xae1   :  { %5404 = vmatpush1.bf16.msra.mxu1 %v9474_v3  ;;  %v9575_v3 = vld [vmem:[#allocation14 + $0xaa4] ss:$16 sps:$4 sm:$0xff]  }
 0xae2   :  { %5405 = vmatprep.subr.bf16.mxu1 %v9479_v7  ;;  %6251 = vmatpush1.bf16.msra.mxu0 %v9522_v43  ;;  %v9579_v7 = vld [vmem:[#allocation14 + $0xa80] ss:$16 sps:$4 sm:$0xff]   ;;  %v9605_v43 = vld [vmem:[#allocation14 + $0xa04] ss:$16 sps:$4 sm:$0xff]  }
 0xae3   :  { %6252 = vmatprep.subr.bf16.mxu0 %v9527_v48  ;;  %v9609_v48 = vld [vmem:[#allocation14 + $0xbe0] ss:$16 sps:$4 sm:$0xff]  }
 0xae5   :  { %5406 = vmatpush1.bf16.msra.mxu1 %v9477_v55  ;;  %v9587_v55 = vld [vmem:[#allocation14 + $0xa64] ss:$16 sps:$4 sm:$0xff]  }
 0xae6   :  { %5407 = vmatprep.subr.bf16.mxu1 %v9482_v18  ;;  %6253 = vmatpush1.bf16.msra.mxu0 %v9525_v1  ;;  %v9591_v18 = vld [vmem:[#allocation14 + $0xa40] ss:$16 sps:$4 sm:$0xff]   ;;  %v9617_v1 = vld [vmem:[#allocation14 + $0xbc4] ss:$16 sps:$4 sm:$0xff]  }
 0xae7   :  { %6254 = vmatprep.subr.bf16.mxu0 %v9530_v61  ;;  %v9621_v61 = vld [vmem:[#allocation14 + $0xba0] ss:$16 sps:$4 sm:$0xff]  }
 0xae9   :  { %5408 = vmatpush1.bf16.msra.mxu1 %v9480_v35  ;;  %v9599_v35 = vld [vmem:[#allocation14 + $0xa24] ss:$16 sps:$4 sm:$0xff]  }
 0xaea   :  { %5409 = vmatprep.subr.bf16.mxu1 %v9485_v30  ;;  %6255 = vmatpush1.bf16.msra.mxu0 %v9528_v8  ;;  %v9603_v30 = vld [vmem:[#allocation14 + $0xa00] ss:$16 sps:$4 sm:$0xff]   ;;  %v9629_v8 = vld [vmem:[#allocation14 + $0xb84] ss:$16 sps:$4 sm:$0xff]  }
 0xaeb   :  { %6256 = vmatprep.subr.bf16.mxu0 %v9533_v28  ;;  %v9633_v28 = vld [vmem:[#allocation14 + $0xb60] ss:$16 sps:$4 sm:$0xff]  }
 0xaed   :  { %5410 = vmatpush1.bf16.msra.mxu1 %v9483_v47  ;;  %v9611_v47 = vld [vmem:[#allocation14 + $0xbe4] ss:$16 sps:$4 sm:$0xff]  }
 0xaee   :  { %5411 = vmatprep.subr.bf16.mxu1 %v9488_v59  ;;  %6257 = vmatpush1.bf16.msra.mxu0 %v9531_v46  ;;  %v9615_v59 = vld [vmem:[#allocation14 + $0xbc0] ss:$16 sps:$4 sm:$0xff]  }
 0xaef   :  { %6258 = vmatprep.subr.bf16.mxu0 %v9536_v37  ;;  %v9639_v46 = vld [vmem:[#allocation14 + $0xb40] ss:$16 sps:$4 sm:$0xff]   ;;  %v9647_v37 = vld [vmem:[#allocation14 + $0xb24] ss:$16 sps:$4 sm:$0xff]  }
 0xaf1   :  { %5412 = vmatpush1.bf16.msra.mxu1 %v9486_v63  ;;  %v9623_v63 = vld [vmem:[#allocation14 + $0xba4] ss:$16 sps:$4 sm:$0xff]  }
 0xaf2   :  { %5413 = vmatprep.subr.bf16.mxu1 %v9491_v45  ;;  %6259 = vmatpush1.bf16.msra.mxu0 %v9534_v32  ;;  %v9627_v45 = vld [vmem:[#allocation14 + $0xb80] ss:$16 sps:$4 sm:$0xff]  }
 0xaf3   :  { %6260 = vmatprep.subr.bf16.mxu0 %v9539_v9  ;;  %v9651_v32 = vld [vmem:[#allocation14 + $0xb00] ss:$16 sps:$4 sm:$0xff]   ;;  %v9659_v9 = vld [vmem:[#allocation14 + $0xaec] ss:$16 sps:$4 sm:$0xff]  }
 0xaf5   :  { %5414 = vmatpush2.bf16.msra.mxu1 %v9489_v4  ;;  %v9635_v4 = vld [vmem:[#allocation14 + $0xb64] ss:$16 sps:$4 sm:$0xff]  }
 0xaf6   :  { %5415 = vmatprep.subr.bf16.mxu1 %v9494_v12  ;;  %6261 = vmatpush2.bf16.msra.mxu0 %v9537_v52  ;;  %v9641_v12 = vld [vmem:[#allocation14 + $0xb44] ss:$16 sps:$4 sm:$0xff]  }
 0xaf7   :  { %6262 = vmatprep.subr.bf16.mxu0 %v9542_v0  ;;  %v11460_v52 = vld [vmem:[#allocation16 + $0x1] ss:$4 sm:$0xf] }
 0xaf9   :  { %5416 = vmatpush2.bf16.msra.mxu1 %v9492_v50  ;;  %v9645_v50 = vld [vmem:[#allocation14 + $0xb20] ss:$16 sps:$4 sm:$0xff]  }
 0xafa   :  { %5417 = vmatprep.subr.bf16.mxu1 %v9497_v24  ;;  %6263 = vmatpush2.bf16.msra.mxu0 %v9540_v40  ;;  %v9653_v24 = vld [vmem:[#allocation14 + $0xb04] ss:$16 sps:$4 sm:$0xff]  }
 0xafb   :  { %6264 = vmatprep.subr.bf16.mxu0 %v9545_v33 }
 0xafd   :  { %5418 = vmatpush2.bf16.msra.mxu1 %v9495_v25 }
 0xafe   :  { %5419 = vmatprep.subr.bf16.mxu1 %v9500_v54  ;;  %6265 = vmatpush2.bf16.msra.mxu0 %v9543_v56 }
 0xaff   :  { %6266 = vmatprep.subr.bf16.mxu0 %v9548_v58 }
 0xb01   :  { %5420 = vmatpush2.bf16.msra.mxu1 %v9498_v17  ;;  %v4615_v17 = vrot.slane %v11460_v52, %v11616_v42 }
 0xb02   :  { %5421 = vmatprep.subr.bf16.mxu1 %v9503_v5  ;;  %6267 = vmatpush2.bf16.msra.mxu0 %v9546_v41  ;;  %v4611_v5 = vrot.slane %v11460_v52, %v11615_v36 }
 0xb03   :  { %6268 = vmatprep.subr.bf16.mxu0 %v9551_v6 }
 0xb05   :  { %5422 = vmatpush2.bf16.msra.mxu1 %v9501_v44 }
 0xb06   :  { %5423 = vmatprep.subr.bf16.mxu1 %v9506_v53  ;;  %6269 = vmatpush2.bf16.msra.mxu0 %v9549_v23 }
 0xb07   :  { %6270 = vmatprep.subr.bf16.mxu0 %v9554_v49 }
 0xb09   :  { %5424 = vmatpush2.bf16.msra.mxu1 %v9504_v20 }
 0xb0a   :  { %5425 = vmatprep.subr.bf16.mxu1 %v9509_v51  ;;  %6271 = vmatpush2.bf16.msra.mxu0 %v9552_v21 }
 0xb0b   :  { %6272 = vmatprep.subr.bf16.mxu0 %v9557_v29 }
 0xb0d   :  { %5426 = vmatpush2.bf16.msra.mxu1 %v9507_v39 }
 0xb0e   :  { %5427 = vmatprep.subr.bf16.mxu1 %v9512_v57  ;;  %6273 = vmatpush2.bf16.msra.mxu0 %v9555_v13 }
 0xb0f   :  { %6274 = vmatprep.subr.bf16.mxu0 %v9560_v10  ;;  %v9564_v10 = vld [vmem:[#allocation14 + $0x8e8] ss:$16 sps:$4 sm:$0xff]  }
 0xb11   :  { %5428 = vmatpush2.bf16.msra.mxu1 %v9510_v11 }
 0xb12   :  { %6275 = vmatpush2.bf16.msra.mxu0 %v9558_v14  ;;  %6287 = vmatprep.subr.bf16.mxu1 %v9563_v19  ;;  %v9570_v19 = vld [vmem:[#allocation14 + $0x8c8] ss:$16 sps:$4 sm:$0xff]  }
 0xb13   :  { %6330 = vmatprep.subr.bf16.mxu0 %v9566_v15  ;;  %v9578_v15 = vld [vmem:[#allocation14 + $0x8ac] ss:$16 sps:$4 sm:$0xff]  }
 0xb14   :  { %5430 = vmatmul.mubr.bf16.vlgmr.msra.gmra.mxu1 %v11455_v2  ;;  %v9569_v2 = vld [vmem:[#allocation14 + $0xac4] ss:$16 sps:$4 sm:$0xff]  }
 0xb15   :  { %6288 = vmatpush1.bf16.msra.mxu1 %v9561_v60  ;;  %v9572_v60 = vld [vmem:[#allocation14 + $0x8cc] ss:$16 sps:$4 sm:$0xff]  }
 0xb16   :  { %6289 = vmatprep.subr.bf16.mxu1 %v9569_v2  ;;  %v9584_v2 = vld [vmem:[#allocation14 + $0x88c] ss:$16 sps:$4 sm:$0xff]  }
 0xb19   :  { %6290 = vmatpush1.bf16.msra.mxu1 %v9567_v26  ;;  %v9576_v26 = vld [vmem:[#allocation14 + $0x8a8] ss:$16 sps:$4 sm:$0xff]  }
 0xb1a   :  { %6291 = vmatprep.subr.bf16.mxu1 %v9575_v3  ;;  %v9590_v3 = vld [vmem:[#allocation14 + $0x86c] ss:$16 sps:$4 sm:$0xff]  }
 0xb1d   :  { %6292 = vmatpush1.bf16.msra.mxu1 %v9573_v34  ;;  %v9582_v34 = vld [vmem:[#allocation14 + $0x888] ss:$16 sps:$4 sm:$0xff]  }
 0xb1e   :  { %6293 = vmatprep.subr.bf16.mxu1 %v9581_v22  ;;  %v9596_v22 = vld [vmem:[#allocation14 + $0x84c] ss:$16 sps:$4 sm:$0xff]  }
 0xb21   :  { %6294 = vmatpush1.bf16.msra.mxu1 %v9579_v7  ;;  %v9588_v7 = vld [vmem:[#allocation14 + $0x868] ss:$16 sps:$4 sm:$0xff]  }
 0xb22   :  { %6295 = vmatprep.subr.bf16.mxu1 %v9587_v55  ;;  %v9602_v55 = vld [vmem:[#allocation14 + $0x82c] ss:$16 sps:$4 sm:$0xff]  }
 0xb25   :  { %6296 = vmatpush1.bf16.msra.mxu1 %v9585_v38  ;;  %v9594_v38 = vld [vmem:[#allocation14 + $0x848] ss:$16 sps:$4 sm:$0xff]  }
 0xb26   :  { %6297 = vmatprep.subr.bf16.mxu1 %v9593_v62  ;;  %v9608_v62 = vld [vmem:[#allocation14 + $0x80c] ss:$16 sps:$4 sm:$0xff]  }
 0xb29   :  { %6298 = vmatpush1.bf16.msra.mxu1 %v9591_v18  ;;  %v9600_v18 = vld [vmem:[#allocation14 + $0x828] ss:$16 sps:$4 sm:$0xff]  }
 0xb2a   :  { %6299 = vmatprep.subr.bf16.mxu1 %v9599_v35  ;;  %v9614_v35 = vld [vmem:[#allocation14 + $0x9ec] ss:$16 sps:$4 sm:$0xff]  }
 0xb2d   :  { %6300 = vmatpush1.bf16.msra.mxu1 %v9597_v31  ;;  %v9606_v31 = vld [vmem:[#allocation14 + $0x808] ss:$16 sps:$4 sm:$0xff]  }
 0xb2e   :  { %6301 = vmatprep.subr.bf16.mxu1 %v9605_v43  ;;  %v9620_v43 = vld [vmem:[#allocation14 + $0x9cc] ss:$16 sps:$4 sm:$0xff]  }
 0xb31   :  { %6302 = vmatpush1.bf16.msra.mxu1 %v9603_v30  ;;  %v9612_v30 = vld [vmem:[#allocation14 + $0x9e8] ss:$16 sps:$4 sm:$0xff]  }
 0xb32   :  { %6303 = vmatprep.subr.bf16.mxu1 %v9611_v47  ;;  %v9626_v47 = vld [vmem:[#allocation14 + $0x9ac] ss:$16 sps:$4 sm:$0xff]  }
 0xb35   :  { %6304 = vmatpush2.bf16.msra.mxu1 %v9609_v48  ;;  %v9618_v48 = vld [vmem:[#allocation14 + $0x9c8] ss:$16 sps:$4 sm:$0xff]  }
 0xb36   :  { %6305 = vmatprep.subr.bf16.mxu1 %v9617_v1  ;;  %v9632_v1 = vld [vmem:[#allocation14 + $0x98c] ss:$16 sps:$4 sm:$0xff]  }
 0xb39   :  { %6306 = vmatpush2.bf16.msra.mxu1 %v9615_v59  ;;  %v9624_v59 = vld [vmem:[#allocation14 + $0x9a8] ss:$16 sps:$4 sm:$0xff]  }
 0xb3a   :  { %6307 = vmatprep.subr.bf16.mxu1 %v9623_v63  ;;  %v9630_v63 = vld [vmem:[#allocation14 + $0x988] ss:$16 sps:$4 sm:$0xff]  }
 0xb3d   :  { %6308 = vmatpush2.bf16.msra.mxu1 %v9621_v61 }
 0xb3e   :  { %6309 = vmatprep.subr.bf16.mxu1 %v9629_v8 }
 0xb41   :  { %6310 = vmatpush2.bf16.msra.mxu1 %v9627_v45  ;;  %v9638_v45 = vld [vmem:[#allocation14 + $0x96c] ss:$16 sps:$4 sm:$0xff]  }
 0xb42   :  { %6311 = vmatprep.subr.bf16.mxu1 %v9635_v4  ;;  %v9644_v4 = vld [vmem:[#allocation14 + $0x94c] ss:$16 sps:$4 sm:$0xff]  }
 0xb45   :  { %6312 = vmatpush2.bf16.msra.mxu1 %v9633_v28  ;;  %v9636_v28 = vld [vmem:[#allocation14 + $0x968] ss:$16 sps:$4 sm:$0xff]  }
 0xb46   :  { %6313 = vmatprep.subr.bf16.mxu1 %v9641_v12 }
 0xb49   :  { %6314 = vmatpush2.bf16.msra.mxu1 %v9639_v46  ;;  %v4623_v46 = vrot.slane %v11460_v52, %v11617_v27 }
 0xb4a   :  { %6315 = vmatprep.subr.bf16.mxu1 %v9647_v37  ;;  %v9642_v37 = vld [vmem:[#allocation14 + $0x948] ss:$16 sps:$4 sm:$0xff]  }
 0xb4d   :  { %6316 = vmatpush2.bf16.msra.mxu1 %v9645_v50  ;;  %v4619_v50 = vrot.slane %v11460_v52, %v11618_v16  ;;  %v9654_v52 = vld [vmem:[#allocation14 + $0x908] ss:$16 sps:$4 sm:$0xff]  }
 0xb4e   :  { %6317 = vmatprep.subr.bf16.mxu1 %v9653_v24 }
 0xb51   :  { %6318 = vmatpush2.bf16.msra.mxu1 %v9651_v32  ;;  %v9650_v32 = vld [vmem:[#allocation14 + $0x92c] ss:$16 sps:$4 sm:$0xff]  }
 0xb52   :  { %6373 = vmatprep.subr.bf16.mxu1 %v9659_v9 }
 0xb54   :  { %v5302_v25 = vpop.f32.mrf.mxu0 }
 0xb55   :  { %v5303_v58 = vadd.f32 %v5302_v25, %v4611_v5 }
 0xb56   :  { %v5304_v54 = vpop.f32.mrf.mxu0 }
 0xb57   :  { %v5305_v53 = vadd.f32 %v5304_v54, %v4615_v17 }
 0xb58   :  { %v5306_v0 = vpop.f32.mrf.mxu0 }
 0xb59   :  { %v5307_v56 = vadd.f32 %v5306_v0, %v4611_v5 }
 0xb5a   :  { %v5308_v33 = vpop.f32.mrf.mxu0 }
 0xb5b   :  { %v5309_v51 = vadd.f32 %v5308_v33, %v4615_v17  ;;  %v9648_v17 = vld [vmem:[#allocation14 + $0x928] ss:$16 sps:$4 sm:$0xff]   ;;  %v9656_v33 = vld [vmem:[#allocation14 + $0x90c] ss:$16 sps:$4 sm:$0xff]  }
 0xb94   :  { %v5345_v40 = vpop.f32.mrf.mxu1  ;;  %v5388_v61 = vpop.f32.mrf.mxu0 }
 0xb95   :  { %v5346_v39 = vadd.f32 %v5345_v40, %v5303_v58  ;;  %v5389_v5 = vadd.f32 %v5388_v61, %v4619_v50  ;;  %v9720_v61 = vld [vmem:[#allocation14 + $0xc40] ss:$16 sps:$4 sm:$0xff]  }
 0xb96   :  { %v5347_v44 = vpop.f32.mrf.mxu1  ;;  %v5390_v8 = vpop.f32.mrf.mxu0 }
 0xb97   :  { %v5348_v41 = vadd.f32 %v5347_v44, %v5305_v53  ;;  %v5440_v29 = vmax.f32 %v5346_v39, 0.0  ;;  %v5391_v54 = vadd.f32 %v5390_v8, %v4623_v46  ;;  %v9686_v8 = vld [vmem:[#allocation14 + $0xbcc] ss:$16 sps:$4 sm:$0xff]  }
 0xb98   :  { %v5349_v20 = vpop.f32.mrf.mxu1  ;;  %v5392_v12 = vpop.f32.mrf.mxu0 }
 0xb99   :  { %v5350_v6 = vadd.f32 %v5349_v20, %v5307_v56  ;;  %v5441_v49 = vmax.f32 %v5348_v41, 0.0  ;;  %v5393_v0 = vadd.f32 %v5392_v12, %v4619_v50  ;;  %v9684_v12 = vld [vmem:[#allocation14 + $0xbc8] ss:$16 sps:$4 sm:$0xff]   ;;  %v9731_v50 = vld [vmem:[#allocation14 + $0xde4] ss:$16 sps:$4 sm:$0xff]  }
 0xb9a   :  { %v5351_v57 = vpop.f32.mrf.mxu1  ;;  %v5394_v9 = vpop.f32.mrf.mxu0 }
 0xb9b   :  { %v5352_v23 = vadd.f32 %v5351_v57, %v5309_v51  ;;  %v5444_v11 = vmax.f32 %v5350_v6, 0.0  ;;  %v5395_v44 = vadd.f32 %v5394_v9, %v4623_v46  ;;  %v9689_v46 = vld [vmem:[#allocation14 + $0xbac] ss:$16 sps:$4 sm:$0xff]   ;;  %v9729_v9 = vld [vmem:[#allocation14 + $0xde0] ss:$16 sps:$4 sm:$0xff]  }
 0xb9d   :  { %v5445_v21 = vmax.f32 %v5352_v23, 0.0  ;;  %v11466_v14 = vpack.c.bf16 %v5444_v11, %v5440_v29  ;;  %v9657_v11 = vld [vmem:[#allocation14 + $0xae8] ss:$16 sps:$4 sm:$0xff]  }
 0xb9e   :  { %v9660_v29 = vld [vmem:[#allocation14 + $0xac8] ss:$16 sps:$4 sm:$0xff]  }
 0xb9f   :  { %v5449_v13 = vpack.c.bf16 %v5445_v21, %v5441_v49  ;;  %v9662_v21 = vld [vmem:[#allocation14 + $0xacc] ss:$16 sps:$4 sm:$0xff]  }
 0xba1   :  { %6276 = vmatprep.mubr.bf16.mxu0 %v5449_v13 }
 0xba2   :  { %6277 = vmatmul.mubr.bf16.vlgmr.msra.gmra.mxu0 %v11466_v14 }
 0xba3   :  { %6331 = vmatpush1.bf16.msra.mxu0 %v9564_v10  ;;  %6362 = vmatprep.mubr.bf16.mxu0 %v5449_v13  ;;  %v9665_v13 = vld [vmem:[#allocation14 + $0xaac] ss:$16 sps:$4 sm:$0xff]   ;;  %v9663_v10 = vld [vmem:[#allocation14 + $0xaa8] ss:$16 sps:$4 sm:$0xff]  }
 0xba4   :  { %6332 = vmatprep.subr.bf16.mxu0 %v9572_v60  ;;  %v9668_v60 = vld [vmem:[#allocation14 + $0xa8c] ss:$16 sps:$4 sm:$0xff]  }
 0xba7   :  { %6333 = vmatpush1.bf16.msra.mxu0 %v9570_v19  ;;  %v9705_v19 = vld [vmem:[#allocation14 + $0xce0] ss:$16 sps:$4 sm:$0xff]  }
 0xba8   :  { %6334 = vmatprep.subr.bf16.mxu0 %v9578_v15  ;;  %v9707_v15 = vld [vmem:[#allocation14 + $0xce4] ss:$16 sps:$4 sm:$0xff]  }
 0xbab   :  { %6335 = vmatpush1.bf16.msra.mxu0 %v9576_v26  ;;  %v9710_v26 = vld [vmem:[#allocation14 + $0xcc4] ss:$16 sps:$4 sm:$0xff]  }
 0xbac   :  { %6336 = vmatprep.subr.bf16.mxu0 %v9584_v2  ;;  %v9666_v2 = vld [vmem:[#allocation14 + $0xa88] ss:$16 sps:$4 sm:$0xff]  }
 0xbaf   :  { %6337 = vmatpush1.bf16.msra.mxu0 %v9582_v34  ;;  %v9671_v34 = vld [vmem:[#allocation14 + $0xa6c] ss:$16 sps:$4 sm:$0xff]  }
 0xbb0   :  { %6338 = vmatprep.subr.bf16.mxu0 %v9590_v3  ;;  %v9708_v3 = vld [vmem:[#allocation14 + $0xcc0] ss:$16 sps:$4 sm:$0xff]  }
 0xbb3   :  { %6339 = vmatpush1.bf16.msra.mxu0 %v9588_v7  ;;  %v9669_v7 = vld [vmem:[#allocation14 + $0xa68] ss:$16 sps:$4 sm:$0xff]  }
 0xbb4   :  { %6340 = vmatprep.subr.bf16.mxu0 %v9596_v22  ;;  %v9674_v22 = vld [vmem:[#allocation14 + $0xa4c] ss:$16 sps:$4 sm:$0xff]  }
 0xbb7   :  { %6341 = vmatpush1.bf16.msra.mxu0 %v9594_v38  ;;  %v9711_v38 = vld [vmem:[#allocation14 + $0xca0] ss:$16 sps:$4 sm:$0xff]  }
 0xbb8   :  { %6342 = vmatprep.subr.bf16.mxu0 %v9602_v55  ;;  %v9716_v55 = vld [vmem:[#allocation14 + $0xc84] ss:$16 sps:$4 sm:$0xff]  }
 0xbbb   :  { %6343 = vmatpush1.bf16.msra.mxu0 %v9600_v18  ;;  %v9672_v18 = vld [vmem:[#allocation14 + $0xa48] ss:$16 sps:$4 sm:$0xff]  }
 0xbbc   :  { %6344 = vmatprep.subr.bf16.mxu0 %v9608_v62  ;;  %v9677_v62 = vld [vmem:[#allocation14 + $0xa2c] ss:$16 sps:$4 sm:$0xff]  }
 0xbbf   :  { %6345 = vmatpush1.bf16.msra.mxu0 %v9606_v31  ;;  %v9714_v31 = vld [vmem:[#allocation14 + $0xc80] ss:$16 sps:$4 sm:$0xff]  }
 0xbc0   :  { %6346 = vmatprep.subr.bf16.mxu0 %v9614_v35  ;;  %v9719_v35 = vld [vmem:[#allocation14 + $0xc64] ss:$16 sps:$4 sm:$0xff]  }
 0xbc3   :  { %6347 = vmatpush2.bf16.msra.mxu0 %v9612_v30  ;;  %v9675_v30 = vld [vmem:[#allocation14 + $0xa28] ss:$16 sps:$4 sm:$0xff]  }
 0xbc4   :  { %6348 = vmatprep.subr.bf16.mxu0 %v9620_v43  ;;  %v9680_v43 = vld [vmem:[#allocation14 + $0xa0c] ss:$16 sps:$4 sm:$0xff]  }
 0xbc7   :  { %6349 = vmatpush2.bf16.msra.mxu0 %v9618_v48  ;;  %v9717_v48 = vld [vmem:[#allocation14 + $0xc60] ss:$16 sps:$4 sm:$0xff]  }
 0xbc8   :  { %6350 = vmatprep.subr.bf16.mxu0 %v9626_v47  ;;  %v9722_v47 = vld [vmem:[#allocation14 + $0xc44] ss:$16 sps:$4 sm:$0xff]  }
 0xbcb   :  { %6351 = vmatpush2.bf16.msra.mxu0 %v9624_v59  ;;  %v9678_v59 = vld [vmem:[#allocation14 + $0xa08] ss:$16 sps:$4 sm:$0xff]  }
 0xbcc   :  { %6352 = vmatprep.subr.bf16.mxu0 %v9632_v1  ;;  %v9683_v1 = vld [vmem:[#allocation14 + $0xbec] ss:$16 sps:$4 sm:$0xff]  }
 0xbcf   :  { %6353 = vmatpush2.bf16.msra.mxu0 %v9630_v63  ;;  %v9725_v63 = vld [vmem:[#allocation14 + $0xc24] ss:$16 sps:$4 sm:$0xff]  }
 0xbd0   :  { %6354 = vmatprep.subr.bf16.mxu0 %v9638_v45  ;;  %v9681_v45 = vld [vmem:[#allocation14 + $0xbe8] ss:$16 sps:$4 sm:$0xff]  }
 0xbd3   :  { %6355 = vmatpush2.bf16.msra.mxu0 %v9636_v28  ;;  %v9723_v28 = vld [vmem:[#allocation14 + $0xc20] ss:$16 sps:$4 sm:$0xff]  }
 0xbd4   :  { %v5431_v24 = vpop.f32.mrf.mxu1  ;;  %6356 = vmatprep.subr.bf16.mxu0 %v9644_v4  ;;  %v9728_v4 = vld [vmem:[#allocation14 + $0xc04] ss:$16 sps:$4 sm:$0xff]  }
 0xbd5   :  { %v5432_v58 = vadd.f32 %v5431_v24, %v5389_v5  ;;  %v9687_v24 = vld [vmem:[#allocation14 + $0xba8] ss:$16 sps:$4 sm:$0xff]   ;;  %v9737_v5 = vld [vmem:[#allocation14 + $0xda4] ss:$16 sps:$4 sm:$0xff]  }
 0xbd6   :  { %v5433_v25 = vpop.f32.mrf.mxu1 }
 0xbd7   :  { %6357 = vmatpush2.bf16.msra.mxu0 %v9642_v37  ;;  %v5434_v53 = vadd.f32 %v5433_v25, %v5391_v54  ;;  %v5442_v57 = vmax.f32 %v5432_v58, 0.0  ;;  %v9726_v37 = vld [vmem:[#allocation14 + $0xc00] ss:$16 sps:$4 sm:$0xff]   ;;  %v9734_v25 = vld [vmem:[#allocation14 + $0xdc4] ss:$16 sps:$4 sm:$0xff]  }
 0xbd8   :  { %v5435_v40 = vpop.f32.mrf.mxu1  ;;  %6358 = vmatprep.subr.bf16.mxu0 %v9650_v32  ;;  %v9692_v32 = vld [vmem:[#allocation14 + $0xb8c] ss:$16 sps:$4 sm:$0xff]   ;;  %v9690_v54 = vld [vmem:[#allocation14 + $0xb88] ss:$16 sps:$4 sm:$0xff]  }
 0xbd9   :  { %v5436_v56 = vadd.f32 %v5435_v40, %v5393_v0  ;;  %v5443_v6 = vmax.f32 %v5434_v53, 0.0  ;;  %v9695_v0 = vld [vmem:[#allocation14 + $0xb6c] ss:$16 sps:$4 sm:$0xff]   ;;  %v9693_v40 = vld [vmem:[#allocation14 + $0xb68] ss:$16 sps:$4 sm:$0xff]  }
 0xbda   :  { %v5437_v20 = vpop.f32.mrf.mxu1  ;;  %v9740_v53 = vld [vmem:[#allocation14 + $0xd84] ss:$16 sps:$4 sm:$0xff]   ;;  %v9701_v58 = vld [vmem:[#allocation14 + $0xb2c] ss:$16 sps:$4 sm:$0xff]  }
 0xbdb   :  { %v5438_v51 = vadd.f32 %v5437_v20, %v5395_v44  ;;  %6359 = vmatpush2.bf16.msra.mxu0 %v9648_v17  ;;  %v5446_v41 = vmax.f32 %v5436_v56, 0.0  ;;  %v9732_v17 = vld [vmem:[#allocation14 + $0xdc0] ss:$16 sps:$4 sm:$0xff]   ;;  %v9696_v56 = vld [vmem:[#allocation14 + $0xb48] ss:$16 sps:$4 sm:$0xff]  }
 0xbdc   :  { %6360 = vmatprep.subr.bf16.mxu0 %v9656_v33  ;;  %v9698_v33 = vld [vmem:[#allocation14 + $0xb4c] ss:$16 sps:$4 sm:$0xff]   ;;  %v9735_v44 = vld [vmem:[#allocation14 + $0xda0] ss:$16 sps:$4 sm:$0xff]  }
 0xbdd   :  { %v5447_v39 = vmax.f32 %v5438_v51, 0.0  ;;  %v11473_v49 = vpack.c.bf16 %v5446_v41, %v5442_v57  ;;  %v9738_v20 = vld [vmem:[#allocation14 + $0xd80] ss:$16 sps:$4 sm:$0xff]   ;;  %v9743_v51 = vld [vmem:[#allocation14 + $0xd64] ss:$16 sps:$4 sm:$0xff]  }
 0xbde   :  { %v9704_v41 = vld [vmem:[#allocation14 + $0xb0c] ss:$16 sps:$4 sm:$0xff]   ;;  %v9746_v57 = vld [vmem:[#allocation14 + $0xd44] ss:$16 sps:$4 sm:$0xff]  }
 0xbdf   :  { %v5451_v23 = vpack.c.bf16 %v5447_v39, %v5443_v6  ;;  %6361 = vmatpush2.bf16.msra.mxu0 %v9654_v52  ;;  %v9699_v52 = vld [vmem:[#allocation14 + $0xb28] ss:$16 sps:$4 sm:$0xff]   ;;  %v9741_v6 = vld [vmem:[#allocation14 + $0xd60] ss:$16 sps:$4 sm:$0xff]  }
 0xbe0   :  { %7220 = vmatprep.subr.bf16.mxu0 %v9707_v15  ;;  %v9702_v39 = vld [vmem:[#allocation14 + $0xb08] ss:$16 sps:$4 sm:$0xff]   ;;  %v9759_v15 = vld [vmem:[#allocation14 + $0xec0] ss:$16 sps:$4 sm:$0xff]  }
 0xbe1   :  { %6319 = vmatprep.mubr.bf16.mxu1 %v5451_v23 }
 0xbe2   :  { %6320 = vmatmul.mubr.bf16.vlgmr.msra.gmra.mxu1 %v11473_v49  ;;  %6363 = vmatmul.mubr.bf16.vlgmr.msra.gmra.mxu0 %v11466_v14  ;;  %v9713_v14 = vld [vmem:[#allocation14 + $0xca4] ss:$16 sps:$4 sm:$0xff]  }
 0xbe3   :  { %6374 = vmatpush1.bf16.msra.mxu1 %v9657_v11  ;;  %6405 = vmatprep.mubr.bf16.mxu1 %v5451_v23  ;;  %v9744_v23 = vld [vmem:[#allocation14 + $0xd40] ss:$16 sps:$4 sm:$0xff]   ;;  %v9749_v11 = vld [vmem:[#allocation14 + $0xd24] ss:$16 sps:$4 sm:$0xff]  }
 0xbe4   :  { %6375 = vmatprep.subr.bf16.mxu1 %v9662_v21  ;;  %7221 = vmatpush1.bf16.msra.mxu0 %v9705_v19  ;;  %v9747_v21 = vld [vmem:[#allocation14 + $0xd20] ss:$16 sps:$4 sm:$0xff]   ;;  %v9758_v19 = vld [vmem:[#allocation14 + $0xcec] ss:$16 sps:$4 sm:$0xff]  }
 0xbe5   :  { %7222 = vmatprep.subr.bf16.mxu0 %v9710_v26  ;;  %v9765_v26 = vld [vmem:[#allocation14 + $0xea0] ss:$16 sps:$4 sm:$0xff]  }
 0xbe7   :  { %6376 = vmatpush1.bf16.msra.mxu1 %v9660_v29  ;;  %v9752_v29 = vld [vmem:[#allocation14 + $0xd04] ss:$16 sps:$4 sm:$0xff]  }
 0xbe8   :  { %6377 = vmatprep.subr.bf16.mxu1 %v9665_v13  ;;  %7223 = vmatpush1.bf16.msra.mxu0 %v9708_v3  ;;  %v9750_v13 = vld [vmem:[#allocation14 + $0xd00] ss:$16 sps:$4 sm:$0xff]   ;;  %v9773_v3 = vld [vmem:[#allocation14 + $0xe84] ss:$16 sps:$4 sm:$0xff]  }
 0xbe9   :  { %7224 = vmatprep.subr.bf16.mxu0 %v9713_v14  ;;  %v9777_v14 = vld [vmem:[#allocation14 + $0xe60] ss:$16 sps:$4 sm:$0xff]  }
 0xbeb   :  { %6378 = vmatpush1.bf16.msra.mxu1 %v9663_v10  ;;  %v9753_v10 = vld [vmem:[#allocation14 + $0xee0] ss:$16 sps:$4 sm:$0xff]  }
 0xbec   :  { %6379 = vmatprep.subr.bf16.mxu1 %v9668_v60  ;;  %7225 = vmatpush1.bf16.msra.mxu0 %v9711_v38  ;;  %v9755_v60 = vld [vmem:[#allocation14 + $0xee4] ss:$16 sps:$4 sm:$0xff]  }
 0xbed   :  { %7226 = vmatprep.subr.bf16.mxu0 %v9716_v55  ;;  %v9785_v38 = vld [vmem:[#allocation14 + $0xe44] ss:$16 sps:$4 sm:$0xff]   ;;  %v9789_v55 = vld [vmem:[#allocation14 + $0xe20] ss:$16 sps:$4 sm:$0xff]  }
 0xbef   :  { %6380 = vmatpush1.bf16.msra.mxu1 %v9666_v2  ;;  %v9767_v2 = vld [vmem:[#allocation14 + $0xea4] ss:$16 sps:$4 sm:$0xff]  }
 0xbf0   :  { %6381 = vmatprep.subr.bf16.mxu1 %v9671_v34  ;;  %7227 = vmatpush1.bf16.msra.mxu0 %v9714_v31  ;;  %v9771_v34 = vld [vmem:[#allocation14 + $0xe80] ss:$16 sps:$4 sm:$0xff]   ;;  %v9797_v31 = vld [vmem:[#allocation14 + $0xe04] ss:$16 sps:$4 sm:$0xff]  }
 0xbf1   :  { %7228 = vmatprep.subr.bf16.mxu0 %v9719_v35  ;;  %v9801_v35 = vld [vmem:[#allocation14 + $0xfe0] ss:$16 sps:$4 sm:$0xff]  }
 0xbf3   :  { %6382 = vmatpush1.bf16.msra.mxu1 %v9669_v7  ;;  %v9779_v7 = vld [vmem:[#allocation14 + $0xe64] ss:$16 sps:$4 sm:$0xff]  }
 0xbf4   :  { %6383 = vmatprep.subr.bf16.mxu1 %v9674_v22  ;;  %7229 = vmatpush1.bf16.msra.mxu0 %v9717_v48  ;;  %v9783_v22 = vld [vmem:[#allocation14 + $0xe40] ss:$16 sps:$4 sm:$0xff]   ;;  %v9809_v48 = vld [vmem:[#allocation14 + $0xfc4] ss:$16 sps:$4 sm:$0xff]  }
 0xbf5   :  { %7230 = vmatprep.subr.bf16.mxu0 %v9722_v47  ;;  %v9813_v47 = vld [vmem:[#allocation14 + $0xfa0] ss:$16 sps:$4 sm:$0xff]  }
 0xbf7   :  { %6384 = vmatpush1.bf16.msra.mxu1 %v9672_v18  ;;  %v9791_v18 = vld [vmem:[#allocation14 + $0xe24] ss:$16 sps:$4 sm:$0xff]  }
 0xbf8   :  { %6385 = vmatprep.subr.bf16.mxu1 %v9677_v62  ;;  %7231 = vmatpush1.bf16.msra.mxu0 %v9720_v61  ;;  %v9795_v62 = vld [vmem:[#allocation14 + $0xe00] ss:$16 sps:$4 sm:$0xff]   ;;  %v9821_v61 = vld [vmem:[#allocation14 + $0xf84] ss:$16 sps:$4 sm:$0xff]  }
 0xbf9   :  { %7232 = vmatprep.subr.bf16.mxu0 %v9725_v63  ;;  %v9825_v63 = vld [vmem:[#allocation14 + $0xf60] ss:$16 sps:$4 sm:$0xff]  }
 0xbfb   :  { %6386 = vmatpush1.bf16.msra.mxu1 %v9675_v30  ;;  %v9803_v30 = vld [vmem:[#allocation14 + $0xfe4] ss:$16 sps:$4 sm:$0xff]  }
 0xbfc   :  { %6387 = vmatprep.subr.bf16.mxu1 %v9680_v43  ;;  %7233 = vmatpush1.bf16.msra.mxu0 %v9723_v28  ;;  %v9807_v43 = vld [vmem:[#allocation14 + $0xfc0] ss:$16 sps:$4 sm:$0xff]  }
 0xbfd   :  { %7234 = vmatprep.subr.bf16.mxu0 %v9728_v4  ;;  %v9831_v28 = vld [vmem:[#allocation14 + $0xf40] ss:$16 sps:$4 sm:$0xff]   ;;  %v9839_v4 = vld [vmem:[#allocation14 + $0xf24] ss:$16 sps:$4 sm:$0xff]  }
 0xbff   :  { %6388 = vmatpush1.bf16.msra.mxu1 %v9678_v59  ;;  %v9815_v59 = vld [vmem:[#allocation14 + $0xfa4] ss:$16 sps:$4 sm:$0xff]  }
 0xc00   :  { %6389 = vmatprep.subr.bf16.mxu1 %v9683_v1  ;;  %7235 = vmatpush1.bf16.msra.mxu0 %v9726_v37  ;;  %v9819_v1 = vld [vmem:[#allocation14 + $0xf80] ss:$16 sps:$4 sm:$0xff]  }
 0xc01   :  { %7236 = vmatprep.subr.bf16.mxu0 %v9731_v50  ;;  %v9843_v37 = vld [vmem:[#allocation14 + $0xf00] ss:$16 sps:$4 sm:$0xff]   ;;  %v9851_v50 = vld [vmem:[#allocation14 + $0xeec] ss:$16 sps:$4 sm:$0xff]  }
 0xc03   :  { %6390 = vmatpush2.bf16.msra.mxu1 %v9681_v45  ;;  %v9827_v45 = vld [vmem:[#allocation14 + $0xf64] ss:$16 sps:$4 sm:$0xff]  }
 0xc04   :  { %6391 = vmatprep.subr.bf16.mxu1 %v9686_v8  ;;  %7237 = vmatpush2.bf16.msra.mxu0 %v9729_v9  ;;  %v9833_v8 = vld [vmem:[#allocation14 + $0xf44] ss:$16 sps:$4 sm:$0xff]  }
 0xc05   :  { %7238 = vmatprep.subr.bf16.mxu0 %v9734_v25  ;;  %v11478_v9 = vld [vmem:[#allocation16 + $0x2] ss:$4 sm:$0xf] }
 0xc07   :  { %6392 = vmatpush2.bf16.msra.mxu1 %v9684_v12  ;;  %v9837_v12 = vld [vmem:[#allocation14 + $0xf20] ss:$16 sps:$4 sm:$0xff]  }
 0xc08   :  { %6393 = vmatprep.subr.bf16.mxu1 %v9689_v46  ;;  %7239 = vmatpush2.bf16.msra.mxu0 %v9732_v17  ;;  %v9845_v46 = vld [vmem:[#allocation14 + $0xf04] ss:$16 sps:$4 sm:$0xff]  }
 0xc09   :  { %7240 = vmatprep.subr.bf16.mxu0 %v9737_v5 }
 0xc0b   :  { %6394 = vmatpush2.bf16.msra.mxu1 %v9687_v24 }
 0xc0c   :  { %6395 = vmatprep.subr.bf16.mxu1 %v9692_v32  ;;  %7241 = vmatpush2.bf16.msra.mxu0 %v9735_v44 }
 0xc0d   :  { %7242 = vmatprep.subr.bf16.mxu0 %v9740_v53 }
 0xc0f   :  { %6396 = vmatpush2.bf16.msra.mxu1 %v9690_v54  ;;  %v5591_v54 = vrot.slane %v11478_v9, %v11616_v42 }
 0xc10   :  { %6397 = vmatprep.subr.bf16.mxu1 %v9695_v0  ;;  %7243 = vmatpush2.bf16.msra.mxu0 %v9738_v20  ;;  %v5587_v0 = vrot.slane %v11478_v9, %v11615_v36 }
 0xc11   :  { %7244 = vmatprep.subr.bf16.mxu0 %v9743_v51 }
 0xc13   :  { %6398 = vmatpush2.bf16.msra.mxu1 %v9693_v40 }
 0xc14   :  { %6399 = vmatprep.subr.bf16.mxu1 %v9698_v33  ;;  %7245 = vmatpush2.bf16.msra.mxu0 %v9741_v6 }
 0xc15   :  { %7246 = vmatprep.subr.bf16.mxu0 %v9746_v57 }
 0xc17   :  { %6400 = vmatpush2.bf16.msra.mxu1 %v9696_v56 }
 0xc18   :  { %6401 = vmatprep.subr.bf16.mxu1 %v9701_v58  ;;  %7247 = vmatpush2.bf16.msra.mxu0 %v9744_v23 }
 0xc19   :  { %7248 = vmatprep.subr.bf16.mxu0 %v9749_v11 }
 0xc1b   :  { %6402 = vmatpush2.bf16.msra.mxu1 %v9699_v52 }
 0xc1c   :  { %6403 = vmatprep.subr.bf16.mxu1 %v9704_v41  ;;  %7249 = vmatpush2.bf16.msra.mxu0 %v9747_v21 }
 0xc1d   :  { %7250 = vmatprep.subr.bf16.mxu0 %v9752_v29  ;;  %v9756_v29 = vld [vmem:[#allocation14 + $0xce8] ss:$16 sps:$4 sm:$0xff]  }
 0xc1f   :  { %6404 = vmatpush2.bf16.msra.mxu1 %v9702_v39 }
 0xc20   :  { %7251 = vmatpush2.bf16.msra.mxu0 %v9750_v13  ;;  %7263 = vmatprep.subr.bf16.mxu1 %v9755_v60  ;;  %v9762_v60 = vld [vmem:[#allocation14 + $0xcc8] ss:$16 sps:$4 sm:$0xff]  }
 0xc21   :  { %7306 = vmatprep.subr.bf16.mxu0 %v9758_v19  ;;  %v9770_v19 = vld [vmem:[#allocation14 + $0xcac] ss:$16 sps:$4 sm:$0xff]  }
 0xc22   :  { %6406 = vmatmul.mubr.bf16.vlgmr.msra.gmra.mxu1 %v11473_v49  ;;  %v9761_v49 = vld [vmem:[#allocation14 + $0xec4] ss:$16 sps:$4 sm:$0xff]  }
 0xc23   :  { %7264 = vmatpush1.bf16.msra.mxu1 %v9753_v10  ;;  %v9764_v10 = vld [vmem:[#allocation14 + $0xccc] ss:$16 sps:$4 sm:$0xff]  }
 0xc24   :  { %7265 = vmatprep.subr.bf16.mxu1 %v9761_v49  ;;  %v9776_v49 = vld [vmem:[#allocation14 + $0xc8c] ss:$16 sps:$4 sm:$0xff]  }
 0xc27   :  { %7266 = vmatpush1.bf16.msra.mxu1 %v9759_v15  ;;  %v9768_v15 = vld [vmem:[#allocation14 + $0xca8] ss:$16 sps:$4 sm:$0xff]  }
 0xc28   :  { %7267 = vmatprep.subr.bf16.mxu1 %v9767_v2  ;;  %v9782_v2 = vld [vmem:[#allocation14 + $0xc6c] ss:$16 sps:$4 sm:$0xff]  }
 0xc2b   :  { %7268 = vmatpush1.bf16.msra.mxu1 %v9765_v26  ;;  %v9774_v26 = vld [vmem:[#allocation14 + $0xc88] ss:$16 sps:$4 sm:$0xff]  }
 0xc2c   :  { %7269 = vmatprep.subr.bf16.mxu1 %v9773_v3  ;;  %v9788_v3 = vld [vmem:[#allocation14 + $0xc4c] ss:$16 sps:$4 sm:$0xff]  }
 0xc2f   :  { %7270 = vmatpush1.bf16.msra.mxu1 %v9771_v34  ;;  %v9780_v34 = vld [vmem:[#allocation14 + $0xc68] ss:$16 sps:$4 sm:$0xff]  }
 0xc30   :  { %7271 = vmatprep.subr.bf16.mxu1 %v9779_v7  ;;  %v9794_v7 = vld [vmem:[#allocation14 + $0xc2c] ss:$16 sps:$4 sm:$0xff]  }
 0xc33   :  { %7272 = vmatpush1.bf16.msra.mxu1 %v9777_v14  ;;  %v9786_v14 = vld [vmem:[#allocation14 + $0xc48] ss:$16 sps:$4 sm:$0xff]  }
 0xc34   :  { %7273 = vmatprep.subr.bf16.mxu1 %v9785_v38  ;;  %v9800_v38 = vld [vmem:[#allocation14 + $0xc0c] ss:$16 sps:$4 sm:$0xff]  }
 0xc37   :  { %7274 = vmatpush1.bf16.msra.mxu1 %v9783_v22  ;;  %v9792_v22 = vld [vmem:[#allocation14 + $0xc28] ss:$16 sps:$4 sm:$0xff]  }
 0xc38   :  { %7275 = vmatprep.subr.bf16.mxu1 %v9791_v18  ;;  %v9806_v18 = vld [vmem:[#allocation14 + $0xdec] ss:$16 sps:$4 sm:$0xff]  }
 0xc3b   :  { %7276 = vmatpush1.bf16.msra.mxu1 %v9789_v55  ;;  %v9798_v55 = vld [vmem:[#allocation14 + $0xc08] ss:$16 sps:$4 sm:$0xff]  }
 0xc3c   :  { %7277 = vmatprep.subr.bf16.mxu1 %v9797_v31  ;;  %v9812_v31 = vld [vmem:[#allocation14 + $0xdcc] ss:$16 sps:$4 sm:$0xff]  }
 0xc3f   :  { %7278 = vmatpush1.bf16.msra.mxu1 %v9795_v62  ;;  %v9804_v62 = vld [vmem:[#allocation14 + $0xde8] ss:$16 sps:$4 sm:$0xff]  }
 0xc40   :  { %7279 = vmatprep.subr.bf16.mxu1 %v9803_v30  ;;  %v9818_v30 = vld [vmem:[#allocation14 + $0xdac] ss:$16 sps:$4 sm:$0xff]  }
 0xc43   :  { %7280 = vmatpush2.bf16.msra.mxu1 %v9801_v35  ;;  %v9810_v35 = vld [vmem:[#allocation14 + $0xdc8] ss:$16 sps:$4 sm:$0xff]  }
 0xc44   :  { %7281 = vmatprep.subr.bf16.mxu1 %v9809_v48  ;;  %v9824_v48 = vld [vmem:[#allocation14 + $0xd8c] ss:$16 sps:$4 sm:$0xff]  }
 0xc47   :  { %7282 = vmatpush2.bf16.msra.mxu1 %v9807_v43  ;;  %v9816_v43 = vld [vmem:[#allocation14 + $0xda8] ss:$16 sps:$4 sm:$0xff]  }
 0xc48   :  { %7283 = vmatprep.subr.bf16.mxu1 %v9815_v59  ;;  %v9822_v59 = vld [vmem:[#allocation14 + $0xd88] ss:$16 sps:$4 sm:$0xff]  }
 0xc4b   :  { %7284 = vmatpush2.bf16.msra.mxu1 %v9813_v47 }
 0xc4c   :  { %7285 = vmatprep.subr.bf16.mxu1 %v9821_v61 }
 0xc4f   :  { %7286 = vmatpush2.bf16.msra.mxu1 %v9819_v1  ;;  %v9830_v1 = vld [vmem:[#allocation14 + $0xd6c] ss:$16 sps:$4 sm:$0xff]  }
 0xc50   :  { %7287 = vmatprep.subr.bf16.mxu1 %v9827_v45  ;;  %v9836_v45 = vld [vmem:[#allocation14 + $0xd4c] ss:$16 sps:$4 sm:$0xff]  }
 0xc53   :  { %7288 = vmatpush2.bf16.msra.mxu1 %v9825_v63  ;;  %v9828_v63 = vld [vmem:[#allocation14 + $0xd68] ss:$16 sps:$4 sm:$0xff]  }
 0xc54   :  { %7289 = vmatprep.subr.bf16.mxu1 %v9833_v8 }
 0xc57   :  { %7290 = vmatpush2.bf16.msra.mxu1 %v9831_v28  ;;  %v5599_v28 = vrot.slane %v11478_v9, %v11617_v27 }
 0xc58   :  { %7291 = vmatprep.subr.bf16.mxu1 %v9839_v4  ;;  %v9834_v4 = vld [vmem:[#allocation14 + $0xd48] ss:$16 sps:$4 sm:$0xff]  }
 0xc5b   :  { %7292 = vmatpush2.bf16.msra.mxu1 %v9837_v12  ;;  %v5595_v12 = vrot.slane %v11478_v9, %v11618_v16  ;;  %v9846_v9 = vld [vmem:[#allocation14 + $0xd08] ss:$16 sps:$4 sm:$0xff]  }
 0xc5c   :  { %7293 = vmatprep.subr.bf16.mxu1 %v9845_v46 }
 0xc5f   :  { %7294 = vmatpush2.bf16.msra.mxu1 %v9843_v37  ;;  %v9842_v37 = vld [vmem:[#allocation14 + $0xd2c] ss:$16 sps:$4 sm:$0xff]  }
 0xc60   :  { %7349 = vmatprep.subr.bf16.mxu1 %v9851_v50 }
 0xc62   :  { %v6278_v24 = vpop.f32.mrf.mxu0 }
 0xc63   :  { %v6279_v53 = vadd.f32 %v6278_v24, %v5587_v0 }
 0xc64   :  { %v6280_v32 = vpop.f32.mrf.mxu0 }
 0xc65   :  { %v6281_v33 = vadd.f32 %v6280_v32, %v5591_v54 }
 0xc66   :  { %v6282_v25 = vpop.f32.mrf.mxu0 }
 0xc67   :  { %v6283_v44 = vadd.f32 %v6282_v25, %v5587_v0 }
 0xc68   :  { %v6284_v5 = vpop.f32.mrf.mxu0 }
 0xc69   :  { %v6285_v58 = vadd.f32 %v6284_v5, %v5591_v54  ;;  %v9840_v54 = vld [vmem:[#allocation14 + $0xd28] ss:$16 sps:$4 sm:$0xff]   ;;  %v9848_v5 = vld [vmem:[#allocation14 + $0xd0c] ss:$16 sps:$4 sm:$0xff]  }
 0xca2   :  { %v6321_v17 = vpop.f32.mrf.mxu1  ;;  %v6364_v47 = vpop.f32.mrf.mxu0 }
 0xca3   :  { %v6322_v52 = vadd.f32 %v6321_v17, %v6279_v53  ;;  %v6365_v0 = vadd.f32 %v6364_v47, %v5595_v12  ;;  %v9878_v47 = vld [vmem:[#allocation14 + $0xfcc] ss:$16 sps:$4 sm:$0xff]  }
 0xca4   :  { %v6323_v40 = vpop.f32.mrf.mxu1  ;;  %v6366_v61 = vpop.f32.mrf.mxu0 }
 0xca5   :  { %v6324_v20 = vadd.f32 %v6323_v40, %v6281_v33  ;;  %v6416_v11 = vmax.f32 %v6322_v52, 0.0  ;;  %v6367_v32 = vadd.f32 %v6366_v61, %v5599_v28  ;;  %v9879_v61 = vld [vmem:[#allocation14 + $0xfa8] ss:$16 sps:$4 sm:$0xff]  }
 0xca6   :  { %v6325_v56 = vpop.f32.mrf.mxu1  ;;  %v6368_v8 = vpop.f32.mrf.mxu0 }
 0xca7   :  { %v6326_v51 = vadd.f32 %v6325_v56, %v6283_v44  ;;  %v6417_v57 = vmax.f32 %v6324_v20, 0.0  ;;  %v6369_v25 = vadd.f32 %v6368_v8, %v5595_v12  ;;  %v9887_v8 = vld [vmem:[#allocation14 + $0xf6c] ss:$16 sps:$4 sm:$0xff]   ;;  %v9888_v12 = vld [vmem:[#allocation14 + $0xf48] ss:$16 sps:$4 sm:$0xff]  }
 0xca8   :  { %v6327_v41 = vpop.f32.mrf.mxu1  ;;  %v6370_v50 = vpop.f32.mrf.mxu0 }
 0xca9   :  { %v6328_v6 = vadd.f32 %v6327_v41, %v6285_v58  ;;  %v6420_v39 = vmax.f32 %v6326_v51, 0.0  ;;  %v6371_v40 = vadd.f32 %v6370_v50, %v5599_v28  ;;  %v9885_v28 = vld [vmem:[#allocation14 + $0xf68] ss:$16 sps:$4 sm:$0xff]   ;;  %v9896_v50 = vld [vmem:[#allocation14 + $0xf0c] ss:$16 sps:$4 sm:$0xff]  }
 0xcab   :  { %v6421_v23 = vmax.f32 %v6328_v6, 0.0  ;;  %v11484_v13 = vpack.c.bf16 %v6420_v39, %v6416_v11  ;;  %v9849_v39 = vld [vmem:[#allocation14 + $0xee8] ss:$16 sps:$4 sm:$0xff]  }
 0xcac   :  { %v9852_v11 = vld [vmem:[#allocation14 + $0xec8] ss:$16 sps:$4 sm:$0xff]  }
 0xcad   :  { %v6425_v21 = vpack.c.bf16 %v6421_v23, %v6417_v57  ;;  %v9854_v23 = vld [vmem:[#allocation14 + $0xecc] ss:$16 sps:$4 sm:$0xff]  }
 0xcaf   :  { %7252 = vmatprep.mubr.bf16.mxu0 %v6425_v21 }
 0xcb0   :  { %7253 = vmatmul.mubr.bf16.vlgmr.msra.gmra.mxu0 %v11484_v13 }
 0xcb1   :  { %7307 = vmatpush1.bf16.msra.mxu0 %v9756_v29  ;;  %7338 = vmatprep.mubr.bf16.mxu0 %v6425_v21  ;;  %v9857_v21 = vld [vmem:[#allocation14 + $0xeac] ss:$16 sps:$4 sm:$0xff]   ;;  %v9855_v29 = vld [vmem:[#allocation14 + $0xea8] ss:$16 sps:$4 sm:$0xff]  }
 0xcb2   :  { %7308 = vmatprep.subr.bf16.mxu0 %v9764_v10  ;;  %v9860_v10 = vld [vmem:[#allocation14 + $0xe8c] ss:$16 sps:$4 sm:$0xff]  }
 0xcb5   :  { %7309 = vmatpush1.bf16.msra.mxu0 %v9762_v60  ;;  %v9897_v60 = vld [vmem:[#allocation17 + $0x78] sm:$0xff]  }
 0xcb6   :  { %7310 = vmatprep.subr.bf16.mxu0 %v9770_v19  ;;  %v9898_v19 = vld [vmem:[#allocation17 + $0x38] sm:$0xff]  }
 0xcb9   :  { %7311 = vmatpush1.bf16.msra.mxu0 %v9768_v15  ;;  %v9899_v15 = vld [vmem:[#allocation17 + $0x70] sm:$0xff]  }
 0xcba   :  { %7312 = vmatprep.subr.bf16.mxu0 %v9776_v49  ;;  %v9858_v49 = vld [vmem:[#allocation14 + $0xe88] ss:$16 sps:$4 sm:$0xff]  }
 0xcbd   :  { %7313 = vmatpush1.bf16.msra.mxu0 %v9774_v26  ;;  %v9863_v26 = vld [vmem:[#allocation14 + $0xe6c] ss:$16 sps:$4 sm:$0xff]  }
 0xcbe   :  { %7314 = vmatprep.subr.bf16.mxu0 %v9782_v2  ;;  %v9900_v2 = vld [vmem:[#allocation17 + $0x30] sm:$0xff]  }
 0xcc1   :  { %7315 = vmatpush1.bf16.msra.mxu0 %v9780_v34  ;;  %v9861_v34 = vld [vmem:[#allocation14 + $0xe68] ss:$16 sps:$4 sm:$0xff]  }
 0xcc2   :  { %7316 = vmatprep.subr.bf16.mxu0 %v9788_v3  ;;  %v9866_v3 = vld [vmem:[#allocation14 + $0xe4c] ss:$16 sps:$4 sm:$0xff]  }
 0xcc5   :  { %7317 = vmatpush1.bf16.msra.mxu0 %v9786_v14  ;;  %v9902_v14 = vld [vmem:[#allocation17 + $0x28] sm:$0xff]  }
 0xcc6   :  { %7318 = vmatprep.subr.bf16.mxu0 %v9794_v7  ;;  %v9903_v7 = vld [vmem:[#allocation17 + $0x60] sm:$0xff]  }
 0xcc9   :  { %7319 = vmatpush1.bf16.msra.mxu0 %v9792_v22  ;;  %v9864_v22 = vld [vmem:[#allocation14 + $0xe48] ss:$16 sps:$4 sm:$0xff]  }
 0xcca   :  { %7320 = vmatprep.subr.bf16.mxu0 %v9800_v38  ;;  %v9869_v38 = vld [vmem:[#allocation14 + $0xe2c] ss:$16 sps:$4 sm:$0xff]  }
 0xccd   :  { %7321 = vmatpush1.bf16.msra.mxu0 %v9798_v55  ;;  %v9904_v55 = vld [vmem:[#allocation17 + $0x20] sm:$0xff]  }
 0xcce   :  { %7322 = vmatprep.subr.bf16.mxu0 %v9806_v18  ;;  %v9905_v18 = vld [vmem:[#allocation17 + $0x58] sm:$0xff]  }
 0xcd1   :  { %7323 = vmatpush2.bf16.msra.mxu0 %v9804_v62  ;;  %v9867_v62 = vld [vmem:[#allocation14 + $0xe28] ss:$16 sps:$4 sm:$0xff]  }
 0xcd2   :  { %7324 = vmatprep.subr.bf16.mxu0 %v9812_v31  ;;  %v9872_v31 = vld [vmem:[#allocation14 + $0xe0c] ss:$16 sps:$4 sm:$0xff]  }
 0xcd5   :  { %7325 = vmatpush2.bf16.msra.mxu0 %v9810_v35  ;;  %v9906_v35 = vld [vmem:[#allocation17 + $0x18] sm:$0xff]  }
 0xcd6   :  { %7326 = vmatprep.subr.bf16.mxu0 %v9818_v30  ;;  %v9870_v30 = vld [vmem:[#allocation14 + $0xe08] ss:$16 sps:$4 sm:$0xff]  }
 0xcd9   :  { %7327 = vmatpush2.bf16.msra.mxu0 %v9816_v43  ;;  %v9875_v43 = vld [vmem:[#allocation14 + $0xfec] ss:$16 sps:$4 sm:$0xff]  }
 0xcda   :  { %7328 = vmatprep.subr.bf16.mxu0 %v9824_v48  ;;  %v9873_v48 = vld [vmem:[#allocation14 + $0xfe8] ss:$16 sps:$4 sm:$0xff]  }
 0xcdd   :  { %7329 = vmatpush2.bf16.msra.mxu0 %v9822_v59  ;;  %v9876_v59 = vld [vmem:[#allocation14 + $0xfc8] ss:$16 sps:$4 sm:$0xff]  }
 0xcde   :  { %7330 = vmatprep.subr.bf16.mxu0 %v9830_v1  ;;  %v9881_v1 = vld [vmem:[#allocation14 + $0xfac] ss:$16 sps:$4 sm:$0xff]  }
 0xce1   :  { %7331 = vmatpush2.bf16.msra.mxu0 %v9828_v63  ;;  %v9884_v63 = vld [vmem:[#allocation14 + $0xf8c] ss:$16 sps:$4 sm:$0xff]  }
 0xce2   :  { %v6407_v46 = vpop.f32.mrf.mxu1  ;;  %7332 = vmatprep.subr.bf16.mxu0 %v9836_v45  ;;  %v9882_v45 = vld [vmem:[#allocation14 + $0xf88] ss:$16 sps:$4 sm:$0xff]  }
 0xce3   :  { %v6408_v53 = vadd.f32 %v6407_v46, %v6365_v0  ;;  %v9893_v46 = vld [vmem:[#allocation14 + $0xf2c] ss:$16 sps:$4 sm:$0xff]  }
 0xce4   :  { %v6409_v24 = vpop.f32.mrf.mxu1  ;;  %v9910_v0 = vld [vmem:[#allocation17 + $0x8] sm:$0xff]  }
 0xce5   :  { %7333 = vmatpush2.bf16.msra.mxu0 %v9834_v4  ;;  %v6410_v33 = vadd.f32 %v6409_v24, %v6367_v32  ;;  %v6418_v41 = vmax.f32 %v6408_v53, 0.0  ;;  %v9890_v4 = vld [vmem:[#allocation14 + $0xf4c] ss:$16 sps:$4 sm:$0xff]   ;;  %v9894_v24 = vld [vmem:[#allocation14 + $0xf08] ss:$16 sps:$4 sm:$0xff]   ;;  %v9907_v32 = vld [vmem:[#allocation17 + $0x50] sm:$0xff]  }
 0xce6   :  { %v6411_v17 = vpop.f32.mrf.mxu1  ;;  %7334 = vmatprep.subr.bf16.mxu0 %v9842_v37  ;;  %v9891_v37 = vld [vmem:[#allocation14 + $0xf28] ss:$16 sps:$4 sm:$0xff]   ;;  %v9916_v53 = vld [vmem:[#allocation17 + $0xb0] sm:$0xff]  }
 0xce7   :  { %v6412_v44 = vadd.f32 %v6411_v17, %v6369_v25  ;;  %v6419_v51 = vmax.f32 %v6410_v33, 0.0  ;;  %v9908_v25 = vld [vmem:[#allocation17 + $0x10] sm:$0xff]   ;;  %v9911_v17 = vld [vmem:[#allocation17 + $0x40] sm:$0xff]   ;;  %v9914_v33 = vld [vmem:[#allocation17 + $0xb8] sm:$0xff]  }
 0xce8   :  { %v6413_v56 = vpop.f32.mrf.mxu1 }
 0xce9   :  { %v6414_v58 = vadd.f32 %v6413_v56, %v6371_v40  ;;  %7335 = vmatpush2.bf16.msra.mxu0 %v9840_v54  ;;  %v6422_v20 = vmax.f32 %v6412_v44, 0.0  ;;  %v9909_v54 = vld [vmem:[#allocation17 + $0x48] sm:$0xff]   ;;  %v9913_v40 = vld [vmem:[#allocation17 + $0xf8] sm:$0xff]   ;;  %v9915_v44 = vld [vmem:[#allocation17 + $0xf0] sm:$0xff]  }
 0xcea   :  { %7336 = vmatprep.subr.bf16.mxu0 %v9848_v5  ;;  %v9912_v5 = vld [vmem:[#allocation17] sm:$0xff]   ;;  %v9917_v56 = vld [vmem:[#allocation17 + $0xe8] sm:$0xff]  }
 0xceb   :  { %v6423_v52 = vmax.f32 %v6414_v58, 0.0  ;;  %v11491_v57 = vpack.c.bf16 %v6422_v20, %v6418_v41  ;;  %v9918_v58 = vld [vmem:[#allocation17 + $0xa8] sm:$0xff]   ;;  %v9920_v20 = vld [vmem:[#allocation17 + $0xa0] sm:$0xff]   ;;  %v9923_v41 = vld [vmem:[#allocation17 + $0xd0] sm:$0xff]  }
 0xced   :  { %v6427_v6 = vpack.c.bf16 %v6423_v52, %v6419_v51  ;;  %7337 = vmatpush2.bf16.msra.mxu0 %v9846_v9  ;;  %v9919_v9 = vld [vmem:[#allocation17 + $0xe0] sm:$0xff]   ;;  %v9921_v51 = vld [vmem:[#allocation17 + $0xd8] sm:$0xff]  }
 0xcee   :  { %8666 = vmatprep.subr.bf16.mxu0 %v9897_v60  ;;  %v9922_v52 = vld [vmem:[#allocation17 + $0x98] sm:$0xff]  }
 0xcef   :  { %7295 = vmatprep.mubr.bf16.mxu1 %v6427_v6 }
 0xcf0   :  { %7296 = vmatmul.mubr.bf16.vlgmr.msra.gmra.mxu1 %v11491_v57  ;;  %7339 = vmatmul.mubr.bf16.vlgmr.msra.gmra.mxu0 %v11484_v13  ;;  %v9901_v13 = vld [vmem:[#allocation17 + $0x68] sm:$0xff]  }
 0xcf1   :  { %7350 = vmatpush1.bf16.msra.mxu1 %v9849_v39  ;;  %7381 = vmatprep.mubr.bf16.mxu1 %v6427_v6  ;;  %v9924_v6 = vld [vmem:[#allocation17 + $0x90] sm:$0xff]   ;;  %v9925_v39 = vld [vmem:[#allocation17 + $0xc8] sm:$0xff]  }
 0xcf2   :  { %7351 = vmatprep.subr.bf16.mxu1 %v9854_v23  ;;  %8667 = vmatpush3.bf16.msra.mxu0 %v9898_v19  ;;  %v9927_v23 = vld [vmem:[#allocation17 + $0xc0] sm:$0xff]  }
 0xcf3   :  { %8668 = vmatprep.subr.bf16.mxu0 %v9899_v15 }
 0xcf5   :  { %7352 = vmatpush1.bf16.msra.mxu1 %v9852_v11  ;;  %v9928_v11 = vld [vmem:[#allocation17 + $0x80] sm:$0xff]  }
 0xcf6   :  { %7353 = vmatprep.subr.bf16.mxu1 %v9857_v21  ;;  %8669 = vmatpush3.bf16.msra.mxu0 %v9900_v2 }
 0xcf7   :  { %8670 = vmatprep.subr.bf16.mxu0 %v9901_v13 }
 0xcf9   :  { %7354 = vmatpush1.bf16.msra.mxu1 %v9855_v29 }
 0xcfa   :  { %7355 = vmatprep.subr.bf16.mxu1 %v9860_v10  ;;  %8671 = vmatpush3.bf16.msra.mxu0 %v9902_v14  ;;  %v6558_v10 = vld [vmem:[#allocation16 + $0x3] ss:$4 sm:$0xf] }
 0xcfb   :  { %8672 = vmatprep.subr.bf16.mxu0 %v9903_v7  ;;  %v6567_v19 = vrot.slane %v6558_v10, %v11616_v42  ;;  %v6563_v15 = vrot.slane %v6558_v10, %v11615_v36 }
 0xcfd   :  { %7356 = vmatpush1.bf16.msra.mxu1 %v9858_v49 }
 0xcfe   :  { %7357 = vmatprep.subr.bf16.mxu1 %v9863_v26  ;;  %8673 = vmatpush3.bf16.msra.mxu0 %v9904_v55 }
 0xcff   :  { %8674 = vmatprep.subr.bf16.mxu0 %v9905_v18 }
 0xd01   :  { %7358 = vmatpush1.bf16.msra.mxu1 %v9861_v34 }
 0xd02   :  { %7359 = vmatprep.subr.bf16.mxu1 %v9866_v3  ;;  %8675 = vmatpush3.bf16.msra.mxu0 %v9906_v35 }
 0xd03   :  { %8676 = vmatprep.subr.bf16.mxu0 %v9907_v32 }
 0xd05   :  { %7360 = vmatpush1.bf16.msra.mxu1 %v9864_v22 }
 0xd06   :  { %7361 = vmatprep.subr.bf16.mxu1 %v9869_v38  ;;  %8677 = vmatpush3.bf16.msra.mxu0 %v9908_v25 }
 0xd07   :  { %8678 = vmatprep.subr.bf16.mxu0 %v9909_v54 }
 0xd09   :  { %7362 = vmatpush1.bf16.msra.mxu1 %v9867_v62 }
 0xd0a   :  { %7363 = vmatprep.subr.bf16.mxu1 %v9872_v31  ;;  %8679 = vmatpush3.bf16.msra.mxu0 %v9910_v0 }
 0xd0b   :  { %8680 = vmatprep.subr.bf16.mxu0 %v9911_v17 }
 0xd0d   :  { %7364 = vmatpush1.bf16.msra.mxu1 %v9870_v30 }
 0xd0e   :  { %7365 = vmatprep.subr.bf16.mxu1 %v9875_v43  ;;  %8681 = vmatpush3.bf16.msra.mxu0 %v9912_v5 }
 0xd11   :  { %7366 = vmatpush2.bf16.msra.mxu1 %v9873_v48 }
 0xd12   :  { %7367 = vmatprep.subr.bf16.mxu1 %v9878_v47 }
 0xd15   :  { %7368 = vmatpush2.bf16.msra.mxu1 %v9876_v59 }
 0xd16   :  { %7369 = vmatprep.subr.bf16.mxu1 %v9881_v1  ;;  %v6575_v1 = vrot.slane %v6558_v10, %v11617_v27 }
 0xd19   :  { %7370 = vmatpush2.bf16.msra.mxu1 %v9879_v61  ;;  %v6571_v61 = vrot.slane %v6558_v10, %v11618_v16 }
 0xd1a   :  { %7371 = vmatprep.subr.bf16.mxu1 %v9884_v63 }
 0xd1d   :  { %7372 = vmatpush2.bf16.msra.mxu1 %v9882_v45 }
 0xd1e   :  { %7373 = vmatprep.subr.bf16.mxu1 %v9887_v8 }
 0xd21   :  { %7374 = vmatpush2.bf16.msra.mxu1 %v9885_v28 }
 0xd22   :  { %7375 = vmatprep.subr.bf16.mxu1 %v9890_v4 }
 0xd25   :  { %7376 = vmatpush2.bf16.msra.mxu1 %v9888_v12 }
 0xd26   :  { %7377 = vmatprep.subr.bf16.mxu1 %v9893_v46 }
 0xd29   :  { %7378 = vmatpush2.bf16.msra.mxu1 %v9891_v37 }
 0xd2a   :  { %7379 = vmatprep.subr.bf16.mxu1 %v9896_v50 }
 0xd2d   :  { %7380 = vmatpush2.bf16.msra.mxu1 %v9894_v24 }
 0xd2e   :  { %8688 = vmatprep.subr.bf16.mxu1 %v9913_v40 }
 0xd30   :  { %7382 = vmatmul.mubr.bf16.vlgmr.msra.gmra.mxu1 %v11491_v57  ;;  %v9926_v57 = vld [vmem:[#allocation17 + $0x88] sm:$0xff]  }
 0xd31   :  { %8689 = vmatpush3.bf16.msra.mxu1 %v9914_v33 }
 0xd32   :  { %8690 = vmatprep.subr.bf16.mxu1 %v9915_v44 }
 0xd35   :  { %8691 = vmatpush3.bf16.msra.mxu1 %v9916_v53 }
 0xd36   :  { %8692 = vmatprep.subr.bf16.mxu1 %v9917_v56 }
 0xd39   :  { %8693 = vmatpush3.bf16.msra.mxu1 %v9918_v58  ;;  %v8631_v58 = vld [vmem:[#allocation19] ss:$0 sm:$0xff] }
 0xd3a   :  { %8694 = vmatprep.subr.bf16.mxu1 %v9919_v9 }
 0xd3d   :  { %8695 = vmatpush3.bf16.msra.mxu1 %v9920_v20 }
 0xd3e   :  { %8696 = vmatprep.subr.bf16.mxu1 %v9921_v51 }
 0xd41   :  { %8697 = vmatpush3.bf16.msra.mxu1 %v9922_v52 }
 0xd42   :  { %8698 = vmatprep.subr.bf16.mxu1 %v9923_v41 }
 0xd45   :  { %8699 = vmatpush3.bf16.msra.mxu1 %v9924_v6 }
 0xd46   :  { %8700 = vmatprep.subr.bf16.mxu1 %v9925_v39 }
 0xd49   :  { %8701 = vmatpush3.bf16.msra.mxu1 %v9926_v57 }
 0xd4a   :  { %8702 = vmatprep.subr.bf16.mxu1 %v9927_v23 }
 0xd4d   :  { %8703 = vmatpush3.bf16.msra.mxu1 %v9928_v11 }
 0xd70   :  { %v7254_v21 = vpop.f32.mrf.mxu0 }
 0xd71   :  { %v7255_v3 = vadd.f32 %v7254_v21, %v6563_v15 }
 0xd72   :  { %v7256_v29 = vpop.f32.mrf.mxu0 }
 0xd73   :  { %v7257_v13 = vadd.f32 %v7256_v29, %v6567_v19 }
 0xd74   :  { %v7258_v60 = vpop.f32.mrf.mxu0 }
 0xd75   :  { %v7259_v34 = vadd.f32 %v7258_v60, %v6563_v15 }
 0xd76   :  { %v7260_v26 = vpop.f32.mrf.mxu0 }
 0xd77   :  { %v7261_v7 = vadd.f32 %v7260_v26, %v6567_v19 }
 0xdb0   :  { %v7297_v49 = vpop.f32.mrf.mxu1  ;;  %v7340_v36 = vpop.f32.mrf.mxu0 }
 0xdb1   :  { %v7298_v55 = vadd.f32 %v7297_v49, %v7255_v3  ;;  %v7341_v12 = vadd.f32 %v7340_v36, %v6571_v61 }
 0xdb2   :  { %v7299_v2 = vpop.f32.mrf.mxu1  ;;  %v7342_v47 = vpop.f32.mrf.mxu0 }
 0xdb3   :  { %v7300_v22 = vadd.f32 %v7299_v2, %v7257_v13  ;;  %v7392_v43 = vmax.f32 %v7298_v55, 0.0  ;;  %v7343_v28 = vadd.f32 %v7342_v47, %v6575_v1 }
 0xdb4   :  { %v7301_v14 = vpop.f32.mrf.mxu1  ;;  %v7344_v59 = vpop.f32.mrf.mxu0 }
 0xdb5   :  { %v7302_v38 = vadd.f32 %v7301_v14, %v7259_v34  ;;  %v7393_v35 = vmax.f32 %v7300_v22, 0.0  ;;  %v7345_v4 = vadd.f32 %v7344_v59, %v6571_v61 }
 0xdb6   :  { %v7303_v18 = vpop.f32.mrf.mxu1  ;;  %v7346_v45 = vpop.f32.mrf.mxu0 }
 0xdb7   :  { %v7304_v62 = vadd.f32 %v7303_v18, %v7261_v7  ;;  %v7396_v31 = vmax.f32 %v7302_v38, 0.0  ;;  %v7347_v37 = vadd.f32 %v7346_v45, %v6575_v1 }
 0xdb9   :  { %v7397_v30 = vmax.f32 %v7304_v62, 0.0  ;;  %v7400_v48 = vpack.c.bf16 %v7396_v31, %v7392_v43 }
 0xdbb   :  { %v7401_v42 = vpack.c.bf16 %v7397_v30, %v7393_v35 }
 0xdbd   :  { %7699 = vmatprep.mubr.bf16.mxu0 %v7401_v42 }
 0xdbe   :  { %7700 = vmatmul.mubr.bf16.vlgmr.msra.gmra.mxu0 %v7400_v48 }
 0xdf0   :  { %v7383_v63 = vpop.f32.mrf.mxu1 }
 0xdf1   :  { %v7384_v32 = vadd.f32 %v7383_v63, %v7341_v12 }
 0xdf2   :  { %v7385_v8 = vpop.f32.mrf.mxu1 }
 0xdf3   :  { %v7386_v50 = vadd.f32 %v7385_v8, %v7343_v28  ;;  %v7394_v40 = vmax.f32 %v7384_v32, 0.0 }
 0xdf4   :  { %v7387_v46 = vpop.f32.mrf.mxu1 }
 0xdf5   :  { %v7388_v24 = vadd.f32 %v7387_v46, %v7345_v4  ;;  %v7395_v17 = vmax.f32 %v7386_v50, 0.0 }
 0xdf6   :  { %v7389_v25 = vpop.f32.mrf.mxu1 }
 0xdf7   :  { %v7390_v54 = vadd.f32 %v7389_v25, %v7347_v37  ;;  %v7398_v0 = vmax.f32 %v7388_v24, 0.0 }
 0xdf9   :  { %v7399_v5 = vmax.f32 %v7390_v54, 0.0  ;;  %v7402_v33 = vpack.c.bf16 %v7398_v0, %v7394_v40 }
 0xdfb   :  { %v7403_v27 = vpack.c.bf16 %v7399_v5, %v7395_v17 }
 0xdfd   :  { %7740 = vmatprep.mubr.bf16.mxu1 %v7403_v27 }
 0xdfe   :  { %7741 = vmatmul.mubr.bf16.vlgmr.msra.gmra.mxu1 %v7402_v33 }
 0xe7e   :  { %v8682_v16 = vpop.f32.mrf.mxu0 }
 0xe80   :  { %v8683_v44 = vpop.f32.mrf.mxu0 }
 0xe81   :  { %v8684_v56 = vadd.f32 %v8683_v44, %v8682_v16 }
 0xe82   :  { %v8685_v53 = vpop.f32.mrf.mxu0 }
 0xe83   :  { %v7702_v52 = vadd.f32 %v8684_v56, %v8631_v58 }
 0xe84   :  { %v8686_v9 = vpop.f32.mrf.mxu0 }
 0xe85   :  { %v8687_v41 = vadd.f32 %v8686_v9, %v8685_v53 }
 0xe87   :  { %v7705_v11 = vadd.f32 %v8687_v41, %v8631_v58 }
 0xebe   :  { %v8704_v20 = vpop.f32.mrf.mxu1 }
 0xec0   :  { %v8705_v51 = vpop.f32.mrf.mxu1 }
 0xec1   :  { %v8706_v6 = vadd.f32 %v8705_v51, %v8704_v20 }
 0xec2   :  { %v8707_v39 = vpop.f32.mrf.mxu1 }
 0xec3   :  { %v7743_v57 = vadd.f32 %v8706_v6, %v7702_v52 }
 0xec4   :  { %v8708_v23 = vpop.f32.mrf.mxu1 }
 0xec5   :  { %v8664_v21 = vmul.f32 -1.442695, %v7743_v57  ;;  %v8709_v29 = vadd.f32 %v8708_v23, %v8707_v39 }
 0xec7   :  { %10185 = vpow2.f32 %v8664_v21  ;;  %v7746_v10 = vadd.f32 %v8709_v29, %v7705_v11 }
 0xec9   :  { %v8665_v60 = vmul.f32 -1.442695, %v7746_v10 }
 0xecb   :  { %10187 = vpow2.f32 %v8665_v60 }
 0xed4   :  { %v10186_v19 = vpop.eup %10185 }
 0xed5   :  { %v7755_v15 = vadd.f32 1.0, %v10186_v19 }
 0xed7   :  { %10189 = vrcp.f32 %v7755_v15 }
 0xed8   :  { %v10188_v49 = vpop.eup %10187 }
 0xed9   :  { %v7756_v26 = vadd.f32 1.0, %v10188_v49 }
 0xedb   :  { %10191 = vrcp.f32 %v7756_v26 }
 0xee4   :  { %v10190_v2 = vpop.eup %10189 }
 0xee5   :  { %7761 = vst [vmem:[#allocation20] sm:$0xff] %v10190_v2 }
 0xee8   :  { %v10192_v13 = vpop.eup %10191 }
 0xee9   :  { %7762 = vst [vmem:[#allocation20 + $0x8] sm:$0xff] %v10192_v13 }
 0xeea   :  { %10486 = shalt.err (!%p10483_p3)
}
 0xeeb   :  { %s10526_s10 = smov 128   ;;  %s10527_s19 = smov 8  }
 0xeec   :  { %7774 = dma.vmem_to_hbm [thread:$0]  %s7769_s17, 256, %s11515_s12, [#allocation4], %s10526_s10, %s10526_s10, %s10527_s19  }
 0xeed   :  { %10507 = dma.done.wait [#allocation4], 256  }
 0xeee   :  { %10508 = vsyncadd [#allocation4], 4294967040 }
 0xeef   :  { %7778 = vsyncpa [#allocation3], 1 }
 0xef0   :  { %7779 = vsyncpa [#allocation6], 1 }
 0xef1   :  { %7780 = vsyncpa [#allocation9], 1 }
 0xef2   :  { %7781 = vsyncpa [#allocation12], 1 }
 0xef3   :  { %7782 = vsyncpa [#allocation15], 1 }
 0xef4   :  { %7783 = vsyncpa [#allocation18], 1 }
 0xef5   :  { %7784 = vsyncpa [#allocation4], 1 }

</bundles_post_ra>
